<compile_context>
chip_gen: v6e
topology: v6e:2x2x1
jax: 0.10.0
libtpu: 0.0.40
codegen_flags: <defaults>
</compile_context>

<pallas_src>
import functools

import numpy as np
import jax
import jax.numpy as jnp
from jax.experimental import pallas as pl
from jax.experimental.pallas import tpu as pltpu  # noqa: F401 (TPU backend)

BN_EPS = 1e-5
NF = 64          # ResCNN base width (the model hard-codes ResCNN(64))
EMB = 2 * NF     # embedding width per stream (block4 output channels)


# ----------------------------- Pallas kernel --------------------------------

def fused_forward_kernel(x_nlc_ref, x_wav_ref, whl_ref, bhl_ref, phl_ref,
                         w1_ref, w2_ref, w3_ref, wsc_ref, scs_ref, sct_ref,
                         wb2_ref, s2_ref, t2_ref,
                         wb3_ref, s3_ref, t3_ref,
                         wb4_ref, s4_ref, t4_ref,
                         ow_ref, ob_ref,
                         xout_ref, out_ref, *, B, S):
    Sh = S // 2
    C = NF

    def conv(x3, w_ref, s, k, scale_ref=None, shift_ref=None):
        """Same-padded Conv1d as K per-tap MXU dots with bf16 operands and f32
        accumulation, optionally fused with a per-channel affine (eval-mode BN).

        x3: (N, L, Cin) f32 channels-last activations (in vregs/VMEM).
        w_ref: (2, K, Cin, Cout) bf16 stacked per-stream per-tap weights.
        """
        N, L, Cin = x3.shape
        Cout = w_ref.shape[-1]
        if k > 1:
            pad_l, pad_r = (k - 1) // 2, k // 2    # ConstantPad1d((k-1)//2, k//2)
            xp = jnp.concatenate(
                [jnp.zeros((N, pad_l, Cin), jnp.float32), x3,
                 jnp.zeros((N, pad_r, Cin), jnp.float32)], axis=1)
        else:
            xp = x3
        acc = jnp.zeros((N * L, Cout), jnp.float32)
        for i in range(k):
            tap = xp[:, i:i + L, :].reshape(N * L, Cin).astype(jnp.bfloat16)
            acc = acc + jnp.dot(tap, w_ref[s, i],
                                preferred_element_type=jnp.float32)
        if scale_ref is not None:
            acc = acc * scale_ref[s] + shift_ref[s]
        return acc.reshape(N, L, Cout)

    def rescnn(x3, s):
        # _ResCNNBlock: 3 bare convs + (1x1 conv + BN) shortcut, add, ReLU.
        h = conv(x3, w1_ref, s, 7)
        h = conv(h, w2_ref, s, 5)
        h = conv(h, w3_ref, s, 3)
        sc = conv(x3, wsc_ref, s, 1, scs_ref, sct_ref)
        h = jnp.maximum(h + sc, 0.0)
        # block2 (conv + BN) + LeakyReLU(0.2)
        h = conv(h, wb2_ref, s, 3, s2_ref, t2_ref)
        h = jnp.where(h > 0, h, 0.2 * h)
        # block3 (conv + BN) + PReLU
        # TODO(synk): PReLU slope is fixed at the 0.25 init value; a learned
        # per-model slope would need to be plumbed in for trained weights.
        h = conv(h, wb3_ref, s, 3, s3_ref, t3_ref)
        h = jnp.where(h > 0, h, 0.25 * h)
        # block4 (conv + BN) + ELU(alpha=0.3)
        h = conv(h, wb4_ref, s, 3, s4_ref, t4_ref)
        h = jnp.where(h > 0, h, 0.3 * (jnp.exp(h) - 1.0))
        # AdaptiveAvgPool1d(1) + Squeeze(-1): mean over the length axis.
        return jnp.mean(h, axis=1)                           # (N, EMB)

    # ---- Stream 0: raw input through ResCNN_x -------------------------------
    emb_x = rescnn(x_nlc_ref[...], 0)                        # (B, EMB)

    # ---- Stream 1: mWDN wavelet, fully batched ------------------------------
    # a = sigmoid([W_H; W_L] @ x + [b_H; b_L]);  AvgPool1d(2) via constant
    # matrix phl whose output is already [xh ; xl] rows, length-major.
    xw = x_wav_ref[...].astype(jnp.bfloat16)                 # (S, B*C)
    a = jax.nn.sigmoid(
        jnp.dot(whl_ref[...], xw, preferred_element_type=jnp.float32)
        + bhl_ref[...])                                      # (2S, B*C) f32
    pooled = jnp.dot(phl_ref[...], a.astype(jnp.bfloat16),
                     preferred_element_type=jnp.float32)     # (S, B*C) f32

    # xh / xl share ResCNN_x1 weights: stack them on the batch axis, run once.
    parts = ([pooled[0:Sh, b * C:(b + 1) * C] for b in range(B)] +    # xh
             [pooled[Sh:S, b * C:(b + 1) * C] for b in range(B)])     # xl
    stacked = jnp.stack(parts, axis=0)                       # (2B, Sh, C)
    emb1 = rescnn(stacked, 1)                                # (2B, EMB)
    emb_h = emb1[0:B]
    emb_l = emb1[B:2 * B]

    # ---- Head: x_out and final Linear over [emb_x | emb_h | emb_l] ----------
    xout_ref[...] = emb_x
    out_ref[...] = (
        jnp.dot(emb_x, ow_ref[0], preferred_element_type=jnp.float32)
        + jnp.dot(emb_h, ow_ref[1], preferred_element_type=jnp.float32)
        + jnp.dot(emb_l, ow_ref[2], preferred_element_type=jnp.float32)
        + ob_ref[...])


# ------------------------------- wrapper -------------------------------------

def wavelet1_rescnn_forward(x, params):
    """x: (B, 64, S) float32 in PyTorch NCL layout.  Returns (x_out, output)."""
    B, C, S = x.shape
    assert C == NF, "ResCNN(64) hard-codes 64 input channels"
    assert S % 2 == 0, "AvgPool1d(2) needs an even seq_len"
    A = params["out_w"].shape[-1]

    # Two tiny boundary relayouts; everything else stays on-chip in the kernel.
    x_nlc = jnp.transpose(x, (0, 2, 1))                      # (B, S, C)  ResCNN_x
    x_wav = jnp.transpose(x, (2, 0, 1)).reshape(S, B * C)    # (S, B*C)   wavelet

    args = [x_nlc, x_wav, params["whl"], params["bhl"], params["phl"],
            params["w1"], params["w2"], params["w3"], params["wsc"],
            params["sc_scale"], params["sc_shift"],
            params["wb2"], params["b2_scale"], params["b2_shift"],
            params["wb3"], params["b3_scale"], params["b3_shift"],
            params["wb4"], params["b4_scale"], params["b4_shift"],
            params["out_w"], params["out_b"]]

    # Advisory cost estimate so XLA can overlap the custom call.
    nl0, nl1 = B * S, 2 * B * (S // 2)
    per_row_flops = 2 * (7 * 64 * 64 + 5 * 64 * 64 + 3 * 64 * 64 + 1 * 64 * 64
                         + 3 * 64 * 128 + 3 * 128 * 256 + 3 * 256 * 128)
    flops = ((nl0 + nl1) * per_row_flops
             + 2 * (2 * S) * S * (B * C)        # wavelet matmul
             + 2 * S * (2 * S) * (B * C)        # avgpool matmul
             + 2 * B * 3 * EMB * A)             # head
    transcendentals = (2 * S) * (B * C) + (nl0 + nl1) * EMB
    bytes_accessed = (sum(int(a.size) * a.dtype.itemsize for a in args)
                      + B * EMB * 4 + B * A * 4)

    x_out, output = pl.pallas_call(
        functools.partial(fused_forward_kernel, B=B, S=S),
        out_shape=(jax.ShapeDtypeStruct((B, EMB), jnp.float32),
                   jax.ShapeDtypeStruct((B, A), jnp.float32)),
        cost_estimate=pl.CostEstimate(flops=int(flops),
                                      transcendentals=int(transcendentals),
                                      bytes_accessed=int(bytes_accessed)),
    )(*args)
    return x_out, output


# ----------------------------- parameter init --------------------------------

def init_params(seq_len, activity_num, key):
    # mWDN wavelet filters and W init (matches the PyTorch create_W()).
    l_filter = np.array([-0.0106, 0.0329, 0.0308, -0.187,
                         -0.028, 0.6309, 0.7148, 0.2304])
    h_filter = np.array([-0.2304, 0.7148, -0.6309, -0.028,
                         0.187, 0.0308, -0.0329, -0.0106])
    rng = np.random.default_rng(0)

    def create_W(P, filt):
        max_eps = np.min(np.abs(filt))
        w = rng.standard_normal((P, P)) * 0.1 * max_eps
        for i in range(P):
            fi = 0
            for j in range(i, P):
                if fi < len(filt):
                    w[i, j] = filt[fi]
                    fi += 1
        return w

    S, Sh = seq_len, seq_len // 2
    W_H = create_W(S, h_filter)
    W_L = create_W(S, l_filter)
    whl = np.concatenate([W_H, W_L], axis=0).astype(np.float32)      # (2S, S)

    # AvgPool1d(2) over the stacked [H | L] rows, outputs [xh ; xl] rows.
    phl = np.zeros((S, 2 * S), np.float32)
    for j in range(Sh):
        phl[j, 2 * j] = phl[j, 2 * j + 1] = 0.5
        phl[Sh + j, S + 2 * j] = phl[Sh + j, S + 2 * j + 1] = 0.5

    ks = iter(jax.random.split(key, 64))

    def nrm(shape, scale=0.05):
        return scale * jax.random.normal(next(ks), shape, jnp.float32)

    def conv_w(k, cin, cout):
        # PyTorch Conv1d weight [Cout, Cin, K] -> transpose(2,1,0) -> (K,Cin,Cout)
        return nrm((k, cin, cout))

    def rescnn_set(c_in=NF, nf=NF):
        return dict(
            w1=conv_w(7, c_in, nf), w2=conv_w(5, nf, nf), w3=conv_w(3, nf, nf),
            wsc=conv_w(1, c_in, nf),
            sc_g=1.0 + nrm((nf,), 0.1), sc_b=nrm((nf,), 0.1),
            wb2=conv_w(3, nf, 2 * nf),
            b2_g=1.0 + nrm((2 * nf,), 0.1), b2_b=nrm((2 * nf,), 0.1),
            wb3=conv_w(3, 2 * nf, 4 * nf),
            b3_g=1.0 + nrm((4 * nf,), 0.1), b3_b=nrm((4 * nf,), 0.1),
            wb4=conv_w(3, 4 * nf, 2 * nf),
            b4_g=1.0 + nrm((2 * nf,), 0.1), b4_b=nrm((2 * nf,), 0.1),
        )

    px, p1 = rescnn_set(), rescnn_set()   # ResCNN_x, ResCNN_x1

    def stack_w(name):
        # bf16 weights: native-rate MXU + half the DMA / VMEM footprint.
        return jnp.stack([px[name], p1[name]], axis=0).astype(jnp.bfloat16)

    def bn_affine(g, b):
        # TODO(synk): BatchNorm1d is modeled in eval mode with as-constructed
        # running stats (mean=0, var=1); training-mode batch statistics are
        # not modeled.  For trained weights, fold real running_mean/var here.
        scale = g / jnp.sqrt(1.0 + BN_EPS)
        return scale.reshape(1, -1), b.reshape(1, -1)

    def stack_affine(gname, bname):
        sx, tx = bn_affine(px[gname], px[bname])
        s1, t1 = bn_affine(p1[gname], p1[bname])
        return jnp.stack([sx, s1], axis=0), jnp.stack([tx, t1], axis=0)

    sc_s, sc_t = stack_affine("sc_g", "sc_b")
    b2_s, b2_t = stack_affine("b2_g", "b2_b")
    b3_s, b3_t = stack_affine("b3_g", "b3_b")
    b4_s, b4_t = stack_affine("b4_g", "b4_b")

    return {
        "whl": jnp.asarray(whl).astype(jnp.bfloat16),     # (2S, S): [W_H; W_L]
        "bhl": nrm((2 * S, 1), 0.01),                     # [b_H; b_L] column, f32
        "phl": jnp.asarray(phl).astype(jnp.bfloat16),     # (S, 2S) pool matrix
        "w1": stack_w("w1"), "w2": stack_w("w2"), "w3": stack_w("w3"),
        "wsc": stack_w("wsc"), "sc_scale": sc_s, "sc_shift": sc_t,
        "wb2": stack_w("wb2"), "b2_scale": b2_s, "b2_shift": b2_t,
        "wb3": stack_w("wb3"), "b3_scale": b3_s, "b3_shift": b3_t,
        "wb4": stack_w("wb4"), "b4_scale": b4_s, "b4_shift": b4_t,
        # LazyLinear(3*EMB -> A) as three (EMB, A) slabs; bias (1, A).
        "out_w": nrm((3, EMB, activity_num)),
        "out_b": nrm((1, activity_num), 0.01),
    }


# --------------------------------- main --------------------------------------

if __name__ == "__main__":
    # ResCNN(64) hard-codes 64 input channels; small seq_len=16, batch=2.
    B, C, S, A = 2, 64, 16, 6
    key = jax.random.PRNGKey(0)
    kx, kp = jax.random.split(key)
    x = jax.random.normal(kx, (B, C, S), jnp.float32)   # PyTorch NCL input layout
    params = init_params(S, A, kp)

    fwd = jax.jit(wavelet1_rescnn_forward)
    x_out, output = fwd(x, params)
    jax.block_until_ready((x_out, output))
    assert x_out.shape == (B, EMB), x_out.shape
    assert output.shape == (B, A), output.shape
    assert bool(jnp.all(jnp.isfinite(x_out))) and bool(jnp.all(jnp.isfinite(output)))
    print("KERNEL_OK")
</pallas_src>

<mosaic_0001>
module attributes {stable_mosaic.version = 11 : i64} {
  func.func @fused_forward_kernel(%arg0: memref<2x16x64xf32, #tpu.memory_space<vmem>>, %arg1: memref<16x128xf32, #tpu.memory_space<vmem>>, %arg2: memref<32x16xbf16, #tpu.memory_space<vmem>>, %arg3: memref<32x1xf32, #tpu.memory_space<vmem>>, %arg4: memref<16x32xbf16, #tpu.memory_space<vmem>>, %arg5: memref<2x7x64x64xbf16, #tpu.memory_space<vmem>>, %arg6: memref<2x5x64x64xbf16, #tpu.memory_space<vmem>>, %arg7: memref<2x3x64x64xbf16, #tpu.memory_space<vmem>>, %arg8: memref<2x1x64x64xbf16, #tpu.memory_space<vmem>>, %arg9: memref<2x1x64xf32, #tpu.memory_space<vmem>>, %arg10: memref<2x1x64xf32, #tpu.memory_space<vmem>>, %arg11: memref<2x3x64x128xbf16, #tpu.memory_space<vmem>>, %arg12: memref<2x1x128xf32, #tpu.memory_space<vmem>>, %arg13: memref<2x1x128xf32, #tpu.memory_space<vmem>>, %arg14: memref<2x3x128x256xbf16, #tpu.memory_space<vmem>>, %arg15: memref<2x1x256xf32, #tpu.memory_space<vmem>>, %arg16: memref<2x1x256xf32, #tpu.memory_space<vmem>>, %arg17: memref<2x3x256x128xbf16, #tpu.memory_space<vmem>>, %arg18: memref<2x1x128xf32, #tpu.memory_space<vmem>>, %arg19: memref<2x1x128xf32, #tpu.memory_space<vmem>>, %arg20: memref<3x128x6xf32, #tpu.memory_space<vmem>>, %arg21: memref<1x6xf32, #tpu.memory_space<vmem>>, %arg22: memref<2x128xf32, #tpu.memory_space<vmem>>, %arg23: memref<2x6xf32, #tpu.memory_space<vmem>>) attributes {dimension_semantics = [], scalar_prefetch = 0 : i64, scratch_operands = 0 : i64, tpu.core_type = #tpu.core_type<tc>} {
    %c0 = arith.constant 0 : index
    %c0_0 = arith.constant 0 : index
    %c0_1 = arith.constant 0 : index
    %0 = vector.load %arg0[%c0, %c0_0, %c0_1] : memref<2x16x64xf32, #tpu.memory_space<vmem>>, vector<2x16x64xf32>
    %cst = arith.constant 0.000000e+00 : f32
    %1 = vector.broadcast %cst : f32 to vector<2x3x64xf32>
    %cst_2 = arith.constant 0.000000e+00 : f32
    %2 = vector.broadcast %cst_2 : f32 to vector<2x3x64xf32>
    %3 = tpu.concatenate %1, %0, %2 in 1 : vector<2x3x64xf32>, vector<2x16x64xf32>, vector<2x3x64xf32> -> vector<2x22x64xf32>
    %cst_3 = arith.constant 0.000000e+00 : f32
    %4 = vector.broadcast %cst_3 : f32 to vector<32x64xf32>
    %5 = vector.extract_strided_slice %3 {offsets = [0, 0, 0], sizes = [2, 16, 64], strides = [1, 1, 1]} : vector<2x22x64xf32> to vector<2x16x64xf32>
    %6 = vector.shape_cast %5 : vector<2x16x64xf32> to vector<32x64xf32>
    %7 = arith.truncf %6 : vector<32x64xf32> to vector<32x64xbf16>
    %c0_4 = arith.constant 0 : index
    %c0_5 = arith.constant 0 : index
    %c0_6 = arith.constant 0 : index
    %c0_7 = arith.constant 0 : index
    %8 = vector.load %arg5[%c0_4, %c0_5, %c0_6, %c0_7] : memref<2x7x64x64xbf16, #tpu.memory_space<vmem>>, vector<1x1x64x64xbf16>
    %9 = vector.shape_cast %8 : vector<1x1x64x64xbf16> to vector<64x64xbf16>
    %cst_8 = arith.constant dense<0.000000e+00> : vector<32x64xf32>
    %10 = tpu.matmul %7, %9, %cst_8 {dimension_numbers = #tpu.dot_dimension_numbers<[1], [0], [0], [1], [0, 0, 1, 1], [], []>} : vector<32x64xbf16>, vector<64x64xbf16>, vector<32x64xf32> -> vector<32x64xf32>
    %11 = arith.addf %4, %10 : vector<32x64xf32>
    %12 = vector.extract_strided_slice %3 {offsets = [0, 1, 0], sizes = [2, 16, 64], strides = [1, 1, 1]} : vector<2x22x64xf32> to vector<2x16x64xf32>
    %13 = vector.shape_cast %12 : vector<2x16x64xf32> to vector<32x64xf32>
    %14 = arith.truncf %13 : vector<32x64xf32> to vector<32x64xbf16>
    %c0_9 = arith.constant 0 : index
    %c1 = arith.constant 1 : index
    %c0_10 = arith.constant 0 : index
    %c0_11 = arith.constant 0 : index
    %15 = vector.load %arg5[%c0_9, %c1, %c0_10, %c0_11] : memref<2x7x64x64xbf16, #tpu.memory_space<vmem>>, vector<1x1x64x64xbf16>
    %16 = vector.shape_cast %15 : vector<1x1x64x64xbf16> to vector<64x64xbf16>
    %cst_12 = arith.constant dense<0.000000e+00> : vector<32x64xf32>
    %17 = tpu.matmul %14, %16, %cst_12 {dimension_numbers = #tpu.dot_dimension_numbers<[1], [0], [0], [1], [0, 0, 1, 1], [], []>} : vector<32x64xbf16>, vector<64x64xbf16>, vector<32x64xf32> -> vector<32x64xf32>
    %18 = arith.addf %11, %17 : vector<32x64xf32>
    %19 = vector.extract_strided_slice %3 {offsets = [0, 2, 0], sizes = [2, 16, 64], strides = [1, 1, 1]} : vector<2x22x64xf32> to vector<2x16x64xf32>
    %20 = vector.shape_cast %19 : vector<2x16x64xf32> to vector<32x64xf32>
    %21 = arith.truncf %20 : vector<32x64xf32> to vector<32x64xbf16>
    %c0_13 = arith.constant 0 : index
    %c2 = arith.constant 2 : index
    %c0_14 = arith.constant 0 : index
    %c0_15 = arith.constant 0 : index
    %22 = vector.load %arg5[%c0_13, %c2, %c0_14, %c0_15] : memref<2x7x64x64xbf16, #tpu.memory_space<vmem>>, vector<1x1x64x64xbf16>
    %23 = vector.shape_cast %22 : vector<1x1x64x64xbf16> to vector<64x64xbf16>
    %cst_16 = arith.constant dense<0.000000e+00> : vector<32x64xf32>
    %24 = tpu.matmul %21, %23, %cst_16 {dimension_numbers = #tpu.dot_dimension_numbers<[1], [0], [0], [1], [0, 0, 1, 1], [], []>} : vector<32x64xbf16>, vector<64x64xbf16>, vector<32x64xf32> -> vector<32x64xf32>
    %25 = arith.addf %18, %24 : vector<32x64xf32>
    %26 = vector.extract_strided_slice %3 {offsets = [0, 3, 0], sizes = [2, 16, 64], strides = [1, 1, 1]} : vector<2x22x64xf32> to vector<2x16x64xf32>
    %27 = vector.shape_cast %26 : vector<2x16x64xf32> to vector<32x64xf32>
    %28 = arith.truncf %27 : vector<32x64xf32> to vector<32x64xbf16>
    %c0_17 = arith.constant 0 : index
    %c3 = arith.constant 3 : index
    %c0_18 = arith.constant 0 : index
    %c0_19 = arith.constant 0 : index
    %29 = vector.load %arg5[%c0_17, %c3, %c0_18, %c0_19] : memref<2x7x64x64xbf16, #tpu.memory_space<vmem>>, vector<1x1x64x64xbf16>
    %30 = vector.shape_cast %29 : vector<1x1x64x64xbf16> to vector<64x64xbf16>
    %cst_20 = arith.constant dense<0.000000e+00> : vector<32x64xf32>
    %31 = tpu.matmul %28, %30, %cst_20 {dimension_numbers = #tpu.dot_dimension_numbers<[1], [0], [0], [1], [0, 0, 1, 1], [], []>} : vector<32x64xbf16>, vector<64x64xbf16>, vector<32x64xf32> -> vector<32x64xf32>
    %32 = arith.addf %25, %31 : vector<32x64xf32>
    %33 = vector.extract_strided_slice %3 {offsets = [0, 4, 0], sizes = [2, 16, 64], strides = [1, 1, 1]} : vector<2x22x64xf32> to vector<2x16x64xf32>
    %34 = vector.shape_cast %33 : vector<2x16x64xf32> to vector<32x64xf32>
    %35 = arith.truncf %34 : vector<32x64xf32> to vector<32x64xbf16>
    %c0_21 = arith.constant 0 : index
    %c4 = arith.constant 4 : index
    %c0_22 = arith.constant 0 : index
    %c0_23 = arith.constant 0 : index
    %36 = vector.load %arg5[%c0_21, %c4, %c0_22, %c0_23] : memref<2x7x64x64xbf16, #tpu.memory_space<vmem>>, vector<1x1x64x64xbf16>
    %37 = vector.shape_cast %36 : vector<1x1x64x64xbf16> to vector<64x64xbf16>
    %cst_24 = arith.constant dense<0.000000e+00> : vector<32x64xf32>
    %38 = tpu.matmul %35, %37, %cst_24 {dimension_numbers = #tpu.dot_dimension_numbers<[1], [0], [0], [1], [0, 0, 1, 1], [], []>} : vector<32x64xbf16>, vector<64x64xbf16>, vector<32x64xf32> -> vector<32x64xf32>
    %39 = arith.addf %32, %38 : vector<32x64xf32>
    %40 = vector.extract_strided_slice %3 {offsets = [0, 5, 0], sizes = [2, 16, 64], strides = [1, 1, 1]} : vector<2x22x64xf32> to vector<2x16x64xf32>
    %41 = vector.shape_cast %40 : vector<2x16x64xf32> to vector<32x64xf32>
    %42 = arith.truncf %41 : vector<32x64xf32> to vector<32x64xbf16>
    %c0_25 = arith.constant 0 : index
    %c5 = arith.constant 5 : index
    %c0_26 = arith.constant 0 : index
    %c0_27 = arith.constant 0 : index
    %43 = vector.load %arg5[%c0_25, %c5, %c0_26, %c0_27] : memref<2x7x64x64xbf16, #tpu.memory_space<vmem>>, vector<1x1x64x64xbf16>
    %44 = vector.shape_cast %43 : vector<1x1x64x64xbf16> to vector<64x64xbf16>
    %cst_28 = arith.constant dense<0.000000e+00> : vector<32x64xf32>
    %45 = tpu.matmul %42, %44, %cst_28 {dimension_numbers = #tpu.dot_dimension_numbers<[1], [0], [0], [1], [0, 0, 1, 1], [], []>} : vector<32x64xbf16>, vector<64x64xbf16>, vector<32x64xf32> -> vector<32x64xf32>
    %46 = arith.addf %39, %45 : vector<32x64xf32>
    %47 = vector.extract_strided_slice %3 {offsets = [0, 6, 0], sizes = [2, 16, 64], strides = [1, 1, 1]} : vector<2x22x64xf32> to vector<2x16x64xf32>
    %48 = vector.shape_cast %47 : vector<2x16x64xf32> to vector<32x64xf32>
    %49 = arith.truncf %48 : vector<32x64xf32> to vector<32x64xbf16>
    %c0_29 = arith.constant 0 : index
    %c6 = arith.constant 6 : index
    %c0_30 = arith.constant 0 : index
    %c0_31 = arith.constant 0 : index
    %50 = vector.load %arg5[%c0_29, %c6, %c0_30, %c0_31] : memref<2x7x64x64xbf16, #tpu.memory_space<vmem>>, vector<1x1x64x64xbf16>
    %51 = vector.shape_cast %50 : vector<1x1x64x64xbf16> to vector<64x64xbf16>
    %cst_32 = arith.constant dense<0.000000e+00> : vector<32x64xf32>
    %52 = tpu.matmul %49, %51, %cst_32 {dimension_numbers = #tpu.dot_dimension_numbers<[1], [0], [0], [1], [0, 0, 1, 1], [], []>} : vector<32x64xbf16>, vector<64x64xbf16>, vector<32x64xf32> -> vector<32x64xf32>
    %53 = arith.addf %46, %52 : vector<32x64xf32>
    %54 = vector.shape_cast %53 : vector<32x64xf32> to vector<2x16x64xf32>
    %cst_33 = arith.constant 0.000000e+00 : f32
    %55 = vector.broadcast %cst_33 : f32 to vector<2x2x64xf32>
    %cst_34 = arith.constant 0.000000e+00 : f32
    %56 = vector.broadcast %cst_34 : f32 to vector<2x2x64xf32>
    %57 = tpu.concatenate %55, %54, %56 in 1 : vector<2x2x64xf32>, vector<2x16x64xf32>, vector<2x2x64xf32> -> vector<2x20x64xf32>
    %cst_35 = arith.constant 0.000000e+00 : f32
    %58 = vector.broadcast %cst_35 : f32 to vector<32x64xf32>
    %59 = vector.extract_strided_slice %57 {offsets = [0, 0, 0], sizes = [2, 16, 64], strides = [1, 1, 1]} : vector<2x20x64xf32> to vector<2x16x64xf32>
    %60 = vector.shape_cast %59 : vector<2x16x64xf32> to vector<32x64xf32>
    %61 = arith.truncf %60 : vector<32x64xf32> to vector<32x64xbf16>
    %c0_36 = arith.constant 0 : index
    %c0_37 = arith.constant 0 : index
    %c0_38 = arith.constant 0 : index
    %c0_39 = arith.constant 0 : index
    %62 = vector.load %arg6[%c0_36, %c0_37, %c0_38, %c0_39] : memref<2x5x64x64xbf16, #tpu.memory_space<vmem>>, vector<1x1x64x64xbf16>
    %63 = vector.shape_cast %62 : vector<1x1x64x64xbf16> to vector<64x64xbf16>
    %cst_40 = arith.constant dense<0.000000e+00> : vector<32x64xf32>
    %64 = tpu.matmul %61, %63, %cst_40 {dimension_numbers = #tpu.dot_dimension_numbers<[1], [0], [0], [1], [0, 0, 1, 1], [], []>} : vector<32x64xbf16>, vector<64x64xbf16>, vector<32x64xf32> -> vector<32x64xf32>
    %65 = arith.addf %58, %64 : vector<32x64xf32>
    %66 = vector.extract_strided_slice %57 {offsets = [0, 1, 0], sizes = [2, 16, 64], strides = [1, 1, 1]} : vector<2x20x64xf32> to vector<2x16x64xf32>
    %67 = vector.shape_cast %66 : vector<2x16x64xf32> to vector<32x64xf32>
    %68 = arith.truncf %67 : vector<32x64xf32> to vector<32x64xbf16>
    %c0_41 = arith.constant 0 : index
    %c1_42 = arith.constant 1 : index
    %c0_43 = arith.constant 0 : index
    %c0_44 = arith.constant 0 : index
    %69 = vector.load %arg6[%c0_41, %c1_42, %c0_43, %c0_44] : memref<2x5x64x64xbf16, #tpu.memory_space<vmem>>, vector<1x1x64x64xbf16>
    %70 = vector.shape_cast %69 : vector<1x1x64x64xbf16> to vector<64x64xbf16>
    %cst_45 = arith.constant dense<0.000000e+00> : vector<32x64xf32>
    %71 = tpu.matmul %68, %70, %cst_45 {dimension_numbers = #tpu.dot_dimension_numbers<[1], [0], [0], [1], [0, 0, 1, 1], [], []>} : vector<32x64xbf16>, vector<64x64xbf16>, vector<32x64xf32> -> vector<32x64xf32>
    %72 = arith.addf %65, %71 : vector<32x64xf32>
    %73 = vector.extract_strided_slice %57 {offsets = [0, 2, 0], sizes = [2, 16, 64], strides = [1, 1, 1]} : vector<2x20x64xf32> to vector<2x16x64xf32>
    %74 = vector.shape_cast %73 : vector<2x16x64xf32> to vector<32x64xf32>
    %75 = arith.truncf %74 : vector<32x64xf32> to vector<32x64xbf16>
    %c0_46 = arith.constant 0 : index
    %c2_47 = arith.constant 2 : index
    %c0_48 = arith.constant 0 : index
    %c0_49 = arith.constant 0 : index
    %76 = vector.load %arg6[%c0_46, %c2_47, %c0_48, %c0_49] : memref<2x5x64x64xbf16, #tpu.memory_space<vmem>>, vector<1x1x64x64xbf16>
    %77 = vector.shape_cast %76 : vector<1x1x64x64xbf16> to vector<64x64xbf16>
    %cst_50 = arith.constant dense<0.000000e+00> : vector<32x64xf32>
    %78 = tpu.matmul %75, %77, %cst_50 {dimension_numbers = #tpu.dot_dimension_numbers<[1], [0], [0], [1], [0, 0, 1, 1], [], []>} : vector<32x64xbf16>, vector<64x64xbf16>, vector<32x64xf32> -> vector<32x64xf32>
    %79 = arith.addf %72, %78 : vector<32x64xf32>
    %80 = vector.extract_strided_slice %57 {offsets = [0, 3, 0], sizes = [2, 16, 64], strides = [1, 1, 1]} : vector<2x20x64xf32> to vector<2x16x64xf32>
    %81 = vector.shape_cast %80 : vector<2x16x64xf32> to vector<32x64xf32>
    %82 = arith.truncf %81 : vector<32x64xf32> to vector<32x64xbf16>
    %c0_51 = arith.constant 0 : index
    %c3_52 = arith.constant 3 : index
    %c0_53 = arith.constant 0 : index
    %c0_54 = arith.constant 0 : index
    %83 = vector.load %arg6[%c0_51, %c3_52, %c0_53, %c0_54] : memref<2x5x64x64xbf16, #tpu.memory_space<vmem>>, vector<1x1x64x64xbf16>
    %84 = vector.shape_cast %83 : vector<1x1x64x64xbf16> to vector<64x64xbf16>
    %cst_55 = arith.constant dense<0.000000e+00> : vector<32x64xf32>
    %85 = tpu.matmul %82, %84, %cst_55 {dimension_numbers = #tpu.dot_dimension_numbers<[1], [0], [0], [1], [0, 0, 1, 1], [], []>} : vector<32x64xbf16>, vector<64x64xbf16>, vector<32x64xf32> -> vector<32x64xf32>
    %86 = arith.addf %79, %85 : vector<32x64xf32>
    %87 = vector.extract_strided_slice %57 {offsets = [0, 4, 0], sizes = [2, 16, 64], strides = [1, 1, 1]} : vector<2x20x64xf32> to vector<2x16x64xf32>
    %88 = vector.shape_cast %87 : vector<2x16x64xf32> to vector<32x64xf32>
    %89 = arith.truncf %88 : vector<32x64xf32> to vector<32x64xbf16>
    %c0_56 = arith.constant 0 : index
    %c4_57 = arith.constant 4 : index
    %c0_58 = arith.constant 0 : index
    %c0_59 = arith.constant 0 : index
    %90 = vector.load %arg6[%c0_56, %c4_57, %c0_58, %c0_59] : memref<2x5x64x64xbf16, #tpu.memory_space<vmem>>, vector<1x1x64x64xbf16>
    %91 = vector.shape_cast %90 : vector<1x1x64x64xbf16> to vector<64x64xbf16>
    %cst_60 = arith.constant dense<0.000000e+00> : vector<32x64xf32>
    %92 = tpu.matmul %89, %91, %cst_60 {dimension_numbers = #tpu.dot_dimension_numbers<[1], [0], [0], [1], [0, 0, 1, 1], [], []>} : vector<32x64xbf16>, vector<64x64xbf16>, vector<32x64xf32> -> vector<32x64xf32>
    %93 = arith.addf %86, %92 : vector<32x64xf32>
    %94 = vector.shape_cast %93 : vector<32x64xf32> to vector<2x16x64xf32>
    %cst_61 = arith.constant 0.000000e+00 : f32
    %95 = vector.broadcast %cst_61 : f32 to vector<2x1x64xf32>
    %cst_62 = arith.constant 0.000000e+00 : f32
    %96 = vector.broadcast %cst_62 : f32 to vector<2x1x64xf32>
    %97 = tpu.concatenate %95, %94, %96 in 1 : vector<2x1x64xf32>, vector<2x16x64xf32>, vector<2x1x64xf32> -> vector<2x18x64xf32>
    %cst_63 = arith.constant 0.000000e+00 : f32
    %98 = vector.broadcast %cst_63 : f32 to vector<32x64xf32>
    %99 = vector.extract_strided_slice %97 {offsets = [0, 0, 0], sizes = [2, 16, 64], strides = [1, 1, 1]} : vector<2x18x64xf32> to vector<2x16x64xf32>
    %100 = vector.shape_cast %99 : vector<2x16x64xf32> to vector<32x64xf32>
    %101 = arith.truncf %100 : vector<32x64xf32> to vector<32x64xbf16>
    %c0_64 = arith.constant 0 : index
    %c0_65 = arith.constant 0 : index
    %c0_66 = arith.constant 0 : index
    %c0_67 = arith.constant 0 : index
    %102 = vector.load %arg7[%c0_64, %c0_65, %c0_66, %c0_67] : memref<2x3x64x64xbf16, #tpu.memory_space<vmem>>, vector<1x1x64x64xbf16>
    %103 = vector.shape_cast %102 : vector<1x1x64x64xbf16> to vector<64x64xbf16>
    %cst_68 = arith.constant dense<0.000000e+00> : vector<32x64xf32>
    %104 = tpu.matmul %101, %103, %cst_68 {dimension_numbers = #tpu.dot_dimension_numbers<[1], [0], [0], [1], [0, 0, 1, 1], [], []>} : vector<32x64xbf16>, vector<64x64xbf16>, vector<32x64xf32> -> vector<32x64xf32>
    %105 = arith.addf %98, %104 : vector<32x64xf32>
    %106 = vector.extract_strided_slice %97 {offsets = [0, 1, 0], sizes = [2, 16, 64], strides = [1, 1, 1]} : vector<2x18x64xf32> to vector<2x16x64xf32>
    %107 = vector.shape_cast %106 : vector<2x16x64xf32> to vector<32x64xf32>
    %108 = arith.truncf %107 : vector<32x64xf32> to vector<32x64xbf16>
    %c0_69 = arith.constant 0 : index
    %c1_70 = arith.constant 1 : index
    %c0_71 = arith.constant 0 : index
    %c0_72 = arith.constant 0 : index
    %109 = vector.load %arg7[%c0_69, %c1_70, %c0_71, %c0_72] : memref<2x3x64x64xbf16, #tpu.memory_space<vmem>>, vector<1x1x64x64xbf16>
    %110 = vector.shape_cast %109 : vector<1x1x64x64xbf16> to vector<64x64xbf16>
    %cst_73 = arith.constant dense<0.000000e+00> : vector<32x64xf32>
    %111 = tpu.matmul %108, %110, %cst_73 {dimension_numbers = #tpu.dot_dimension_numbers<[1], [0], [0], [1], [0, 0, 1, 1], [], []>} : vector<32x64xbf16>, vector<64x64xbf16>, vector<32x64xf32> -> vector<32x64xf32>
    %112 = arith.addf %105, %111 : vector<32x64xf32>
    %113 = vector.extract_strided_slice %97 {offsets = [0, 2, 0], sizes = [2, 16, 64], strides = [1, 1, 1]} : vector<2x18x64xf32> to vector<2x16x64xf32>
    %114 = vector.shape_cast %113 : vector<2x16x64xf32> to vector<32x64xf32>
    %115 = arith.truncf %114 : vector<32x64xf32> to vector<32x64xbf16>
    %c0_74 = arith.constant 0 : index
    %c2_75 = arith.constant 2 : index
    %c0_76 = arith.constant 0 : index
    %c0_77 = arith.constant 0 : index
    %116 = vector.load %arg7[%c0_74, %c2_75, %c0_76, %c0_77] : memref<2x3x64x64xbf16, #tpu.memory_space<vmem>>, vector<1x1x64x64xbf16>
    %117 = vector.shape_cast %116 : vector<1x1x64x64xbf16> to vector<64x64xbf16>
    %cst_78 = arith.constant dense<0.000000e+00> : vector<32x64xf32>
    %118 = tpu.matmul %115, %117, %cst_78 {dimension_numbers = #tpu.dot_dimension_numbers<[1], [0], [0], [1], [0, 0, 1, 1], [], []>} : vector<32x64xbf16>, vector<64x64xbf16>, vector<32x64xf32> -> vector<32x64xf32>
    %119 = arith.addf %112, %118 : vector<32x64xf32>
    %120 = vector.shape_cast %119 : vector<32x64xf32> to vector<2x16x64xf32>
    %cst_79 = arith.constant 0.000000e+00 : f32
    %121 = vector.broadcast %cst_79 : f32 to vector<32x64xf32>
    %122 = vector.shape_cast %0 : vector<2x16x64xf32> to vector<32x64xf32>
    %123 = arith.truncf %122 : vector<32x64xf32> to vector<32x64xbf16>
    %c0_80 = arith.constant 0 : index
    %c0_81 = arith.constant 0 : index
    %c0_82 = arith.constant 0 : index
    %c0_83 = arith.constant 0 : index
    %124 = vector.load %arg8[%c0_80, %c0_81, %c0_82, %c0_83] : memref<2x1x64x64xbf16, #tpu.memory_space<vmem>>, vector<1x1x64x64xbf16>
    %125 = vector.shape_cast %124 : vector<1x1x64x64xbf16> to vector<64x64xbf16>
    %cst_84 = arith.constant dense<0.000000e+00> : vector<32x64xf32>
    %126 = tpu.matmul %123, %125, %cst_84 {dimension_numbers = #tpu.dot_dimension_numbers<[1], [0], [0], [1], [0, 0, 1, 1], [], []>} : vector<32x64xbf16>, vector<64x64xbf16>, vector<32x64xf32> -> vector<32x64xf32>
    %127 = arith.addf %121, %126 : vector<32x64xf32>
    %c0_85 = arith.constant 0 : index
    %c0_86 = arith.constant 0 : index
    %c0_87 = arith.constant 0 : index
    %128 = vector.load %arg9[%c0_85, %c0_86, %c0_87] : memref<2x1x64xf32, #tpu.memory_space<vmem>>, vector<1x1x64xf32>
    %129 = vector.shape_cast %128 : vector<1x1x64xf32> to vector<1x64xf32>
    %130 = vector.broadcast %129 : vector<1x64xf32> to vector<32x64xf32>
    %131 = arith.mulf %127, %130 : vector<32x64xf32>
    %c0_88 = arith.constant 0 : index
    %c0_89 = arith.constant 0 : index
    %c0_90 = arith.constant 0 : index
    %132 = vector.load %arg10[%c0_88, %c0_89, %c0_90] : memref<2x1x64xf32, #tpu.memory_space<vmem>>, vector<1x1x64xf32>
    %133 = vector.shape_cast %132 : vector<1x1x64xf32> to vector<1x64xf32>
    %134 = vector.broadcast %133 : vector<1x64xf32> to vector<32x64xf32>
    %135 = arith.addf %131, %134 : vector<32x64xf32>
    %136 = vector.shape_cast %135 : vector<32x64xf32> to vector<2x16x64xf32>
    %137 = arith.addf %120, %136 : vector<2x16x64xf32>
    %cst_91 = arith.constant 0.000000e+00 : f32
    %138 = vector.broadcast %cst_91 : f32 to vector<2x16x64xf32>
    %139 = arith.maximumf %137, %138 : vector<2x16x64xf32>
    %cst_92 = arith.constant 0.000000e+00 : f32
    %140 = vector.broadcast %cst_92 : f32 to vector<2x1x64xf32>
    %cst_93 = arith.constant 0.000000e+00 : f32
    %141 = vector.broadcast %cst_93 : f32 to vector<2x1x64xf32>
    %142 = tpu.concatenate %140, %139, %141 in 1 : vector<2x1x64xf32>, vector<2x16x64xf32>, vector<2x1x64xf32> -> vector<2x18x64xf32>
    %cst_94 = arith.constant 0.000000e+00 : f32
    %143 = vector.broadcast %cst_94 : f32 to vector<32x128xf32>
    %144 = vector.extract_strided_slice %142 {offsets = [0, 0, 0], sizes = [2, 16, 64], strides = [1, 1, 1]} : vector<2x18x64xf32> to vector<2x16x64xf32>
    %145 = vector.shape_cast %144 : vector<2x16x64xf32> to vector<32x64xf32>
    %146 = arith.truncf %145 : vector<32x64xf32> to vector<32x64xbf16>
    %c0_95 = arith.constant 0 : index
    %c0_96 = arith.constant 0 : index
    %c0_97 = arith.constant 0 : index
    %c0_98 = arith.constant 0 : index
    %147 = vector.load %arg11[%c0_95, %c0_96, %c0_97, %c0_98] : memref<2x3x64x128xbf16, #tpu.memory_space<vmem>>, vector<1x1x64x128xbf16>
    %148 = vector.shape_cast %147 : vector<1x1x64x128xbf16> to vector<64x128xbf16>
    %cst_99 = arith.constant dense<0.000000e+00> : vector<32x128xf32>
    %149 = tpu.matmul %146, %148, %cst_99 {dimension_numbers = #tpu.dot_dimension_numbers<[1], [0], [0], [1], [0, 0, 1, 1], [], []>} : vector<32x64xbf16>, vector<64x128xbf16>, vector<32x128xf32> -> vector<32x128xf32>
    %150 = arith.addf %143, %149 : vector<32x128xf32>
    %151 = vector.extract_strided_slice %142 {offsets = [0, 1, 0], sizes = [2, 16, 64], strides = [1, 1, 1]} : vector<2x18x64xf32> to vector<2x16x64xf32>
    %152 = vector.shape_cast %151 : vector<2x16x64xf32> to vector<32x64xf32>
    %153 = arith.truncf %152 : vector<32x64xf32> to vector<32x64xbf16>
    %c0_100 = arith.constant 0 : index
    %c1_101 = arith.constant 1 : index
    %c0_102 = arith.constant 0 : index
    %c0_103 = arith.constant 0 : index
    %154 = vector.load %arg11[%c0_100, %c1_101, %c0_102, %c0_103] : memref<2x3x64x128xbf16, #tpu.memory_space<vmem>>, vector<1x1x64x128xbf16>
    %155 = vector.shape_cast %154 : vector<1x1x64x128xbf16> to vector<64x128xbf16>
    %cst_104 = arith.constant dense<0.000000e+00> : vector<32x128xf32>
    %156 = tpu.matmul %153, %155, %cst_104 {dimension_numbers = #tpu.dot_dimension_numbers<[1], [0], [0], [1], [0, 0, 1, 1], [], []>} : vector<32x64xbf16>, vector<64x128xbf16>, vector<32x128xf32> -> vector<32x128xf32>
    %157 = arith.addf %150, %156 : vector<32x128xf32>
    %158 = vector.extract_strided_slice %142 {offsets = [0, 2, 0], sizes = [2, 16, 64], strides = [1, 1, 1]} : vector<2x18x64xf32> to vector<2x16x64xf32>
    %159 = vector.shape_cast %158 : vector<2x16x64xf32> to vector<32x64xf32>
    %160 = arith.truncf %159 : vector<32x64xf32> to vector<32x64xbf16>
    %c0_105 = arith.constant 0 : index
    %c2_106 = arith.constant 2 : index
    %c0_107 = arith.constant 0 : index
    %c0_108 = arith.constant 0 : index
    %161 = vector.load %arg11[%c0_105, %c2_106, %c0_107, %c0_108] : memref<2x3x64x128xbf16, #tpu.memory_space<vmem>>, vector<1x1x64x128xbf16>
    %162 = vector.shape_cast %161 : vector<1x1x64x128xbf16> to vector<64x128xbf16>
    %cst_109 = arith.constant dense<0.000000e+00> : vector<32x128xf32>
    %163 = tpu.matmul %160, %162, %cst_109 {dimension_numbers = #tpu.dot_dimension_numbers<[1], [0], [0], [1], [0, 0, 1, 1], [], []>} : vector<32x64xbf16>, vector<64x128xbf16>, vector<32x128xf32> -> vector<32x128xf32>
    %164 = arith.addf %157, %163 : vector<32x128xf32>
    %c0_110 = arith.constant 0 : index
    %c0_111 = arith.constant 0 : index
    %c0_112 = arith.constant 0 : index
    %165 = vector.load %arg12[%c0_110, %c0_111, %c0_112] : memref<2x1x128xf32, #tpu.memory_space<vmem>>, vector<1x1x128xf32>
    %166 = vector.shape_cast %165 : vector<1x1x128xf32> to vector<1x128xf32>
    %167 = vector.broadcast %166 : vector<1x128xf32> to vector<32x128xf32>
    %168 = arith.mulf %164, %167 : vector<32x128xf32>
    %c0_113 = arith.constant 0 : index
    %c0_114 = arith.constant 0 : index
    %c0_115 = arith.constant 0 : index
    %169 = vector.load %arg13[%c0_113, %c0_114, %c0_115] : memref<2x1x128xf32, #tpu.memory_space<vmem>>, vector<1x1x128xf32>
    %170 = vector.shape_cast %169 : vector<1x1x128xf32> to vector<1x128xf32>
    %171 = vector.broadcast %170 : vector<1x128xf32> to vector<32x128xf32>
    %172 = arith.addf %168, %171 : vector<32x128xf32>
    %173 = vector.shape_cast %172 : vector<32x128xf32> to vector<2x16x128xf32>
    %cst_116 = arith.constant 0.000000e+00 : f32
    %174 = vector.broadcast %cst_116 : f32 to vector<2x16x128xf32>
    %175 = arith.cmpf ogt, %173, %174 : vector<2x16x128xf32>
    %cst_117 = arith.constant 2.000000e-01 : f32
    %176 = vector.broadcast %cst_117 : f32 to vector<2x16x128xf32>
    %177 = arith.mulf %176, %173 : vector<2x16x128xf32>
    %178 = arith.select %175, %173, %177 : vector<2x16x128xi1>, vector<2x16x128xf32>
    %cst_118 = arith.constant 0.000000e+00 : f32
    %179 = vector.broadcast %cst_118 : f32 to vector<2x1x128xf32>
    %cst_119 = arith.constant 0.000000e+00 : f32
    %180 = vector.broadcast %cst_119 : f32 to vector<2x1x128xf32>
    %181 = tpu.concatenate %179, %178, %180 in 1 : vector<2x1x128xf32>, vector<2x16x128xf32>, vector<2x1x128xf32> -> vector<2x18x128xf32>
    %cst_120 = arith.constant 0.000000e+00 : f32
    %182 = vector.broadcast %cst_120 : f32 to vector<32x256xf32>
    %183 = vector.extract_strided_slice %181 {offsets = [0, 0, 0], sizes = [2, 16, 128], strides = [1, 1, 1]} : vector<2x18x128xf32> to vector<2x16x128xf32>
    %184 = vector.shape_cast %183 : vector<2x16x128xf32> to vector<32x128xf32>
    %185 = arith.truncf %184 : vector<32x128xf32> to vector<32x128xbf16>
    %c0_121 = arith.constant 0 : index
    %c0_122 = arith.constant 0 : index
    %c0_123 = arith.constant 0 : index
    %c0_124 = arith.constant 0 : index
    %186 = vector.load %arg14[%c0_121, %c0_122, %c0_123, %c0_124] : memref<2x3x128x256xbf16, #tpu.memory_space<vmem>>, vector<1x1x128x256xbf16>
    %187 = vector.shape_cast %186 : vector<1x1x128x256xbf16> to vector<128x256xbf16>
    %cst_125 = arith.constant dense<0.000000e+00> : vector<32x256xf32>
    %188 = tpu.matmul %185, %187, %cst_125 {dimension_numbers = #tpu.dot_dimension_numbers<[1], [0], [0], [1], [0, 0, 1, 1], [], []>} : vector<32x128xbf16>, vector<128x256xbf16>, vector<32x256xf32> -> vector<32x256xf32>
    %189 = arith.addf %182, %188 : vector<32x256xf32>
    %190 = vector.extract_strided_slice %181 {offsets = [0, 1, 0], sizes = [2, 16, 128], strides = [1, 1, 1]} : vector<2x18x128xf32> to vector<2x16x128xf32>
    %191 = vector.shape_cast %190 : vector<2x16x128xf32> to vector<32x128xf32>
    %192 = arith.truncf %191 : vector<32x128xf32> to vector<32x128xbf16>
    %c0_126 = arith.constant 0 : index
    %c1_127 = arith.constant 1 : index
    %c0_128 = arith.constant 0 : index
    %c0_129 = arith.constant 0 : index
    %193 = vector.load %arg14[%c0_126, %c1_127, %c0_128, %c0_129] : memref<2x3x128x256xbf16, #tpu.memory_space<vmem>>, vector<1x1x128x256xbf16>
    %194 = vector.shape_cast %193 : vector<1x1x128x256xbf16> to vector<128x256xbf16>
    %cst_130 = arith.constant dense<0.000000e+00> : vector<32x256xf32>
    %195 = tpu.matmul %192, %194, %cst_130 {dimension_numbers = #tpu.dot_dimension_numbers<[1], [0], [0], [1], [0, 0, 1, 1], [], []>} : vector<32x128xbf16>, vector<128x256xbf16>, vector<32x256xf32> -> vector<32x256xf32>
    %196 = arith.addf %189, %195 : vector<32x256xf32>
    %197 = vector.extract_strided_slice %181 {offsets = [0, 2, 0], sizes = [2, 16, 128], strides = [1, 1, 1]} : vector<2x18x128xf32> to vector<2x16x128xf32>
    %198 = vector.shape_cast %197 : vector<2x16x128xf32> to vector<32x128xf32>
    %199 = arith.truncf %198 : vector<32x128xf32> to vector<32x128xbf16>
    %c0_131 = arith.constant 0 : index
    %c2_132 = arith.constant 2 : index
    %c0_133 = arith.constant 0 : index
    %c0_134 = arith.constant 0 : index
    %200 = vector.load %arg14[%c0_131, %c2_132, %c0_133, %c0_134] : memref<2x3x128x256xbf16, #tpu.memory_space<vmem>>, vector<1x1x128x256xbf16>
    %201 = vector.shape_cast %200 : vector<1x1x128x256xbf16> to vector<128x256xbf16>
    %cst_135 = arith.constant dense<0.000000e+00> : vector<32x256xf32>
    %202 = tpu.matmul %199, %201, %cst_135 {dimension_numbers = #tpu.dot_dimension_numbers<[1], [0], [0], [1], [0, 0, 1, 1], [], []>} : vector<32x128xbf16>, vector<128x256xbf16>, vector<32x256xf32> -> vector<32x256xf32>
    %203 = arith.addf %196, %202 : vector<32x256xf32>
    %c0_136 = arith.constant 0 : index
    %c0_137 = arith.constant 0 : index
    %c0_138 = arith.constant 0 : index
    %204 = vector.load %arg15[%c0_136, %c0_137, %c0_138] : memref<2x1x256xf32, #tpu.memory_space<vmem>>, vector<1x1x256xf32>
    %205 = vector.shape_cast %204 : vector<1x1x256xf32> to vector<1x256xf32>
    %206 = vector.broadcast %205 : vector<1x256xf32> to vector<32x256xf32>
    %207 = arith.mulf %203, %206 : vector<32x256xf32>
    %c0_139 = arith.constant 0 : index
    %c0_140 = arith.constant 0 : index
    %c0_141 = arith.constant 0 : index
    %208 = vector.load %arg16[%c0_139, %c0_140, %c0_141] : memref<2x1x256xf32, #tpu.memory_space<vmem>>, vector<1x1x256xf32>
    %209 = vector.shape_cast %208 : vector<1x1x256xf32> to vector<1x256xf32>
    %210 = vector.broadcast %209 : vector<1x256xf32> to vector<32x256xf32>
    %211 = arith.addf %207, %210 : vector<32x256xf32>
    %212 = vector.shape_cast %211 : vector<32x256xf32> to vector<2x16x256xf32>
    %cst_142 = arith.constant 0.000000e+00 : f32
    %213 = vector.broadcast %cst_142 : f32 to vector<2x16x256xf32>
    %214 = arith.cmpf ogt, %212, %213 : vector<2x16x256xf32>
    %cst_143 = arith.constant 2.500000e-01 : f32
    %215 = vector.broadcast %cst_143 : f32 to vector<2x16x256xf32>
    %216 = arith.mulf %215, %212 : vector<2x16x256xf32>
    %217 = arith.select %214, %212, %216 : vector<2x16x256xi1>, vector<2x16x256xf32>
    %cst_144 = arith.constant 0.000000e+00 : f32
    %218 = vector.broadcast %cst_144 : f32 to vector<2x1x256xf32>
    %cst_145 = arith.constant 0.000000e+00 : f32
    %219 = vector.broadcast %cst_145 : f32 to vector<2x1x256xf32>
    %220 = tpu.concatenate %218, %217, %219 in 1 : vector<2x1x256xf32>, vector<2x16x256xf32>, vector<2x1x256xf32> -> vector<2x18x256xf32>
    %cst_146 = arith.constant 0.000000e+00 : f32
    %221 = vector.broadcast %cst_146 : f32 to vector<32x128xf32>
    %222 = vector.extract_strided_slice %220 {offsets = [0, 0, 0], sizes = [2, 16, 256], strides = [1, 1, 1]} : vector<2x18x256xf32> to vector<2x16x256xf32>
    %223 = vector.shape_cast %222 : vector<2x16x256xf32> to vector<32x256xf32>
    %224 = arith.truncf %223 : vector<32x256xf32> to vector<32x256xbf16>
    %c0_147 = arith.constant 0 : index
    %c0_148 = arith.constant 0 : index
    %c0_149 = arith.constant 0 : index
    %c0_150 = arith.constant 0 : index
    %225 = vector.load %arg17[%c0_147, %c0_148, %c0_149, %c0_150] : memref<2x3x256x128xbf16, #tpu.memory_space<vmem>>, vector<1x1x256x128xbf16>
    %226 = vector.shape_cast %225 : vector<1x1x256x128xbf16> to vector<256x128xbf16>
    %cst_151 = arith.constant dense<0.000000e+00> : vector<32x128xf32>
    %227 = tpu.matmul %224, %226, %cst_151 {dimension_numbers = #tpu.dot_dimension_numbers<[1], [0], [0], [1], [0, 0, 1, 1], [], []>} : vector<32x256xbf16>, vector<256x128xbf16>, vector<32x128xf32> -> vector<32x128xf32>
    %228 = arith.addf %221, %227 : vector<32x128xf32>
    %229 = vector.extract_strided_slice %220 {offsets = [0, 1, 0], sizes = [2, 16, 256], strides = [1, 1, 1]} : vector<2x18x256xf32> to vector<2x16x256xf32>
    %230 = vector.shape_cast %229 : vector<2x16x256xf32> to vector<32x256xf32>
    %231 = arith.truncf %230 : vector<32x256xf32> to vector<32x256xbf16>
    %c0_152 = arith.constant 0 : index
    %c1_153 = arith.constant 1 : index
    %c0_154 = arith.constant 0 : index
    %c0_155 = arith.constant 0 : index
    %232 = vector.load %arg17[%c0_152, %c1_153, %c0_154, %c0_155] : memref<2x3x256x128xbf16, #tpu.memory_space<vmem>>, vector<1x1x256x128xbf16>
    %233 = vector.shape_cast %232 : vector<1x1x256x128xbf16> to vector<256x128xbf16>
    %cst_156 = arith.constant dense<0.000000e+00> : vector<32x128xf32>
    %234 = tpu.matmul %231, %233, %cst_156 {dimension_numbers = #tpu.dot_dimension_numbers<[1], [0], [0], [1], [0, 0, 1, 1], [], []>} : vector<32x256xbf16>, vector<256x128xbf16>, vector<32x128xf32> -> vector<32x128xf32>
    %235 = arith.addf %228, %234 : vector<32x128xf32>
    %236 = vector.extract_strided_slice %220 {offsets = [0, 2, 0], sizes = [2, 16, 256], strides = [1, 1, 1]} : vector<2x18x256xf32> to vector<2x16x256xf32>
    %237 = vector.shape_cast %236 : vector<2x16x256xf32> to vector<32x256xf32>
    %238 = arith.truncf %237 : vector<32x256xf32> to vector<32x256xbf16>
    %c0_157 = arith.constant 0 : index
    %c2_158 = arith.constant 2 : index
    %c0_159 = arith.constant 0 : index
    %c0_160 = arith.constant 0 : index
    %239 = vector.load %arg17[%c0_157, %c2_158, %c0_159, %c0_160] : memref<2x3x256x128xbf16, #tpu.memory_space<vmem>>, vector<1x1x256x128xbf16>
    %240 = vector.shape_cast %239 : vector<1x1x256x128xbf16> to vector<256x128xbf16>
    %cst_161 = arith.constant dense<0.000000e+00> : vector<32x128xf32>
    %241 = tpu.matmul %238, %240, %cst_161 {dimension_numbers = #tpu.dot_dimension_numbers<[1], [0], [0], [1], [0, 0, 1, 1], [], []>} : vector<32x256xbf16>, vector<256x128xbf16>, vector<32x128xf32> -> vector<32x128xf32>
    %242 = arith.addf %235, %241 : vector<32x128xf32>
    %c0_162 = arith.constant 0 : index
    %c0_163 = arith.constant 0 : index
    %c0_164 = arith.constant 0 : index
    %243 = vector.load %arg18[%c0_162, %c0_163, %c0_164] : memref<2x1x128xf32, #tpu.memory_space<vmem>>, vector<1x1x128xf32>
    %244 = vector.shape_cast %243 : vector<1x1x128xf32> to vector<1x128xf32>
    %245 = vector.broadcast %244 : vector<1x128xf32> to vector<32x128xf32>
    %246 = arith.mulf %242, %245 : vector<32x128xf32>
    %c0_165 = arith.constant 0 : index
    %c0_166 = arith.constant 0 : index
    %c0_167 = arith.constant 0 : index
    %247 = vector.load %arg19[%c0_165, %c0_166, %c0_167] : memref<2x1x128xf32, #tpu.memory_space<vmem>>, vector<1x1x128xf32>
    %248 = vector.shape_cast %247 : vector<1x1x128xf32> to vector<1x128xf32>
    %249 = vector.broadcast %248 : vector<1x128xf32> to vector<32x128xf32>
    %250 = arith.addf %246, %249 : vector<32x128xf32>
    %251 = vector.shape_cast %250 : vector<32x128xf32> to vector<2x16x128xf32>
    %cst_168 = arith.constant 0.000000e+00 : f32
    %252 = vector.broadcast %cst_168 : f32 to vector<2x16x128xf32>
    %253 = arith.cmpf ogt, %251, %252 : vector<2x16x128xf32>
    %254 = math.exp %251 : vector<2x16x128xf32>
    %cst_169 = arith.constant 1.000000e+00 : f32
    %255 = vector.broadcast %cst_169 : f32 to vector<2x16x128xf32>
    %256 = arith.subf %254, %255 : vector<2x16x128xf32>
    %cst_170 = arith.constant 3.000000e-01 : f32
    %257 = vector.broadcast %cst_170 : f32 to vector<2x16x128xf32>
    %258 = arith.mulf %257, %256 : vector<2x16x128xf32>
    %259 = arith.select %253, %251, %258 : vector<2x16x128xi1>, vector<2x16x128xf32>
    %cst_171 = arith.constant dense<0.000000e+00> : vector<2x128xf32>
    %260 = vector.multi_reduction <add>, %259, %cst_171 [1] : vector<2x16x128xf32> to vector<2x128xf32>
    %cst_172 = arith.constant 1.600000e+01 : f32
    %261 = vector.broadcast %cst_172 : f32 to vector<2x128xf32>
    %262 = arith.divf %260, %261 : vector<2x128xf32>
    %c0_173 = arith.constant 0 : index
    %c0_174 = arith.constant 0 : index
    %263 = vector.load %arg1[%c0_173, %c0_174] : memref<16x128xf32, #tpu.memory_space<vmem>>, vector<16x128xf32>
    %264 = arith.truncf %263 : vector<16x128xf32> to vector<16x128xbf16>
    %c0_175 = arith.constant 0 : index
    %c0_176 = arith.constant 0 : index
    %265 = vector.load %arg2[%c0_175, %c0_176] : memref<32x16xbf16, #tpu.memory_space<vmem>>, vector<32x16xbf16>
    %cst_177 = arith.constant dense<0.000000e+00> : vector<32x128xf32>
    %266 = tpu.matmul %265, %264, %cst_177 {dimension_numbers = #tpu.dot_dimension_numbers<[1], [0], [0], [1], [0, 0, 1, 1], [], []>} : vector<32x16xbf16>, vector<16x128xbf16>, vector<32x128xf32> -> vector<32x128xf32>
    %c0_178 = arith.constant 0 : index
    %c0_179 = arith.constant 0 : index
    %267 = vector.load %arg3[%c0_178, %c0_179] : memref<32x1xf32, #tpu.memory_space<vmem>>, vector<32x1xf32>
    %268 = vector.broadcast %267 : vector<32x1xf32> to vector<32x128xf32>
    %269 = arith.addf %266, %268 : vector<32x128xf32>
    %270 = arith.negf %269 : vector<32x128xf32>
    %271 = math.exp %270 : vector<32x128xf32>
    %cst_180 = arith.constant 1.000000e+00 : f32
    %272 = vector.broadcast %cst_180 : f32 to vector<32x128xf32>
    %273 = arith.addf %272, %271 : vector<32x128xf32>
    %274 = arith.divf %272, %273 : vector<32x128xf32>
    %c0_181 = arith.constant 0 : index
    %c0_182 = arith.constant 0 : index
    %275 = vector.load %arg4[%c0_181, %c0_182] : memref<16x32xbf16, #tpu.memory_space<vmem>>, vector<16x32xbf16>
    %276 = arith.truncf %274 : vector<32x128xf32> to vector<32x128xbf16>
    %cst_183 = arith.constant dense<0.000000e+00> : vector<16x128xf32>
    %277 = tpu.matmul %275, %276, %cst_183 {dimension_numbers = #tpu.dot_dimension_numbers<[1], [0], [0], [1], [0, 0, 1, 1], [], []>} : vector<16x32xbf16>, vector<32x128xbf16>, vector<16x128xf32> -> vector<16x128xf32>
    %278 = vector.extract_strided_slice %277 {offsets = [0, 0], sizes = [8, 64], strides = [1, 1]} : vector<16x128xf32> to vector<8x64xf32>
    %279 = vector.extract_strided_slice %277 {offsets = [0, 64], sizes = [8, 64], strides = [1, 1]} : vector<16x128xf32> to vector<8x64xf32>
    %280 = vector.extract_strided_slice %277 {offsets = [8, 0], sizes = [8, 64], strides = [1, 1]} : vector<16x128xf32> to vector<8x64xf32>
    %281 = vector.extract_strided_slice %277 {offsets = [8, 64], sizes = [8, 64], strides = [1, 1]} : vector<16x128xf32> to vector<8x64xf32>
    %282 = vector.shape_cast %278 : vector<8x64xf32> to vector<1x8x64xf32>
    %283 = vector.shape_cast %279 : vector<8x64xf32> to vector<1x8x64xf32>
    %284 = vector.shape_cast %280 : vector<8x64xf32> to vector<1x8x64xf32>
    %285 = vector.shape_cast %281 : vector<8x64xf32> to vector<1x8x64xf32>
    %286 = tpu.concatenate %282, %283, %284, %285 in 0 : vector<1x8x64xf32>, vector<1x8x64xf32>, vector<1x8x64xf32>, vector<1x8x64xf32> -> vector<4x8x64xf32>
    %cst_184 = arith.constant 0.000000e+00 : f32
    %287 = vector.broadcast %cst_184 : f32 to vector<4x3x64xf32>
    %cst_185 = arith.constant 0.000000e+00 : f32
    %288 = vector.broadcast %cst_185 : f32 to vector<4x3x64xf32>
    %289 = tpu.concatenate %287, %286, %288 in 1 : vector<4x3x64xf32>, vector<4x8x64xf32>, vector<4x3x64xf32> -> vector<4x14x64xf32>
    %cst_186 = arith.constant 0.000000e+00 : f32
    %290 = vector.broadcast %cst_186 : f32 to vector<32x64xf32>
    %291 = vector.extract_strided_slice %289 {offsets = [0, 0, 0], sizes = [4, 8, 64], strides = [1, 1, 1]} : vector<4x14x64xf32> to vector<4x8x64xf32>
    %292 = vector.shape_cast %291 : vector<4x8x64xf32> to vector<32x64xf32>
    %293 = arith.truncf %292 : vector<32x64xf32> to vector<32x64xbf16>
    %c1_187 = arith.constant 1 : index
    %c0_188 = arith.constant 0 : index
    %c0_189 = arith.constant 0 : index
    %c0_190 = arith.constant 0 : index
    %294 = vector.load %arg5[%c1_187, %c0_188, %c0_189, %c0_190] : memref<2x7x64x64xbf16, #tpu.memory_space<vmem>>, vector<1x1x64x64xbf16>
    %295 = vector.shape_cast %294 : vector<1x1x64x64xbf16> to vector<64x64xbf16>
    %cst_191 = arith.constant dense<0.000000e+00> : vector<32x64xf32>
    %296 = tpu.matmul %293, %295, %cst_191 {dimension_numbers = #tpu.dot_dimension_numbers<[1], [0], [0], [1], [0, 0, 1, 1], [], []>} : vector<32x64xbf16>, vector<64x64xbf16>, vector<32x64xf32> -> vector<32x64xf32>
    %297 = arith.addf %290, %296 : vector<32x64xf32>
    %298 = vector.extract_strided_slice %289 {offsets = [0, 1, 0], sizes = [4, 8, 64], strides = [1, 1, 1]} : vector<4x14x64xf32> to vector<4x8x64xf32>
    %299 = vector.shape_cast %298 : vector<4x8x64xf32> to vector<32x64xf32>
    %300 = arith.truncf %299 : vector<32x64xf32> to vector<32x64xbf16>
    %c1_192 = arith.constant 1 : index
    %c1_193 = arith.constant 1 : index
    %c0_194 = arith.constant 0 : index
    %c0_195 = arith.constant 0 : index
    %301 = vector.load %arg5[%c1_192, %c1_193, %c0_194, %c0_195] : memref<2x7x64x64xbf16, #tpu.memory_space<vmem>>, vector<1x1x64x64xbf16>
    %302 = vector.shape_cast %301 : vector<1x1x64x64xbf16> to vector<64x64xbf16>
    %cst_196 = arith.constant dense<0.000000e+00> : vector<32x64xf32>
    %303 = tpu.matmul %300, %302, %cst_196 {dimension_numbers = #tpu.dot_dimension_numbers<[1], [0], [0], [1], [0, 0, 1, 1], [], []>} : vector<32x64xbf16>, vector<64x64xbf16>, vector<32x64xf32> -> vector<32x64xf32>
    %304 = arith.addf %297, %303 : vector<32x64xf32>
    %305 = vector.extract_strided_slice %289 {offsets = [0, 2, 0], sizes = [4, 8, 64], strides = [1, 1, 1]} : vector<4x14x64xf32> to vector<4x8x64xf32>
    %306 = vector.shape_cast %305 : vector<4x8x64xf32> to vector<32x64xf32>
    %307 = arith.truncf %306 : vector<32x64xf32> to vector<32x64xbf16>
    %c1_197 = arith.constant 1 : index
    %c2_198 = arith.constant 2 : index
    %c0_199 = arith.constant 0 : index
    %c0_200 = arith.constant 0 : index
    %308 = vector.load %arg5[%c1_197, %c2_198, %c0_199, %c0_200] : memref<2x7x64x64xbf16, #tpu.memory_space<vmem>>, vector<1x1x64x64xbf16>
    %309 = vector.shape_cast %308 : vector<1x1x64x64xbf16> to vector<64x64xbf16>
    %cst_201 = arith.constant dense<0.000000e+00> : vector<32x64xf32>
    %310 = tpu.matmul %307, %309, %cst_201 {dimension_numbers = #tpu.dot_dimension_numbers<[1], [0], [0], [1], [0, 0, 1, 1], [], []>} : vector<32x64xbf16>, vector<64x64xbf16>, vector<32x64xf32> -> vector<32x64xf32>
    %311 = arith.addf %304, %310 : vector<32x64xf32>
    %312 = vector.extract_strided_slice %289 {offsets = [0, 3, 0], sizes = [4, 8, 64], strides = [1, 1, 1]} : vector<4x14x64xf32> to vector<4x8x64xf32>
    %313 = vector.shape_cast %312 : vector<4x8x64xf32> to vector<32x64xf32>
    %314 = arith.truncf %313 : vector<32x64xf32> to vector<32x64xbf16>
    %c1_202 = arith.constant 1 : index
    %c3_203 = arith.constant 3 : index
    %c0_204 = arith.constant 0 : index
    %c0_205 = arith.constant 0 : index
    %315 = vector.load %arg5[%c1_202, %c3_203, %c0_204, %c0_205] : memref<2x7x64x64xbf16, #tpu.memory_space<vmem>>, vector<1x1x64x64xbf16>
    %316 = vector.shape_cast %315 : vector<1x1x64x64xbf16> to vector<64x64xbf16>
    %cst_206 = arith.constant dense<0.000000e+00> : vector<32x64xf32>
    %317 = tpu.matmul %314, %316, %cst_206 {dimension_numbers = #tpu.dot_dimension_numbers<[1], [0], [0], [1], [0, 0, 1, 1], [], []>} : vector<32x64xbf16>, vector<64x64xbf16>, vector<32x64xf32> -> vector<32x64xf32>
    %318 = arith.addf %311, %317 : vector<32x64xf32>
    %319 = vector.extract_strided_slice %289 {offsets = [0, 4, 0], sizes = [4, 8, 64], strides = [1, 1, 1]} : vector<4x14x64xf32> to vector<4x8x64xf32>
    %320 = vector.shape_cast %319 : vector<4x8x64xf32> to vector<32x64xf32>
    %321 = arith.truncf %320 : vector<32x64xf32> to vector<32x64xbf16>
    %c1_207 = arith.constant 1 : index
    %c4_208 = arith.constant 4 : index
    %c0_209 = arith.constant 0 : index
    %c0_210 = arith.constant 0 : index
    %322 = vector.load %arg5[%c1_207, %c4_208, %c0_209, %c0_210] : memref<2x7x64x64xbf16, #tpu.memory_space<vmem>>, vector<1x1x64x64xbf16>
    %323 = vector.shape_cast %322 : vector<1x1x64x64xbf16> to vector<64x64xbf16>
    %cst_211 = arith.constant dense<0.000000e+00> : vector<32x64xf32>
    %324 = tpu.matmul %321, %323, %cst_211 {dimension_numbers = #tpu.dot_dimension_numbers<[1], [0], [0], [1], [0, 0, 1, 1], [], []>} : vector<32x64xbf16>, vector<64x64xbf16>, vector<32x64xf32> -> vector<32x64xf32>
    %325 = arith.addf %318, %324 : vector<32x64xf32>
    %326 = vector.extract_strided_slice %289 {offsets = [0, 5, 0], sizes = [4, 8, 64], strides = [1, 1, 1]} : vector<4x14x64xf32> to vector<4x8x64xf32>
    %327 = vector.shape_cast %326 : vector<4x8x64xf32> to vector<32x64xf32>
    %328 = arith.truncf %327 : vector<32x64xf32> to vector<32x64xbf16>
    %c1_212 = arith.constant 1 : index
    %c5_213 = arith.constant 5 : index
    %c0_214 = arith.constant 0 : index
    %c0_215 = arith.constant 0 : index
    %329 = vector.load %arg5[%c1_212, %c5_213, %c0_214, %c0_215] : memref<2x7x64x64xbf16, #tpu.memory_space<vmem>>, vector<1x1x64x64xbf16>
    %330 = vector.shape_cast %329 : vector<1x1x64x64xbf16> to vector<64x64xbf16>
    %cst_216 = arith.constant dense<0.000000e+00> : vector<32x64xf32>
    %331 = tpu.matmul %328, %330, %cst_216 {dimension_numbers = #tpu.dot_dimension_numbers<[1], [0], [0], [1], [0, 0, 1, 1], [], []>} : vector<32x64xbf16>, vector<64x64xbf16>, vector<32x64xf32> -> vector<32x64xf32>
    %332 = arith.addf %325, %331 : vector<32x64xf32>
    %333 = vector.extract_strided_slice %289 {offsets = [0, 6, 0], sizes = [4, 8, 64], strides = [1, 1, 1]} : vector<4x14x64xf32> to vector<4x8x64xf32>
    %334 = vector.shape_cast %333 : vector<4x8x64xf32> to vector<32x64xf32>
    %335 = arith.truncf %334 : vector<32x64xf32> to vector<32x64xbf16>
    %c1_217 = arith.constant 1 : index
    %c6_218 = arith.constant 6 : index
    %c0_219 = arith.constant 0 : index
    %c0_220 = arith.constant 0 : index
    %336 = vector.load %arg5[%c1_217, %c6_218, %c0_219, %c0_220] : memref<2x7x64x64xbf16, #tpu.memory_space<vmem>>, vector<1x1x64x64xbf16>
    %337 = vector.shape_cast %336 : vector<1x1x64x64xbf16> to vector<64x64xbf16>
    %cst_221 = arith.constant dense<0.000000e+00> : vector<32x64xf32>
    %338 = tpu.matmul %335, %337, %cst_221 {dimension_numbers = #tpu.dot_dimension_numbers<[1], [0], [0], [1], [0, 0, 1, 1], [], []>} : vector<32x64xbf16>, vector<64x64xbf16>, vector<32x64xf32> -> vector<32x64xf32>
    %339 = arith.addf %332, %338 : vector<32x64xf32>
    %340 = vector.shape_cast %339 : vector<32x64xf32> to vector<4x8x64xf32>
    %cst_222 = arith.constant 0.000000e+00 : f32
    %341 = vector.broadcast %cst_222 : f32 to vector<4x2x64xf32>
    %cst_223 = arith.constant 0.000000e+00 : f32
    %342 = vector.broadcast %cst_223 : f32 to vector<4x2x64xf32>
    %343 = tpu.concatenate %341, %340, %342 in 1 : vector<4x2x64xf32>, vector<4x8x64xf32>, vector<4x2x64xf32> -> vector<4x12x64xf32>
    %cst_224 = arith.constant 0.000000e+00 : f32
    %344 = vector.broadcast %cst_224 : f32 to vector<32x64xf32>
    %345 = vector.extract_strided_slice %343 {offsets = [0, 0, 0], sizes = [4, 8, 64], strides = [1, 1, 1]} : vector<4x12x64xf32> to vector<4x8x64xf32>
    %346 = vector.shape_cast %345 : vector<4x8x64xf32> to vector<32x64xf32>
    %347 = arith.truncf %346 : vector<32x64xf32> to vector<32x64xbf16>
    %c1_225 = arith.constant 1 : index
    %c0_226 = arith.constant 0 : index
    %c0_227 = arith.constant 0 : index
    %c0_228 = arith.constant 0 : index
    %348 = vector.load %arg6[%c1_225, %c0_226, %c0_227, %c0_228] : memref<2x5x64x64xbf16, #tpu.memory_space<vmem>>, vector<1x1x64x64xbf16>
    %349 = vector.shape_cast %348 : vector<1x1x64x64xbf16> to vector<64x64xbf16>
    %cst_229 = arith.constant dense<0.000000e+00> : vector<32x64xf32>
    %350 = tpu.matmul %347, %349, %cst_229 {dimension_numbers = #tpu.dot_dimension_numbers<[1], [0], [0], [1], [0, 0, 1, 1], [], []>} : vector<32x64xbf16>, vector<64x64xbf16>, vector<32x64xf32> -> vector<32x64xf32>
    %351 = arith.addf %344, %350 : vector<32x64xf32>
    %352 = vector.extract_strided_slice %343 {offsets = [0, 1, 0], sizes = [4, 8, 64], strides = [1, 1, 1]} : vector<4x12x64xf32> to vector<4x8x64xf32>
    %353 = vector.shape_cast %352 : vector<4x8x64xf32> to vector<32x64xf32>
    %354 = arith.truncf %353 : vector<32x64xf32> to vector<32x64xbf16>
    %c1_230 = arith.constant 1 : index
    %c1_231 = arith.constant 1 : index
    %c0_232 = arith.constant 0 : index
    %c0_233 = arith.constant 0 : index
    %355 = vector.load %arg6[%c1_230, %c1_231, %c0_232, %c0_233] : memref<2x5x64x64xbf16, #tpu.memory_space<vmem>>, vector<1x1x64x64xbf16>
    %356 = vector.shape_cast %355 : vector<1x1x64x64xbf16> to vector<64x64xbf16>
    %cst_234 = arith.constant dense<0.000000e+00> : vector<32x64xf32>
    %357 = tpu.matmul %354, %356, %cst_234 {dimension_numbers = #tpu.dot_dimension_numbers<[1], [0], [0], [1], [0, 0, 1, 1], [], []>} : vector<32x64xbf16>, vector<64x64xbf16>, vector<32x64xf32> -> vector<32x64xf32>
    %358 = arith.addf %351, %357 : vector<32x64xf32>
    %359 = vector.extract_strided_slice %343 {offsets = [0, 2, 0], sizes = [4, 8, 64], strides = [1, 1, 1]} : vector<4x12x64xf32> to vector<4x8x64xf32>
    %360 = vector.shape_cast %359 : vector<4x8x64xf32> to vector<32x64xf32>
    %361 = arith.truncf %360 : vector<32x64xf32> to vector<32x64xbf16>
    %c1_235 = arith.constant 1 : index
    %c2_236 = arith.constant 2 : index
    %c0_237 = arith.constant 0 : index
    %c0_238 = arith.constant 0 : index
    %362 = vector.load %arg6[%c1_235, %c2_236, %c0_237, %c0_238] : memref<2x5x64x64xbf16, #tpu.memory_space<vmem>>, vector<1x1x64x64xbf16>
    %363 = vector.shape_cast %362 : vector<1x1x64x64xbf16> to vector<64x64xbf16>
    %cst_239 = arith.constant dense<0.000000e+00> : vector<32x64xf32>
    %364 = tpu.matmul %361, %363, %cst_239 {dimension_numbers = #tpu.dot_dimension_numbers<[1], [0], [0], [1], [0, 0, 1, 1], [], []>} : vector<32x64xbf16>, vector<64x64xbf16>, vector<32x64xf32> -> vector<32x64xf32>
    %365 = arith.addf %358, %364 : vector<32x64xf32>
    %366 = vector.extract_strided_slice %343 {offsets = [0, 3, 0], sizes = [4, 8, 64], strides = [1, 1, 1]} : vector<4x12x64xf32> to vector<4x8x64xf32>
    %367 = vector.shape_cast %366 : vector<4x8x64xf32> to vector<32x64xf32>
    %368 = arith.truncf %367 : vector<32x64xf32> to vector<32x64xbf16>
    %c1_240 = arith.constant 1 : index
    %c3_241 = arith.constant 3 : index
    %c0_242 = arith.constant 0 : index
    %c0_243 = arith.constant 0 : index
    %369 = vector.load %arg6[%c1_240, %c3_241, %c0_242, %c0_243] : memref<2x5x64x64xbf16, #tpu.memory_space<vmem>>, vector<1x1x64x64xbf16>
    %370 = vector.shape_cast %369 : vector<1x1x64x64xbf16> to vector<64x64xbf16>
    %cst_244 = arith.constant dense<0.000000e+00> : vector<32x64xf32>
    %371 = tpu.matmul %368, %370, %cst_244 {dimension_numbers = #tpu.dot_dimension_numbers<[1], [0], [0], [1], [0, 0, 1, 1], [], []>} : vector<32x64xbf16>, vector<64x64xbf16>, vector<32x64xf32> -> vector<32x64xf32>
    %372 = arith.addf %365, %371 : vector<32x64xf32>
    %373 = vector.extract_strided_slice %343 {offsets = [0, 4, 0], sizes = [4, 8, 64], strides = [1, 1, 1]} : vector<4x12x64xf32> to vector<4x8x64xf32>
    %374 = vector.shape_cast %373 : vector<4x8x64xf32> to vector<32x64xf32>
    %375 = arith.truncf %374 : vector<32x64xf32> to vector<32x64xbf16>
    %c1_245 = arith.constant 1 : index
    %c4_246 = arith.constant 4 : index
    %c0_247 = arith.constant 0 : index
    %c0_248 = arith.constant 0 : index
    %376 = vector.load %arg6[%c1_245, %c4_246, %c0_247, %c0_248] : memref<2x5x64x64xbf16, #tpu.memory_space<vmem>>, vector<1x1x64x64xbf16>
    %377 = vector.shape_cast %376 : vector<1x1x64x64xbf16> to vector<64x64xbf16>
    %cst_249 = arith.constant dense<0.000000e+00> : vector<32x64xf32>
    %378 = tpu.matmul %375, %377, %cst_249 {dimension_numbers = #tpu.dot_dimension_numbers<[1], [0], [0], [1], [0, 0, 1, 1], [], []>} : vector<32x64xbf16>, vector<64x64xbf16>, vector<32x64xf32> -> vector<32x64xf32>
    %379 = arith.addf %372, %378 : vector<32x64xf32>
    %380 = vector.shape_cast %379 : vector<32x64xf32> to vector<4x8x64xf32>
    %cst_250 = arith.constant 0.000000e+00 : f32
    %381 = vector.broadcast %cst_250 : f32 to vector<4x1x64xf32>
    %cst_251 = arith.constant 0.000000e+00 : f32
    %382 = vector.broadcast %cst_251 : f32 to vector<4x1x64xf32>
    %383 = tpu.concatenate %381, %380, %382 in 1 : vector<4x1x64xf32>, vector<4x8x64xf32>, vector<4x1x64xf32> -> vector<4x10x64xf32>
    %cst_252 = arith.constant 0.000000e+00 : f32
    %384 = vector.broadcast %cst_252 : f32 to vector<32x64xf32>
    %385 = vector.extract_strided_slice %383 {offsets = [0, 0, 0], sizes = [4, 8, 64], strides = [1, 1, 1]} : vector<4x10x64xf32> to vector<4x8x64xf32>
    %386 = vector.shape_cast %385 : vector<4x8x64xf32> to vector<32x64xf32>
    %387 = arith.truncf %386 : vector<32x64xf32> to vector<32x64xbf16>
    %c1_253 = arith.constant 1 : index
    %c0_254 = arith.constant 0 : index
    %c0_255 = arith.constant 0 : index
    %c0_256 = arith.constant 0 : index
    %388 = vector.load %arg7[%c1_253, %c0_254, %c0_255, %c0_256] : memref<2x3x64x64xbf16, #tpu.memory_space<vmem>>, vector<1x1x64x64xbf16>
    %389 = vector.shape_cast %388 : vector<1x1x64x64xbf16> to vector<64x64xbf16>
    %cst_257 = arith.constant dense<0.000000e+00> : vector<32x64xf32>
    %390 = tpu.matmul %387, %389, %cst_257 {dimension_numbers = #tpu.dot_dimension_numbers<[1], [0], [0], [1], [0, 0, 1, 1], [], []>} : vector<32x64xbf16>, vector<64x64xbf16>, vector<32x64xf32> -> vector<32x64xf32>
    %391 = arith.addf %384, %390 : vector<32x64xf32>
    %392 = vector.extract_strided_slice %383 {offsets = [0, 1, 0], sizes = [4, 8, 64], strides = [1, 1, 1]} : vector<4x10x64xf32> to vector<4x8x64xf32>
    %393 = vector.shape_cast %392 : vector<4x8x64xf32> to vector<32x64xf32>
    %394 = arith.truncf %393 : vector<32x64xf32> to vector<32x64xbf16>
    %c1_258 = arith.constant 1 : index
    %c1_259 = arith.constant 1 : index
    %c0_260 = arith.constant 0 : index
    %c0_261 = arith.constant 0 : index
    %395 = vector.load %arg7[%c1_258, %c1_259, %c0_260, %c0_261] : memref<2x3x64x64xbf16, #tpu.memory_space<vmem>>, vector<1x1x64x64xbf16>
    %396 = vector.shape_cast %395 : vector<1x1x64x64xbf16> to vector<64x64xbf16>
    %cst_262 = arith.constant dense<0.000000e+00> : vector<32x64xf32>
    %397 = tpu.matmul %394, %396, %cst_262 {dimension_numbers = #tpu.dot_dimension_numbers<[1], [0], [0], [1], [0, 0, 1, 1], [], []>} : vector<32x64xbf16>, vector<64x64xbf16>, vector<32x64xf32> -> vector<32x64xf32>
    %398 = arith.addf %391, %397 : vector<32x64xf32>
    %399 = vector.extract_strided_slice %383 {offsets = [0, 2, 0], sizes = [4, 8, 64], strides = [1, 1, 1]} : vector<4x10x64xf32> to vector<4x8x64xf32>
    %400 = vector.shape_cast %399 : vector<4x8x64xf32> to vector<32x64xf32>
    %401 = arith.truncf %400 : vector<32x64xf32> to vector<32x64xbf16>
    %c1_263 = arith.constant 1 : index
    %c2_264 = arith.constant 2 : index
    %c0_265 = arith.constant 0 : index
    %c0_266 = arith.constant 0 : index
    %402 = vector.load %arg7[%c1_263, %c2_264, %c0_265, %c0_266] : memref<2x3x64x64xbf16, #tpu.memory_space<vmem>>, vector<1x1x64x64xbf16>
    %403 = vector.shape_cast %402 : vector<1x1x64x64xbf16> to vector<64x64xbf16>
    %cst_267 = arith.constant dense<0.000000e+00> : vector<32x64xf32>
    %404 = tpu.matmul %401, %403, %cst_267 {dimension_numbers = #tpu.dot_dimension_numbers<[1], [0], [0], [1], [0, 0, 1, 1], [], []>} : vector<32x64xbf16>, vector<64x64xbf16>, vector<32x64xf32> -> vector<32x64xf32>
    %405 = arith.addf %398, %404 : vector<32x64xf32>
    %406 = vector.shape_cast %405 : vector<32x64xf32> to vector<4x8x64xf32>
    %cst_268 = arith.constant 0.000000e+00 : f32
    %407 = vector.broadcast %cst_268 : f32 to vector<32x64xf32>
    %408 = vector.shape_cast %286 : vector<4x8x64xf32> to vector<32x64xf32>
    %409 = arith.truncf %408 : vector<32x64xf32> to vector<32x64xbf16>
    %c1_269 = arith.constant 1 : index
    %c0_270 = arith.constant 0 : index
    %c0_271 = arith.constant 0 : index
    %c0_272 = arith.constant 0 : index
    %410 = vector.load %arg8[%c1_269, %c0_270, %c0_271, %c0_272] : memref<2x1x64x64xbf16, #tpu.memory_space<vmem>>, vector<1x1x64x64xbf16>
    %411 = vector.shape_cast %410 : vector<1x1x64x64xbf16> to vector<64x64xbf16>
    %cst_273 = arith.constant dense<0.000000e+00> : vector<32x64xf32>
    %412 = tpu.matmul %409, %411, %cst_273 {dimension_numbers = #tpu.dot_dimension_numbers<[1], [0], [0], [1], [0, 0, 1, 1], [], []>} : vector<32x64xbf16>, vector<64x64xbf16>, vector<32x64xf32> -> vector<32x64xf32>
    %413 = arith.addf %407, %412 : vector<32x64xf32>
    %c1_274 = arith.constant 1 : index
    %c0_275 = arith.constant 0 : index
    %c0_276 = arith.constant 0 : index
    %414 = vector.load %arg9[%c1_274, %c0_275, %c0_276] : memref<2x1x64xf32, #tpu.memory_space<vmem>>, vector<1x1x64xf32>
    %415 = vector.shape_cast %414 : vector<1x1x64xf32> to vector<1x64xf32>
    %416 = vector.broadcast %415 : vector<1x64xf32> to vector<32x64xf32>
    %417 = arith.mulf %413, %416 : vector<32x64xf32>
    %c1_277 = arith.constant 1 : index
    %c0_278 = arith.constant 0 : index
    %c0_279 = arith.constant 0 : index
    %418 = vector.load %arg10[%c1_277, %c0_278, %c0_279] : memref<2x1x64xf32, #tpu.memory_space<vmem>>, vector<1x1x64xf32>
    %419 = vector.shape_cast %418 : vector<1x1x64xf32> to vector<1x64xf32>
    %420 = vector.broadcast %419 : vector<1x64xf32> to vector<32x64xf32>
    %421 = arith.addf %417, %420 : vector<32x64xf32>
    %422 = vector.shape_cast %421 : vector<32x64xf32> to vector<4x8x64xf32>
    %423 = arith.addf %406, %422 : vector<4x8x64xf32>
    %cst_280 = arith.constant 0.000000e+00 : f32
    %424 = vector.broadcast %cst_280 : f32 to vector<4x8x64xf32>
    %425 = arith.maximumf %423, %424 : vector<4x8x64xf32>
    %cst_281 = arith.constant 0.000000e+00 : f32
    %426 = vector.broadcast %cst_281 : f32 to vector<4x1x64xf32>
    %cst_282 = arith.constant 0.000000e+00 : f32
    %427 = vector.broadcast %cst_282 : f32 to vector<4x1x64xf32>
    %428 = tpu.concatenate %426, %425, %427 in 1 : vector<4x1x64xf32>, vector<4x8x64xf32>, vector<4x1x64xf32> -> vector<4x10x64xf32>
    %cst_283 = arith.constant 0.000000e+00 : f32
    %429 = vector.broadcast %cst_283 : f32 to vector<32x128xf32>
    %430 = vector.extract_strided_slice %428 {offsets = [0, 0, 0], sizes = [4, 8, 64], strides = [1, 1, 1]} : vector<4x10x64xf32> to vector<4x8x64xf32>
    %431 = vector.shape_cast %430 : vector<4x8x64xf32> to vector<32x64xf32>
    %432 = arith.truncf %431 : vector<32x64xf32> to vector<32x64xbf16>
    %c1_284 = arith.constant 1 : index
    %c0_285 = arith.constant 0 : index
    %c0_286 = arith.constant 0 : index
    %c0_287 = arith.constant 0 : index
    %433 = vector.load %arg11[%c1_284, %c0_285, %c0_286, %c0_287] : memref<2x3x64x128xbf16, #tpu.memory_space<vmem>>, vector<1x1x64x128xbf16>
    %434 = vector.shape_cast %433 : vector<1x1x64x128xbf16> to vector<64x128xbf16>
    %cst_288 = arith.constant dense<0.000000e+00> : vector<32x128xf32>
    %435 = tpu.matmul %432, %434, %cst_288 {dimension_numbers = #tpu.dot_dimension_numbers<[1], [0], [0], [1], [0, 0, 1, 1], [], []>} : vector<32x64xbf16>, vector<64x128xbf16>, vector<32x128xf32> -> vector<32x128xf32>
    %436 = arith.addf %429, %435 : vector<32x128xf32>
    %437 = vector.extract_strided_slice %428 {offsets = [0, 1, 0], sizes = [4, 8, 64], strides = [1, 1, 1]} : vector<4x10x64xf32> to vector<4x8x64xf32>
    %438 = vector.shape_cast %437 : vector<4x8x64xf32> to vector<32x64xf32>
    %439 = arith.truncf %438 : vector<32x64xf32> to vector<32x64xbf16>
    %c1_289 = arith.constant 1 : index
    %c1_290 = arith.constant 1 : index
    %c0_291 = arith.constant 0 : index
    %c0_292 = arith.constant 0 : index
    %440 = vector.load %arg11[%c1_289, %c1_290, %c0_291, %c0_292] : memref<2x3x64x128xbf16, #tpu.memory_space<vmem>>, vector<1x1x64x128xbf16>
    %441 = vector.shape_cast %440 : vector<1x1x64x128xbf16> to vector<64x128xbf16>
    %cst_293 = arith.constant dense<0.000000e+00> : vector<32x128xf32>
    %442 = tpu.matmul %439, %441, %cst_293 {dimension_numbers = #tpu.dot_dimension_numbers<[1], [0], [0], [1], [0, 0, 1, 1], [], []>} : vector<32x64xbf16>, vector<64x128xbf16>, vector<32x128xf32> -> vector<32x128xf32>
    %443 = arith.addf %436, %442 : vector<32x128xf32>
    %444 = vector.extract_strided_slice %428 {offsets = [0, 2, 0], sizes = [4, 8, 64], strides = [1, 1, 1]} : vector<4x10x64xf32> to vector<4x8x64xf32>
    %445 = vector.shape_cast %444 : vector<4x8x64xf32> to vector<32x64xf32>
    %446 = arith.truncf %445 : vector<32x64xf32> to vector<32x64xbf16>
    %c1_294 = arith.constant 1 : index
    %c2_295 = arith.constant 2 : index
    %c0_296 = arith.constant 0 : index
    %c0_297 = arith.constant 0 : index
    %447 = vector.load %arg11[%c1_294, %c2_295, %c0_296, %c0_297] : memref<2x3x64x128xbf16, #tpu.memory_space<vmem>>, vector<1x1x64x128xbf16>
    %448 = vector.shape_cast %447 : vector<1x1x64x128xbf16> to vector<64x128xbf16>
    %cst_298 = arith.constant dense<0.000000e+00> : vector<32x128xf32>
    %449 = tpu.matmul %446, %448, %cst_298 {dimension_numbers = #tpu.dot_dimension_numbers<[1], [0], [0], [1], [0, 0, 1, 1], [], []>} : vector<32x64xbf16>, vector<64x128xbf16>, vector<32x128xf32> -> vector<32x128xf32>
    %450 = arith.addf %443, %449 : vector<32x128xf32>
    %c1_299 = arith.constant 1 : index
    %c0_300 = arith.constant 0 : index
    %c0_301 = arith.constant 0 : index
    %451 = vector.load %arg12[%c1_299, %c0_300, %c0_301] : memref<2x1x128xf32, #tpu.memory_space<vmem>>, vector<1x1x128xf32>
    %452 = vector.shape_cast %451 : vector<1x1x128xf32> to vector<1x128xf32>
    %453 = vector.broadcast %452 : vector<1x128xf32> to vector<32x128xf32>
    %454 = arith.mulf %450, %453 : vector<32x128xf32>
    %c1_302 = arith.constant 1 : index
    %c0_303 = arith.constant 0 : index
    %c0_304 = arith.constant 0 : index
    %455 = vector.load %arg13[%c1_302, %c0_303, %c0_304] : memref<2x1x128xf32, #tpu.memory_space<vmem>>, vector<1x1x128xf32>
    %456 = vector.shape_cast %455 : vector<1x1x128xf32> to vector<1x128xf32>
    %457 = vector.broadcast %456 : vector<1x128xf32> to vector<32x128xf32>
    %458 = arith.addf %454, %457 : vector<32x128xf32>
    %459 = vector.shape_cast %458 : vector<32x128xf32> to vector<4x8x128xf32>
    %cst_305 = arith.constant 0.000000e+00 : f32
    %460 = vector.broadcast %cst_305 : f32 to vector<4x8x128xf32>
    %461 = arith.cmpf ogt, %459, %460 : vector<4x8x128xf32>
    %cst_306 = arith.constant 2.000000e-01 : f32
    %462 = vector.broadcast %cst_306 : f32 to vector<4x8x128xf32>
    %463 = arith.mulf %462, %459 : vector<4x8x128xf32>
    %464 = arith.select %461, %459, %463 : vector<4x8x128xi1>, vector<4x8x128xf32>
    %cst_307 = arith.constant 0.000000e+00 : f32
    %465 = vector.broadcast %cst_307 : f32 to vector<4x1x128xf32>
    %cst_308 = arith.constant 0.000000e+00 : f32
    %466 = vector.broadcast %cst_308 : f32 to vector<4x1x128xf32>
    %467 = tpu.concatenate %465, %464, %466 in 1 : vector<4x1x128xf32>, vector<4x8x128xf32>, vector<4x1x128xf32> -> vector<4x10x128xf32>
    %cst_309 = arith.constant 0.000000e+00 : f32
    %468 = vector.broadcast %cst_309 : f32 to vector<32x256xf32>
    %469 = vector.extract_strided_slice %467 {offsets = [0, 0, 0], sizes = [4, 8, 128], strides = [1, 1, 1]} : vector<4x10x128xf32> to vector<4x8x128xf32>
    %470 = vector.shape_cast %469 : vector<4x8x128xf32> to vector<32x128xf32>
    %471 = arith.truncf %470 : vector<32x128xf32> to vector<32x128xbf16>
    %c1_310 = arith.constant 1 : index
    %c0_311 = arith.constant 0 : index
    %c0_312 = arith.constant 0 : index
    %c0_313 = arith.constant 0 : index
    %472 = vector.load %arg14[%c1_310, %c0_311, %c0_312, %c0_313] : memref<2x3x128x256xbf16, #tpu.memory_space<vmem>>, vector<1x1x128x256xbf16>
    %473 = vector.shape_cast %472 : vector<1x1x128x256xbf16> to vector<128x256xbf16>
    %cst_314 = arith.constant dense<0.000000e+00> : vector<32x256xf32>
    %474 = tpu.matmul %471, %473, %cst_314 {dimension_numbers = #tpu.dot_dimension_numbers<[1], [0], [0], [1], [0, 0, 1, 1], [], []>} : vector<32x128xbf16>, vector<128x256xbf16>, vector<32x256xf32> -> vector<32x256xf32>
    %475 = arith.addf %468, %474 : vector<32x256xf32>
    %476 = vector.extract_strided_slice %467 {offsets = [0, 1, 0], sizes = [4, 8, 128], strides = [1, 1, 1]} : vector<4x10x128xf32> to vector<4x8x128xf32>
    %477 = vector.shape_cast %476 : vector<4x8x128xf32> to vector<32x128xf32>
    %478 = arith.truncf %477 : vector<32x128xf32> to vector<32x128xbf16>
    %c1_315 = arith.constant 1 : index
    %c1_316 = arith.constant 1 : index
    %c0_317 = arith.constant 0 : index
    %c0_318 = arith.constant 0 : index
    %479 = vector.load %arg14[%c1_315, %c1_316, %c0_317, %c0_318] : memref<2x3x128x256xbf16, #tpu.memory_space<vmem>>, vector<1x1x128x256xbf16>
    %480 = vector.shape_cast %479 : vector<1x1x128x256xbf16> to vector<128x256xbf16>
    %cst_319 = arith.constant dense<0.000000e+00> : vector<32x256xf32>
    %481 = tpu.matmul %478, %480, %cst_319 {dimension_numbers = #tpu.dot_dimension_numbers<[1], [0], [0], [1], [0, 0, 1, 1], [], []>} : vector<32x128xbf16>, vector<128x256xbf16>, vector<32x256xf32> -> vector<32x256xf32>
    %482 = arith.addf %475, %481 : vector<32x256xf32>
    %483 = vector.extract_strided_slice %467 {offsets = [0, 2, 0], sizes = [4, 8, 128], strides = [1, 1, 1]} : vector<4x10x128xf32> to vector<4x8x128xf32>
    %484 = vector.shape_cast %483 : vector<4x8x128xf32> to vector<32x128xf32>
    %485 = arith.truncf %484 : vector<32x128xf32> to vector<32x128xbf16>
    %c1_320 = arith.constant 1 : index
    %c2_321 = arith.constant 2 : index
    %c0_322 = arith.constant 0 : index
    %c0_323 = arith.constant 0 : index
    %486 = vector.load %arg14[%c1_320, %c2_321, %c0_322, %c0_323] : memref<2x3x128x256xbf16, #tpu.memory_space<vmem>>, vector<1x1x128x256xbf16>
    %487 = vector.shape_cast %486 : vector<1x1x128x256xbf16> to vector<128x256xbf16>
    %cst_324 = arith.constant dense<0.000000e+00> : vector<32x256xf32>
    %488 = tpu.matmul %485, %487, %cst_324 {dimension_numbers = #tpu.dot_dimension_numbers<[1], [0], [0], [1], [0, 0, 1, 1], [], []>} : vector<32x128xbf16>, vector<128x256xbf16>, vector<32x256xf32> -> vector<32x256xf32>
    %489 = arith.addf %482, %488 : vector<32x256xf32>
    %c1_325 = arith.constant 1 : index
    %c0_326 = arith.constant 0 : index
    %c0_327 = arith.constant 0 : index
    %490 = vector.load %arg15[%c1_325, %c0_326, %c0_327] : memref<2x1x256xf32, #tpu.memory_space<vmem>>, vector<1x1x256xf32>
    %491 = vector.shape_cast %490 : vector<1x1x256xf32> to vector<1x256xf32>
    %492 = vector.broadcast %491 : vector<1x256xf32> to vector<32x256xf32>
    %493 = arith.mulf %489, %492 : vector<32x256xf32>
    %c1_328 = arith.constant 1 : index
    %c0_329 = arith.constant 0 : index
    %c0_330 = arith.constant 0 : index
    %494 = vector.load %arg16[%c1_328, %c0_329, %c0_330] : memref<2x1x256xf32, #tpu.memory_space<vmem>>, vector<1x1x256xf32>
    %495 = vector.shape_cast %494 : vector<1x1x256xf32> to vector<1x256xf32>
    %496 = vector.broadcast %495 : vector<1x256xf32> to vector<32x256xf32>
    %497 = arith.addf %493, %496 : vector<32x256xf32>
    %498 = vector.shape_cast %497 : vector<32x256xf32> to vector<4x8x256xf32>
    %cst_331 = arith.constant 0.000000e+00 : f32
    %499 = vector.broadcast %cst_331 : f32 to vector<4x8x256xf32>
    %500 = arith.cmpf ogt, %498, %499 : vector<4x8x256xf32>
    %cst_332 = arith.constant 2.500000e-01 : f32
    %501 = vector.broadcast %cst_332 : f32 to vector<4x8x256xf32>
    %502 = arith.mulf %501, %498 : vector<4x8x256xf32>
    %503 = arith.select %500, %498, %502 : vector<4x8x256xi1>, vector<4x8x256xf32>
    %cst_333 = arith.constant 0.000000e+00 : f32
    %504 = vector.broadcast %cst_333 : f32 to vector<4x1x256xf32>
    %cst_334 = arith.constant 0.000000e+00 : f32
    %505 = vector.broadcast %cst_334 : f32 to vector<4x1x256xf32>
    %506 = tpu.concatenate %504, %503, %505 in 1 : vector<4x1x256xf32>, vector<4x8x256xf32>, vector<4x1x256xf32> -> vector<4x10x256xf32>
    %cst_335 = arith.constant 0.000000e+00 : f32
    %507 = vector.broadcast %cst_335 : f32 to vector<32x128xf32>
    %508 = vector.extract_strided_slice %506 {offsets = [0, 0, 0], sizes = [4, 8, 256], strides = [1, 1, 1]} : vector<4x10x256xf32> to vector<4x8x256xf32>
    %509 = vector.shape_cast %508 : vector<4x8x256xf32> to vector<32x256xf32>
    %510 = arith.truncf %509 : vector<32x256xf32> to vector<32x256xbf16>
    %c1_336 = arith.constant 1 : index
    %c0_337 = arith.constant 0 : index
    %c0_338 = arith.constant 0 : index
    %c0_339 = arith.constant 0 : index
    %511 = vector.load %arg17[%c1_336, %c0_337, %c0_338, %c0_339] : memref<2x3x256x128xbf16, #tpu.memory_space<vmem>>, vector<1x1x256x128xbf16>
    %512 = vector.shape_cast %511 : vector<1x1x256x128xbf16> to vector<256x128xbf16>
    %cst_340 = arith.constant dense<0.000000e+00> : vector<32x128xf32>
    %513 = tpu.matmul %510, %512, %cst_340 {dimension_numbers = #tpu.dot_dimension_numbers<[1], [0], [0], [1], [0, 0, 1, 1], [], []>} : vector<32x256xbf16>, vector<256x128xbf16>, vector<32x128xf32> -> vector<32x128xf32>
    %514 = arith.addf %507, %513 : vector<32x128xf32>
    %515 = vector.extract_strided_slice %506 {offsets = [0, 1, 0], sizes = [4, 8, 256], strides = [1, 1, 1]} : vector<4x10x256xf32> to vector<4x8x256xf32>
    %516 = vector.shape_cast %515 : vector<4x8x256xf32> to vector<32x256xf32>
    %517 = arith.truncf %516 : vector<32x256xf32> to vector<32x256xbf16>
    %c1_341 = arith.constant 1 : index
    %c1_342 = arith.constant 1 : index
    %c0_343 = arith.constant 0 : index
    %c0_344 = arith.constant 0 : index
    %518 = vector.load %arg17[%c1_341, %c1_342, %c0_343, %c0_344] : memref<2x3x256x128xbf16, #tpu.memory_space<vmem>>, vector<1x1x256x128xbf16>
    %519 = vector.shape_cast %518 : vector<1x1x256x128xbf16> to vector<256x128xbf16>
    %cst_345 = arith.constant dense<0.000000e+00> : vector<32x128xf32>
    %520 = tpu.matmul %517, %519, %cst_345 {dimension_numbers = #tpu.dot_dimension_numbers<[1], [0], [0], [1], [0, 0, 1, 1], [], []>} : vector<32x256xbf16>, vector<256x128xbf16>, vector<32x128xf32> -> vector<32x128xf32>
    %521 = arith.addf %514, %520 : vector<32x128xf32>
    %522 = vector.extract_strided_slice %506 {offsets = [0, 2, 0], sizes = [4, 8, 256], strides = [1, 1, 1]} : vector<4x10x256xf32> to vector<4x8x256xf32>
    %523 = vector.shape_cast %522 : vector<4x8x256xf32> to vector<32x256xf32>
    %524 = arith.truncf %523 : vector<32x256xf32> to vector<32x256xbf16>
    %c1_346 = arith.constant 1 : index
    %c2_347 = arith.constant 2 : index
    %c0_348 = arith.constant 0 : index
    %c0_349 = arith.constant 0 : index
    %525 = vector.load %arg17[%c1_346, %c2_347, %c0_348, %c0_349] : memref<2x3x256x128xbf16, #tpu.memory_space<vmem>>, vector<1x1x256x128xbf16>
    %526 = vector.shape_cast %525 : vector<1x1x256x128xbf16> to vector<256x128xbf16>
    %cst_350 = arith.constant dense<0.000000e+00> : vector<32x128xf32>
    %527 = tpu.matmul %524, %526, %cst_350 {dimension_numbers = #tpu.dot_dimension_numbers<[1], [0], [0], [1], [0, 0, 1, 1], [], []>} : vector<32x256xbf16>, vector<256x128xbf16>, vector<32x128xf32> -> vector<32x128xf32>
    %528 = arith.addf %521, %527 : vector<32x128xf32>
    %c1_351 = arith.constant 1 : index
    %c0_352 = arith.constant 0 : index
    %c0_353 = arith.constant 0 : index
    %529 = vector.load %arg18[%c1_351, %c0_352, %c0_353] : memref<2x1x128xf32, #tpu.memory_space<vmem>>, vector<1x1x128xf32>
    %530 = vector.shape_cast %529 : vector<1x1x128xf32> to vector<1x128xf32>
    %531 = vector.broadcast %530 : vector<1x128xf32> to vector<32x128xf32>
    %532 = arith.mulf %528, %531 : vector<32x128xf32>
    %c1_354 = arith.constant 1 : index
    %c0_355 = arith.constant 0 : index
    %c0_356 = arith.constant 0 : index
    %533 = vector.load %arg19[%c1_354, %c0_355, %c0_356] : memref<2x1x128xf32, #tpu.memory_space<vmem>>, vector<1x1x128xf32>
    %534 = vector.shape_cast %533 : vector<1x1x128xf32> to vector<1x128xf32>
    %535 = vector.broadcast %534 : vector<1x128xf32> to vector<32x128xf32>
    %536 = arith.addf %532, %535 : vector<32x128xf32>
    %537 = vector.shape_cast %536 : vector<32x128xf32> to vector<4x8x128xf32>
    %cst_357 = arith.constant 0.000000e+00 : f32
    %538 = vector.broadcast %cst_357 : f32 to vector<4x8x128xf32>
    %539 = arith.cmpf ogt, %537, %538 : vector<4x8x128xf32>
    %540 = math.exp %537 : vector<4x8x128xf32>
    %cst_358 = arith.constant 1.000000e+00 : f32
    %541 = vector.broadcast %cst_358 : f32 to vector<4x8x128xf32>
    %542 = arith.subf %540, %541 : vector<4x8x128xf32>
    %cst_359 = arith.constant 3.000000e-01 : f32
    %543 = vector.broadcast %cst_359 : f32 to vector<4x8x128xf32>
    %544 = arith.mulf %543, %542 : vector<4x8x128xf32>
    %545 = arith.select %539, %537, %544 : vector<4x8x128xi1>, vector<4x8x128xf32>
    %cst_360 = arith.constant dense<0.000000e+00> : vector<4x128xf32>
    %546 = vector.multi_reduction <add>, %545, %cst_360 [1] : vector<4x8x128xf32> to vector<4x128xf32>
    %cst_361 = arith.constant 8.000000e+00 : f32
    %547 = vector.broadcast %cst_361 : f32 to vector<4x128xf32>
    %548 = arith.divf %546, %547 : vector<4x128xf32>
    %549 = vector.extract_strided_slice %548 {offsets = [0, 0], sizes = [2, 128], strides = [1, 1]} : vector<4x128xf32> to vector<2x128xf32>
    %550 = vector.extract_strided_slice %548 {offsets = [2, 0], sizes = [2, 128], strides = [1, 1]} : vector<4x128xf32> to vector<2x128xf32>
    %c0_362 = arith.constant 0 : index
    %c0_363 = arith.constant 0 : index
    %551 = vector.load %arg22[%c0_362, %c0_363] : memref<2x128xf32, #tpu.memory_space<vmem>>, vector<2x128xf32>
    tpu.vector_store %arg22[%c0_362, %c0_363], %262 {strides = array<i32>} : memref<2x128xf32, #tpu.memory_space<vmem>>, vector<2x128xf32>,
    %c0_364 = arith.constant 0 : index
    %c0_365 = arith.constant 0 : index
    %c0_366 = arith.constant 0 : index
    %552 = vector.load %arg20[%c0_364, %c0_365, %c0_366] : memref<3x128x6xf32, #tpu.memory_space<vmem>>, vector<1x128x6xf32>
    %553 = vector.shape_cast %552 : vector<1x128x6xf32> to vector<128x6xf32>
    %cst_367 = arith.constant dense<0.000000e+00> : vector<2x6xf32>
    %554 = tpu.matmul %262, %553, %cst_367 {dimension_numbers = #tpu.dot_dimension_numbers<[1], [0], [0], [1], [0, 0, 1, 1], [], []>} : vector<2x128xf32>, vector<128x6xf32>, vector<2x6xf32> -> vector<2x6xf32>
    %c1_368 = arith.constant 1 : index
    %c0_369 = arith.constant 0 : index
    %c0_370 = arith.constant 0 : index
    %555 = vector.load %arg20[%c1_368, %c0_369, %c0_370] : memref<3x128x6xf32, #tpu.memory_space<vmem>>, vector<1x128x6xf32>
    %556 = vector.shape_cast %555 : vector<1x128x6xf32> to vector<128x6xf32>
    %cst_371 = arith.constant dense<0.000000e+00> : vector<2x6xf32>
    %557 = tpu.matmul %549, %556, %cst_371 {dimension_numbers = #tpu.dot_dimension_numbers<[1], [0], [0], [1], [0, 0, 1, 1], [], []>} : vector<2x128xf32>, vector<128x6xf32>, vector<2x6xf32> -> vector<2x6xf32>
    %558 = arith.addf %554, %557 : vector<2x6xf32>
    %c2_372 = arith.constant 2 : index
    %c0_373 = arith.constant 0 : index
    %c0_374 = arith.constant 0 : index
    %559 = vector.load %arg20[%c2_372, %c0_373, %c0_374] : memref<3x128x6xf32, #tpu.memory_space<vmem>>, vector<1x128x6xf32>
    %560 = vector.shape_cast %559 : vector<1x128x6xf32> to vector<128x6xf32>
    %cst_375 = arith.constant dense<0.000000e+00> : vector<2x6xf32>
    %561 = tpu.matmul %550, %560, %cst_375 {dimension_numbers = #tpu.dot_dimension_numbers<[1], [0], [0], [1], [0, 0, 1, 1], [], []>} : vector<2x128xf32>, vector<128x6xf32>, vector<2x6xf32> -> vector<2x6xf32>
    %562 = arith.addf %558, %561 : vector<2x6xf32>
    %c0_376 = arith.constant 0 : index
    %c0_377 = arith.constant 0 : index
    %563 = vector.load %arg21[%c0_376, %c0_377] : memref<1x6xf32, #tpu.memory_space<vmem>>, vector<1x6xf32>
    %564 = vector.broadcast %563 : vector<1x6xf32> to vector<2x6xf32>
    %565 = arith.addf %562, %564 : vector<2x6xf32>
    %c0_378 = arith.constant 0 : index
    %c0_379 = arith.constant 0 : index
    %566 = vector.load %arg23[%c0_378, %c0_379] : memref<2x6xf32, #tpu.memory_space<vmem>>, vector<2x6xf32>
    tpu.vector_store %arg23[%c0_378, %c0_379], %565 {strides = array<i32>} : memref<2x6xf32, #tpu.memory_space<vmem>>, vector<2x6xf32>,
    return
  }
}

</mosaic_0001>

<bundles_post_ra>
// kernel: wavelet1_rescnn_forward.1
= control target key start
LH: loop header
LB: loop body
LE: loop exit
PB: predicated region body
PF: predicated region fallthrough
CT: control target
= control target key end

     0   :  { %s11415_s0 = inlined_call_operand.vmem [shape: f32[2,16,64], index: 0, kind: input, shape index: {}]   ;;  %s11416_s1 = inlined_call_operand.vmem [shape: f32[16,128], index: 1, kind: input, shape index: {}]   ;;  %s11417_s2 = inlined_call_operand.vmem [shape: bf16[32,16], index: 2, kind: input, shape index: {}]   ;;  %s11418_s3 = inlined_call_operand.vmem [shape: f32[32,1], index: 3, kind: input, shape index: {}]   ;;  %s11419_s4 = inlined_call_operand.vmem [shape: bf16[16,32], index: 4, kind: input, shape index: {}]   ;;  %s11420_s5 = inlined_call_operand.vmem [shape: bf16[2,7,64,64], index: 5, kind: input, shape index: {}]   ;;  %s11421_s6 = inlined_call_operand.hbm [shape: bf16[2,5,64,64], index: 6, kind: input, shape index: {}]   ;;  %s11422_s7 = inlined_call_operand.hbm [shape: bf16[2,3,64,64], index: 7, kind: input, shape index: {}]   ;;  %s11423_s8 = inlined_call_operand.vmem [shape: bf16[2,1,64,64], index: 8, kind: input, shape index: {}]   ;;  %s11424_s9 = inlined_call_operand.vmem [shape: f32[2,1,64], index: 9, kind: input, shape index: {}]   ;;  %s11425_s10 = inlined_call_operand.vmem [shape: f32[2,1,64], index: 10, kind: input, shape index: {}]   ;;  %s11426_s11 = inlined_call_operand.hbm [shape: bf16[2,3,64,128], index: 11, kind: input, shape index: {}]   ;;  %s11427_s12 = inlined_call_operand.vmem [shape: f32[2,1,128], index: 12, kind: input, shape index: {}]   ;;  %s11428_s13 = inlined_call_operand.vmem [shape: f32[2,1,128], index: 13, kind: input, shape index: {}]   ;;  %s11429_s14 = inlined_call_operand.hbm [shape: bf16[2,3,128,256], index: 14, kind: input, shape index: {}]   ;;  %s11430_s15 = inlined_call_operand.vmem [shape: f32[2,1,256], index: 15, kind: input, shape index: {}]   ;;  %s11431_s16 = inlined_call_operand.vmem [shape: f32[2,1,256], index: 16, kind: input, shape index: {}]   ;;  %s11432_s17 = inlined_call_operand.hbm [shape: bf16[2,3,256,128], index: 17, kind: input, shape index: {}]   ;;  %s11433_s18 = inlined_call_operand.vmem [shape: f32[2,1,128], index: 18, kind: input, shape index: {}]   ;;  %s11434_s19 = inlined_call_operand.vmem [shape: f32[2,1,128], index: 19, kind: input, shape index: {}]   ;;  %s11435_s20 = inlined_call_operand.vmem [shape: f32[3,128,6], index: 20, kind: input, shape index: {}]   ;;  %s11436_s21 = inlined_call_operand.vmem [shape: f32[1,6], index: 21, kind: input, shape index: {}]   ;;  %s11437_s22 = inlined_call_operand.hbm [shape: f32[2,128], index: 22, kind: output, shape index: {0}]   ;;  %s11438_s23 = inlined_call_operand.hbm [shape: f32[2,6], index: 23, kind: output, shape index: {1}]  }
   0x1   :  { %11444 = sst [smem:[#allocation19_spill]] %s11415_s0 }
   0x2   :  { %11445 = sst [smem:[#allocation20_spill]] %s11416_s1 }
   0x3   :  { %11446 = sst [smem:[#allocation21_spill]] %s11417_s2 }
   0x4   :  { %11447 = sst [smem:[#allocation22_spill]] %s11418_s3 }
   0x5   :  { %11448 = sst [smem:[#allocation23_spill]] %s11419_s4 }
   0x6   :  { %11449 = sst [smem:[#allocation24_spill]] %s11420_s5 }
   0x7   :  { %11450 = sst [smem:[#allocation25_spill]] %s11421_s6 }
   0x8   :  { %11451 = sst [smem:[#allocation26_spill]] %s11422_s7 }
   0x9   :  { %11452 = sst [smem:[#allocation27_spill]] %s11438_s23 }
   0xa   :  { %29 = vsyncpa [#allocation3], 0 }
   0xb   :  { %30 = vsyncpa [#allocation6], 0 }
   0xc   :  { %31 = vsyncpa [#allocation9], 0 }
   0xd   :  { %32 = vsyncpa [#allocation4], 0 }
   0xe   :  { %33 = vsyncpa [#allocation13], 0  ;;  %s9826_s4 = smov [#allocation5]   ;;  %s9827_s24 = smov [#allocation8]  }
   0xf   :  { %s63_s30 = sshll.u32 %s9826_s4, 4  ;;  %s97_s25 = sshll.u32 %s9827_s24, 4  ;;  %s64_s30 = int_to_ptr.vmem [resolvable:$true] %s63_s30  ;;  %s98_s25 = int_to_ptr.vmem [resolvable:$true] %s97_s25 }
  0x10   :  { %s9684_s5 = scalar_lea.vmem %s64_s30, 3072  ;;  %p9689_p1 = scmp.lt.s32.totalorder %s64_s30, %s64_s30 }
  0x11   :  { %p9685_p0 = scmp.ne.s32.totalorder %s64_s30, %s9684_s5  ;;  %p9690_p2 = scmp.lt.s32.totalorder %s9684_s5, %s9684_s5 }
  0x13   :  { %p9691_p3 = por %p9690_p2, %p9689_p1 }
  0x15   :  { %p9692_p4 = pnand %p9691_p3, %p9685_p0 }
  0x17   :  { %9695 = shalt.err (!%p9692_p4)
}
  0x18   :  { %s9828_s1 = smov 64   ;;  %s9829_s26 = smov 4  }
  0x19   :  { %s11453_s27 = sld [smem:[#allocation26_spill]]  ;;  %s9704_s7 = scalar_lea.vmem %s98_s25, 12288 }
  0x1a   :  { %p9705_p5 = scmp.ne.s32.totalorder %s98_s25, %s9704_s7  ;;  %p9709_p6 = scmp.lt.s32.totalorder %s98_s25, %s98_s25 }
  0x1b   :  { %p9710_p7 = scmp.lt.s32.totalorder %s9704_s7, %s9704_s7 }
  0x1d   :  { %p9711_p8 = por %p9710_p7, %p9709_p6 }
  0x1f   :  { %69 = dma.hbm_to_vmem [thread:$0]  %s11453_s27, 3072, %s64_s30, [#allocation6], %s9828_s1, %s9828_s1, %s9829_s26  }
  0x20   :  { %p9712_p9 = pnand %p9711_p8, %p9705_p5 }
  0x22   :  { %9715 = shalt.err (!%p9712_p9)
}
  0x23   :  { %s9830_s28 = smov 128   ;;  %s9831_s29 = smov 8  }
  0x24   :  { %103 = dma.hbm_to_vmem [thread:$0]  %s11429_s14, 12288, %s98_s25, [#allocation9], %s9830_s28, %s9830_s28, %s9831_s29  }
  0x25   :  { %s9832_s4 = smov [#allocation2]   ;;  %s9833_s5 = smov [#allocation7]  }
  0x26   :  { %s51_s24 = sshll.u32 %s9832_s4, 4  ;;  %s81_s23 = sshll.u32 %s9833_s5, 4  ;;  %s52_s24 = int_to_ptr.vmem [resolvable:$true] %s51_s24  ;;  %s82_s23 = int_to_ptr.vmem [resolvable:$true] %s81_s23 }
  0x27   :  { %s9724_s30 = scalar_lea.vmem %s52_s24, 5120  ;;  %p9729_p11 = scmp.lt.s32.totalorder %s52_s24, %s52_s24 }
  0x28   :  { %p9725_p10 = scmp.ne.s32.totalorder %s52_s24, %s9724_s30  ;;  %p9730_p12 = scmp.lt.s32.totalorder %s9724_s30, %s9724_s30 }
  0x2a   :  { %p9731_p13 = por %p9730_p12, %p9729_p11 }
  0x2c   :  { %p9732_p0 = pnand %p9731_p13, %p9725_p10 }
  0x2e   :  { %9735 = shalt.err (!%p9732_p0)
}
  0x2f   :  { %s11454_s27 = sld [smem:[#allocation25_spill]]  ;;  %s9744_s14 = scalar_lea.vmem %s82_s23, 3072 }
  0x30   :  { %p9745_p1 = scmp.ne.s32.totalorder %s82_s23, %s9744_s14  ;;  %p9749_p2 = scmp.lt.s32.totalorder %s82_s23, %s82_s23 }
  0x31   :  { %p9750_p3 = scmp.lt.s32.totalorder %s9744_s14, %s9744_s14 }
  0x33   :  { %p9751_p4 = por %p9750_p3, %p9749_p2 }
  0x35   :  { %57 = dma.hbm_to_vmem [thread:$0]  %s11454_s27, 5120, %s52_s24, [#allocation3], %s9828_s1, %s9828_s1, %s9829_s26  }
  0x36   :  { %p9752_p5 = pnand %p9751_p4, %p9745_p1 }
  0x38   :  { %9755 = shalt.err (!%p9752_p5)
}
  0x39   :  { %87 = dma.hbm_to_vmem [thread:$0]  %s11426_s11, 3072, %s82_s23, [#allocation6], %s9828_s1, %s9828_s1, %s9829_s26  }
  0x3a   :  { %s9834_s28 = smov [#allocation10]  }
  0x3b   :  { %s113_s29 = sshll.u32 %s9834_s28, 4  ;;  %s114_s29 = int_to_ptr.vmem [resolvable:$true] %s113_s29 }
  0x3c   :  { %s9764_s3 = scalar_lea.vmem %s114_s29, 12288  ;;  %p9769_p7 = scmp.lt.s32.totalorder %s114_s29, %s114_s29 }
  0x3d   :  { %p9765_p6 = scmp.ne.s32.totalorder %s114_s29, %s9764_s3  ;;  %p9770_p8 = scmp.lt.s32.totalorder %s9764_s3, %s9764_s3 }
  0x3f   :  { %p9771_p9 = por %p9770_p8, %p9769_p7 }
  0x41   :  { %p9772_p10 = pnand %p9771_p9, %p9765_p6 }
  0x43   :  { %9775 = shalt.err (!%p9772_p10)
}
  0x44   :  { %119 = dma.hbm_to_vmem [thread:$0]  %s11432_s17, 12288, %s114_s29, [#allocation9], %s9828_s1, %s9828_s1, %s9829_s26  }
  0x45   :  { %9816 = dma.done.wait [#allocation3], 5120  }
  0x46   :  { %9817 = vsyncadd [#allocation3], 4294962176 }
  0x47   :  { %9818 = dma.done.wait [#allocation6], 6144  }
  0x48   :  { %9819 = vsyncadd [#allocation6], 4294961152 }
  0x49   :  { %9820 = dma.done.wait [#allocation9], 24576  }
  0x4a   :  { %9821 = vsyncadd [#allocation9], 4294942720  ;;  %s11455_s24 = sld [smem:[#allocation24_spill]]  ;;  %vm152_vm0 = vcmask 1042432   ;;  %vm183_vm1 = vcmask 1046528   ;;  %vm233_vm2 = vcmask 523264  }
  0x4b   :  { %s11456_s27 = sld [smem:[#allocation19_spill]]  ;;  %vm477_vm3 = vcmask 1044480   ;;  %vm368_vm4 = vcmask 1045504   ;;  %vm803_vm5 = vcmask 1041408   ;;  %vm586_vm6 = vcmask 1043456  }
  0x4c   :  { %vm1457_vm7 = vcmask 1040384   ;;  %vm9836_vm13 = vmmov 1   ;;  %s11461_s25 = sld [smem:[#allocation20_spill]] }
  0x4d   :  { %vm10377_vm12 = vmneg %vm1457_vm7  ;;  %s11462_s0 = sld [smem:[#allocation22_spill]] }
  0x4e   :  { %vm10392_vm14 = vmpackc.low %vm9836_vm13, %vm10377_vm12  ;;  %s11463_s7 = sld [smem:[#allocation21_spill]] }
  0x4f   :  { %s11464_s5 = sld [smem:[#allocation23_spill]] }
  0x50   :  { %v9245_v0 = vld [vmem:[%s11455_s24 + $0x38] sm:$0xff]   ;;  %v9246_v1 = vld [vmem:[%s11455_s24 + $0x30] sm:$0xff]   ;;  %v9247_v2 = vld [vmem:[%s11455_s24 + $0x28] sm:$0xff]  }
  0x51   :  { %8648 = vmatprep.subr.bf16.mxu0 %v9245_v0  ;;  %v144_v3 = vld [vmem:[%s11456_s27] sm:$0xff]  ;;  %v145_v4 = vld [vmem:[%s11456_s27 + $0x8] sm:$0xff]  ;;  %v146_v5 = vld [vmem:[%s11456_s27 + $0x10] sm:$0xff] }
  0x52   :  { %8649 = vmatpush3.bf16.msra.mxu0 %v9245_v0  ;;  %v153_v6 = vrot.slane %v144_v3, 5  ;;  %v154_v7 = vrot.slane %v145_v4, 5  ;;  %v147_v8 = vld [vmem:[%s11456_s27 + $0x18] sm:$0xff]  ;;  %v156_v9 = vrot.slane %v146_v5, 5  ;;  %v9248_v15 = vld [vmem:[%s11455_s24 + $0x20] sm:$0xff]   ;;  %v9256_v32 = vld [vmem:[%s11455_s24 + $0x70] sm:$0xff]  }
  0x53   :  { %8650 = vmatprep.subr.bf16.mxu0 %v9246_v1  ;;  %v157_v10 = vrot.slane %v147_v8, 5  ;;  %v9249_v26 = vld [vmem:[%s11455_s24 + $0x18] sm:$0xff]   ;;  %v9250_v34 = vld [vmem:[%s11455_s24 + $0x10] sm:$0xff]   ;;  %v9258_v35 = vld [vmem:[%s11455_s24 + $0x68] sm:$0xff]  }
  0x54   :  { %v10010_v11 = vsel %vm152_vm0, %v153_v6, %v154_v7  ;;  %v10013_v12 = vsel %vm152_vm0, 0.0, %v153_v6  ;;  %v10016_v13 = vsel %vm152_vm0, %v154_v7, 0.0  ;;  %v10019_v14 = vsel %vm152_vm0, 0.0, %v156_v9  ;;  %v9254_v30 = vld [vmem:[%s11455_s24 + $0x78] sm:$0xff]   ;;  %v9251_v37 = vld [vmem:[%s11455_s24 + $0x8] sm:$0xff]   ;;  %v9260_v43 = vld [vmem:[%s11455_s24 + $0x60] sm:$0xff]  }
  0x55   :  { %v184_v16 = vrot.slane %v10013_v12, 1  ;;  %v185_v17 = vrot.slane %v10010_v11, 1  ;;  %v187_v18 = vrot.slane %v10016_v13, 1  ;;  %v10028_v19 = vsel %vm152_vm0, %v156_v9, %v157_v10  ;;  %8684 = vmatprep.subr.bf16.mxu1 %v9254_v30  ;;  %v9252_v46 = vld [vmem:[%s11455_s24] sm:$0xff]   ;;  %v9262_v56 = vld [vmem:[%s11455_s24 + $0xb8] sm:$0xff]   ;;  %v9264_v63 = vld [vmem:[%s11455_s24 + $0xb0] sm:$0xff]  }
  0x56   :  { %8651 = vmatpush3.bf16.msra.mxu0 %v9246_v1  ;;  %v10031_v20 = vsel %vm152_vm0, %v157_v10, 0.0  ;;  %v189_v21 = vrot.slane %v10019_v14, 1  ;;  %v190_v22 = vrot.slane %v10028_v19, 1  ;;  %v169_v33 = vpack.c.bf16 %v10010_v11, %v10013_v12  ;;  %8685 = vmatpush3.bf16.msra.mxu1 %v9254_v30  ;;  %v9253_v57 = vld [vmem:[%s11455_s24 + $0x58] sm:$0xff]   ;;  %v9255_v10 = vld [vmem:[%s11455_s24 + $0x50] sm:$0xff]  }
  0x57   :  { %8652 = vmatprep.subr.bf16.mxu0 %v9247_v2  ;;  %v186_v23 = vsel %vm183_vm1, %v184_v16, %v185_v17  ;;  %v188_v24 = vsel %vm183_vm1, %v185_v17, %v187_v18  ;;  %v192_v25 = vrot.slane %v10031_v20, 1  ;;  %8686 = vmatprep.subr.bf16.mxu1 %v9256_v32  ;;  %v478_v36 = vrot.slane %v10013_v12, 3  ;;  %v9266_v18 = vld [vmem:[%s11455_s24 + $0xa8] sm:$0xff]  }
  0x58   :  { %v198_v27 = vpack.c.bf16 %v188_v24, %v186_v23  ;;  %v191_v28 = vsel %vm183_vm1, %v189_v21, %v190_v22  ;;  %v479_v38 = vrot.slane %v10010_v11, 3  ;;  %v481_v39 = vrot.slane %v10016_v13, 3 }
  0x59   :  { %v193_v29 = vsel %vm183_vm1, %v190_v22, %v192_v25  ;;  %v483_v40 = vrot.slane %v10019_v14, 3  ;;  %v484_v41 = vrot.slane %v10028_v19, 3  ;;  %v486_v42 = vrot.slane %v10031_v20, 3 }
  0x5a   :  { %8653 = vmatpush3.bf16.msra.mxu0 %v9247_v2  ;;  %8656 = vmatprep.mubr.msk.bf16.mxu0 %vm233_vm2, %v198_v27  ;;  %v199_v31 = vpack.c.bf16 %v193_v29, %v191_v28  ;;  %v480_v44 = vsel %vm477_vm3, %v478_v36, %v479_v38  ;;  %v482_v45 = vsel %vm477_vm3, %v479_v38, %v481_v39  ;;  %v369_v47 = vrot.slane %v10013_v12, 2  ;;  %v9257_v29 = vld [vmem:[%s11455_s24 + $0x48] sm:$0xff]   ;;  %v9261_v36 = vld [vmem:[%s11455_s24 + $0x98] sm:$0xff]  }
  0x5b   :  { %8654 = vmatprep.subr.bf16.mxu0 %v9248_v15  ;;  %8687 = vmatpush3.bf16.msra.mxu1 %v9256_v32  ;;  %v492_v48 = vpack.c.bf16 %v482_v45, %v480_v44  ;;  %v370_v49 = vrot.slane %v10010_v11, 2  ;;  %v372_v50 = vrot.slane %v10016_v13, 2  ;;  %v374_v51 = vrot.slane %v10019_v14, 2  ;;  %v9269_v45 = vld [vmem:[%s11455_s24 + $0xd8] sm:$0xff]  }
  0x5c   :  { %8688 = vmatprep.subr.bf16.mxu1 %v9258_v35  ;;  %v375_v52 = vrot.slane %v10028_v19, 2  ;;  %v485_v53 = vsel %vm477_vm3, %v483_v40, %v484_v41  ;;  %v487_v54 = vsel %vm477_vm3, %v484_v41, %v486_v42  ;;  %v377_v55 = vrot.slane %v10031_v20, 2 }
  0x5d   :  { %8692 = vmatprep.mubr.msk.bf16.mxu1 %vm233_vm2, %v492_v48  ;;  %v587_v58 = vrot.slane %v10013_v12, 4  ;;  %v588_v59 = vrot.slane %v10010_v11, 4  ;;  %v371_v60 = vsel %vm368_vm4, %v369_v47, %v370_v49  ;;  %v373_v61 = vsel %vm368_vm4, %v370_v49, %v372_v50 }
  0x5e   :  { %8655 = vmatpush3.bf16.msra.mxu0 %v9248_v15  ;;  %v493_v62 = vpack.c.bf16 %v487_v54, %v485_v53  ;;  %v695_v0 = vrot.slane %v10013_v12, 5  ;;  %v590_v1 = vrot.slane %v10016_v13, 4  ;;  %v592_v2 = vrot.slane %v10019_v14, 4  ;;  %v9274_v53 = vld [vmem:[#allocation2 + $0x38] sm:$0xff]   ;;  %v9275_v54 = vld [vmem:[#allocation2 + $0x10] sm:$0xff]  }
  0x5f   :  { %8660 = vmatprep.subr.bf16.mxu0 %v9249_v26  ;;  %8689 = vmatpush3.bf16.msra.mxu1 %v9258_v35  ;;  %v696_v3 = vrot.slane %v10010_v11, 5  ;;  %v698_v4 = vrot.slane %v10016_v13, 5  ;;  %v593_v5 = vrot.slane %v10028_v19, 4  ;;  %v595_v6 = vrot.slane %v10031_v20, 4 }
  0x60   :  { %8690 = vmatprep.subr.bf16.mxu1 %v9260_v43  ;;  %v700_v7 = vrot.slane %v10019_v14, 5  ;;  %v701_v8 = vrot.slane %v10028_v19, 5  ;;  %v170_v9 = vpack.c.bf16 %v10028_v19, %v10019_v14  ;;  %v383_v17 = vpack.c.bf16 %v373_v61, %v371_v60  ;;  %v10202_v60 = vld [vmem:[#allocation2 + $0x78] sm:$0xff]  }
  0x61   :  { %8657 = vmatmul.mubr.msk.bf16.vlgmr.msra.gmra.mxu0 %vm233_vm2, %v199_v31  ;;  %v697_v15 = vsel %vm152_vm0, %v695_v0, %v696_v3  ;;  %v699_v16 = vsel %vm152_vm0, %v696_v3, %v698_v4  ;;  %v703_v22 = vrot.slane %v10031_v20, 5  ;;  %v804_v23 = vrot.slane %v10013_v12, 6  ;;  %v9265_v12 = vld [vmem:[%s11455_s24 + $0x88] sm:$0xff]   ;;  %v10205_v61 = vld [vmem:[#allocation2 + $0x58] sm:$0xff]  }
  0x62   :  { %8661 = vmatpush3.bf16.msra.mxu0 %v9249_v26  ;;  %8668 = vmatprep.mubr.msk.bf16.mxu0 %vm233_vm2, %v169_v33  ;;  %v709_v21 = vpack.c.bf16 %v699_v16, %v697_v15  ;;  %v805_v24 = vrot.slane %v10010_v11, 6  ;;  %v807_v25 = vrot.slane %v10016_v13, 6  ;;  %v809_v26 = vrot.slane %v10019_v14, 6  ;;  %v9268_v13 = vld [vmem:[%s11455_s24 + $0xa0] sm:$0xff]  }
  0x63   :  { %8662 = vmatprep.subr.bf16.mxu0 %v9250_v34  ;;  %8691 = vmatpush3.bf16.msra.mxu1 %v9260_v43  ;;  %v810_v27 = vrot.slane %v10028_v19, 6  ;;  %v812_v28 = vrot.slane %v10031_v20, 6  ;;  %v9259_v33 = vld [vmem:[%s11455_s24 + $0x40] sm:$0xff]   ;;  %v704_v35 = vsel %vm152_vm0, %v701_v8, %v703_v22  ;;  %v378_v38 = vsel %vm368_vm4, %v375_v52, %v377_v55  ;;  %v9263_v43 = vld [vmem:[%s11455_s24 + $0x90] sm:$0xff]   ;;  %v9271_v19 = vld [vmem:[%s11455_s24 + $0xc8] sm:$0xff]  }
  0x64   :  { %8708 = vmatprep.subr.bf16.mxu1 %v9262_v56  ;;  %v589_v40 = vsel %vm586_vm6, %v587_v58, %v588_v59  ;;  %v591_v41 = vsel %vm586_vm6, %v588_v59, %v590_v1  ;;  %v9267_v11 = vld [vmem:[%s11455_s24 + $0x80] sm:$0xff]   ;;  %v596_v47 = vsel %vm586_vm6, %v593_v5, %v595_v6  ;;  %v806_v48 = vsel %vm803_vm5, %v804_v23, %v805_v24  ;;  %v9276_v55 = vld [vmem:[#allocation2 + $0x30] sm:$0xff]  }
  0x65   :  { %v811_v30 = vsel %vm803_vm5, %v809_v26, %v810_v27  ;;  %v813_v31 = vsel %vm803_vm5, %v810_v27, %v812_v28  ;;  %v601_v44 = vpack.c.bf16 %v591_v41, %v589_v40  ;;  %v808_v49 = vsel %vm803_vm5, %v805_v24, %v807_v25  ;;  %v9272_v20 = vld [vmem:[%s11455_s24 + $0xc0] sm:$0xff]  }
  0x66   :  { %8663 = vmatpush3.bf16.msra.mxu0 %v9250_v34  ;;  %8693 = vmatmul.mubr.msk.bf16.vlgmr.msra.gmra.mxu1 %vm233_vm2, %v493_v62  ;;  %v819_v32 = vpack.c.bf16 %v813_v31, %v811_v30  ;;  %v702_v34 = vsel %vm152_vm0, %v700_v7, %v701_v8  ;;  %v818_v14 = vpack.c.bf16 %v808_v49, %v806_v48  ;;  %v9279_v58 = vld [vmem:[#allocation2] sm:$0xff]  }
  0x67   :  { %8664 = vmatprep.subr.bf16.mxu0 %v9251_v37  ;;  %8709 = vmatpush3.bf16.msra.mxu1 %v9262_v56  ;;  %v710_v39 = vpack.c.bf16 %v704_v35, %v702_v34  ;;  %v9277_v56 = vld [vmem:[#allocation2 + $0x8] sm:$0xff]   ;;  %v9280_v59 = vld [vmem:[#allocation2 + $0x20] sm:$0xff]  }
  0x68   :  { %8710 = vmatprep.subr.bf16.mxu1 %v9264_v63  ;;  %8716 = vmatprep.mubr.msk.bf16.mxu1 %vm233_vm2, %v709_v21 }
  0x6a   :  { %8665 = vmatpush3.bf16.msra.mxu0 %v9251_v37  ;;  %v376_v37 = vsel %vm368_vm4, %v374_v51, %v375_v52  ;;  %v9270_v51 = vld [vmem:[%s11455_s24 + $0xd0] sm:$0xff]   ;;  %v9273_v52 = vld [vmem:[#allocation2 + $0x18] sm:$0xff]  }
  0x6b   :  { %8666 = vmatprep.subr.bf16.mxu0 %v9252_v46  ;;  %8711 = vmatpush3.bf16.msra.mxu1 %v9264_v63  ;;  %v384_v42 = vpack.c.bf16 %v378_v38, %v376_v37 }
  0x6c   :  { %8712 = vmatprep.subr.bf16.mxu1 %v9266_v18 }
  0x6e   :  { %8667 = vmatpush3.bf16.msra.mxu0 %v9252_v46  ;;  %v594_v46 = vsel %vm586_vm6, %v592_v2, %v593_v5 }
  0x6f   :  { %8672 = vmatprep.subr.bf16.mxu0 %v9253_v57  ;;  %8713 = vmatpush3.bf16.msra.mxu1 %v9266_v18  ;;  %v602_v50 = vpack.c.bf16 %v596_v47, %v594_v46 }
  0x70   :  { %8714 = vmatprep.subr.bf16.mxu1 %v9268_v13 }
  0x71   :  { %8669 = vmatmul.mubr.msk.bf16.vlgmr.msra.gmra.mxu0 %vm233_vm2, %v170_v9 }
  0x72   :  { %8673 = vmatpush3.bf16.msra.mxu0 %v9253_v57  ;;  %8680 = vmatprep.mubr.msk.bf16.mxu0 %vm233_vm2, %v383_v17  ;;  %v9278_v57 = vld [vmem:[#allocation2 + $0x28] sm:$0xff]  }
  0x73   :  { %8674 = vmatprep.subr.bf16.mxu0 %v9255_v10  ;;  %8715 = vmatpush3.bf16.msra.mxu1 %v9268_v13 }
  0x74   :  { %8732 = vmatprep.subr.bf16.mxu1 %v9274_v53 }
  0x76   :  { %8675 = vmatpush3.bf16.msra.mxu0 %v9255_v10  ;;  %8717 = vmatmul.mubr.msk.bf16.vlgmr.msra.gmra.mxu1 %vm233_vm2, %v710_v39 }
  0x77   :  { %8676 = vmatprep.subr.bf16.mxu0 %v9257_v29  ;;  %8733 = vmatpush3.bf16.msra.mxu1 %v9274_v53 }
  0x78   :  { %8734 = vmatprep.subr.bf16.mxu1 %v9276_v55 }
  0x7a   :  { %8677 = vmatpush3.bf16.msra.mxu0 %v9257_v29 }
  0x7b   :  { %8678 = vmatprep.subr.bf16.mxu0 %v9259_v33  ;;  %8735 = vmatpush3.bf16.msra.mxu1 %v9276_v55 }
  0x7c   :  { %8736 = vmatprep.subr.bf16.mxu1 %v9278_v57 }
  0x7e   :  { %8679 = vmatpush3.bf16.msra.mxu0 %v9259_v33 }
  0x7f   :  { %8696 = vmatprep.subr.bf16.mxu0 %v9261_v36  ;;  %8737 = vmatpush3.bf16.msra.mxu1 %v9278_v57 }
  0x80   :  { %8738 = vmatprep.subr.bf16.mxu1 %v9280_v59 }
  0x81   :  { %8681 = vmatmul.mubr.msk.bf16.vlgmr.msra.gmra.mxu0 %vm233_vm2, %v384_v42 }
  0x82   :  { %8697 = vmatpush3.bf16.msra.mxu0 %v9261_v36  ;;  %8704 = vmatprep.mubr.msk.bf16.mxu0 %vm233_vm2, %v601_v44 }
  0x83   :  { %8698 = vmatprep.subr.bf16.mxu0 %v9263_v43  ;;  %8739 = vmatpush3.bf16.msra.mxu1 %v9280_v59 }
  0x84   :  { %8756 = vmatprep.subr.bf16.mxu1 %v10205_v61 }
  0x86   :  { %8699 = vmatpush3.bf16.msra.mxu0 %v9263_v43 }
  0x87   :  { %8700 = vmatprep.subr.bf16.mxu0 %v9265_v12 }
  0x8a   :  { %8701 = vmatpush3.bf16.msra.mxu0 %v9265_v12 }
  0x8b   :  { %8702 = vmatprep.subr.bf16.mxu0 %v9267_v11 }
  0x8e   :  { %8703 = vmatpush3.bf16.msra.mxu0 %v9267_v11 }
  0x8f   :  { %8720 = vmatprep.subr.bf16.mxu0 %v9269_v45 }
  0x91   :  { %8705 = vmatmul.mubr.msk.bf16.vlgmr.msra.gmra.mxu0 %vm233_vm2, %v602_v50 }
  0x92   :  { %8721 = vmatpush3.bf16.msra.mxu0 %v9269_v45  ;;  %8728 = vmatprep.mubr.msk.bf16.mxu0 %vm233_vm2, %v818_v14 }
  0x93   :  { %8722 = vmatprep.subr.bf16.mxu0 %v9270_v51 }
  0x96   :  { %8723 = vmatpush3.bf16.msra.mxu0 %v9270_v51 }
  0x97   :  { %8724 = vmatprep.subr.bf16.mxu0 %v9271_v19 }
  0x9a   :  { %8725 = vmatpush3.bf16.msra.mxu0 %v9271_v19 }
  0x9b   :  { %8726 = vmatprep.subr.bf16.mxu0 %v9272_v20 }
  0x9e   :  { %8727 = vmatpush3.bf16.msra.mxu0 %v9272_v20 }
  0x9f   :  { %8744 = vmatprep.subr.bf16.mxu0 %v9273_v52 }
  0xa1   :  { %8729 = vmatmul.mubr.msk.bf16.vlgmr.msra.gmra.mxu0 %vm233_vm2, %v819_v32 }
  0xa2   :  { %8745 = vmatpush3.bf16.msra.mxu0 %v9273_v52 }
  0xa3   :  { %8746 = vmatprep.subr.bf16.mxu0 %v9275_v54 }
  0xa6   :  { %8747 = vmatpush3.bf16.msra.mxu0 %v9275_v54 }
  0xa7   :  { %8748 = vmatprep.subr.bf16.mxu0 %v9277_v56 }
  0xaa   :  { %8749 = vmatpush3.bf16.msra.mxu0 %v9277_v56 }
  0xab   :  { %8750 = vmatprep.subr.bf16.mxu0 %v9279_v58 }
  0xae   :  { %8751 = vmatpush3.bf16.msra.mxu0 %v9279_v58 }
  0xaf   :  { %8768 = vmatprep.subr.bf16.mxu0 %v10202_v60 }
 0x121   :  { %v8658_v62 = vpop.f32.mrf.mxu0 }
 0x123   :  { %v274_v63 = vpop.f32.mrf.mxu0 }
 0x125   :  { %v8659_v0 = vpop.f32.mrf.mxu0 }
 0x126   :  { %v8694_v8 = vpop.f32.mrf.mxu1 }
 0x127   :  { %v277_v1 = vpop.f32.mrf.mxu0 }
 0x128   :  { %v567_v10 = vpop.f32.mrf.mxu1 }
 0x12a   :  { %v8695_v16 = vpop.f32.mrf.mxu1 }
 0x12c   :  { %v570_v21 = vpop.f32.mrf.mxu1 }
 0x131   :  { %v8670_v2 = vpop.f32.mrf.mxu0 }
 0x132   :  { %v362_v18 = vadd.f32 %v8670_v2, %v8658_v62 }
 0x133   :  { %v353_v3 = vpop.f32.mrf.mxu0 }
 0x134   :  { %v354_v22 = vadd.f32 %v353_v3, %v274_v63 }
 0x135   :  { %v8671_v4 = vpop.f32.mrf.mxu0 }
 0x136   :  { %v8718_v25 = vpop.f32.mrf.mxu1  ;;  %v365_v26 = vadd.f32 %v8671_v4, %v8659_v0 }
 0x137   :  { %v356_v5 = vpop.f32.mrf.mxu0 }
 0x138   :  { %v357_v28 = vadd.f32 %v356_v5, %v277_v1  ;;  %v784_v31 = vpop.f32.mrf.mxu1 }
 0x13a   :  { %v8719_v38 = vpop.f32.mrf.mxu1 }
 0x13c   :  { %v787_v12 = vpop.f32.mrf.mxu1 }
 0x141   :  { %v8682_v6 = vpop.f32.mrf.mxu0 }
 0x142   :  { %v475_v23 = vadd.f32 %v8682_v6, %v362_v18 }
 0x143   :  { %v458_v7 = vpop.f32.mrf.mxu0 }
 0x144   :  { %v473_v27 = vadd.f32 %v458_v7, %v354_v22  ;;  %v584_v13 = vadd.f32 %v8694_v8, %v475_v23 }
 0x145   :  { %v8683_v9 = vpop.f32.mrf.mxu0 }
 0x146   :  { %v476_v29 = vadd.f32 %v8683_v9, %v365_v26  ;;  %v582_v32 = vadd.f32 %v567_v10, %v473_v27  ;;  %v9283_v10 = vld [vmem:[#allocation2 + $0x70] sm:$0xff]  }
 0x147   :  { %v461_v15 = vpop.f32.mrf.mxu0 }
 0x148   :  { %v474_v33 = vadd.f32 %v461_v15, %v357_v28  ;;  %v585_v35 = vadd.f32 %v8695_v16, %v476_v29 }
 0x14a   :  { %v583_v39 = vadd.f32 %v570_v21, %v474_v33 }
 0x151   :  { %v8706_v17 = vpop.f32.mrf.mxu0 }
 0x152   :  { %v693_v34 = vadd.f32 %v8706_v17, %v584_v13  ;;  %v9284_v13 = vld [vmem:[#allocation2 + $0x50] sm:$0xff]  }
 0x153   :  { %v676_v24 = vpop.f32.mrf.mxu0 }
 0x154   :  { %v691_v36 = vadd.f32 %v676_v24, %v582_v32  ;;  %v801_v41 = vadd.f32 %v8718_v25, %v693_v34  ;;  %v9287_v32 = vld [vmem:[#allocation2 + $0x60] sm:$0xff]  }
 0x155   :  { %v8707_v30 = vpop.f32.mrf.mxu0 }
 0x156   :  { %v694_v40 = vadd.f32 %v8707_v30, %v585_v35  ;;  %v799_v43 = vadd.f32 %v784_v31, %v691_v36  ;;  %v9285_v31 = vld [vmem:[#allocation2 + $0x68] sm:$0xff]   ;;  %v9288_v36 = vld [vmem:[#allocation2 + $0x40] sm:$0xff]  }
 0x157   :  { %v679_v37 = vpop.f32.mrf.mxu0 }
 0x158   :  { %v692_v44 = vadd.f32 %v679_v37, %v583_v39  ;;  %v802_v46 = vadd.f32 %v8719_v38, %v694_v40 }
 0x15a   :  { %v800_v49 = vadd.f32 %v787_v12, %v692_v44  ;;  %v9289_v44 = vld [vmem:[#allocation2 + $0x98] sm:$0xff]  }
 0x161   :  { %v8730_v42 = vpop.f32.mrf.mxu0 }
 0x162   :  { %v910_v11 = vadd.f32 %v8730_v42, %v801_v41 }
 0x163   :  { %v893_v45 = vpop.f32.mrf.mxu0 }
 0x164   :  { %v908_v47 = vadd.f32 %v893_v45, %v799_v43  ;;  %v919_v51 = vrot.slane %v910_v11, 6 }
 0x165   :  { %v8731_v48 = vpop.f32.mrf.mxu0 }
 0x166   :  { %v911_v50 = vadd.f32 %v8731_v48, %v802_v46  ;;  %v916_v14 = vrot.slane %v908_v47, 6  ;;  %v10215_v56 = vsel %vm803_vm5, 0.0, %v919_v51 }
 0x167   :  { %v896_v19 = vpop.f32.mrf.mxu0  ;;  %v951_v0 = vrot.slane %v10215_v56, 1  ;;  %v1242_v35 = vrot.slane %v10215_v56, 3  ;;  %v1134_v42 = vrot.slane %v10215_v56, 2 }
 0x168   :  { %v920_v20 = vrot.slane %v911_v50, 6  ;;  %v909_v52 = vadd.f32 %v896_v19, %v800_v49  ;;  %v10218_v57 = vsel %vm803_vm5, 0.0, %v916_v14  ;;  %v9290_v49 = vld [vmem:[#allocation2 + $0x90] sm:$0xff]  }
 0x169   :  { %v946_v1 = vrot.slane %v10218_v57, 1  ;;  %v1237_v3 = vrot.slane %v10218_v57, 3  ;;  %v1129_v16 = vrot.slane %v10218_v57, 2  ;;  %v1345_v43 = vrot.slane %v10218_v57, 4 }
 0x16a   :  { %v10209_v53 = vsel %vm803_vm5, %v919_v51, %v920_v20  ;;  %v10212_v54 = vsel %vm803_vm5, %v920_v20, 0.0  ;;  %v917_v55 = vrot.slane %v909_v52, 6  ;;  %v9291_v51 = vld [vmem:[#allocation2 + $0x88] sm:$0xff]   ;;  %v1350_v52 = vrot.slane %v10215_v56, 4 }
 0x16b   :  { %v952_v58 = vrot.slane %v10209_v53, 1  ;;  %v954_v59 = vrot.slane %v10212_v54, 1  ;;  %v933_v7 = vpack.c.bf16 %v10209_v53, %v10215_v56  ;;  %v1243_v33 = vrot.slane %v10209_v53, 3  ;;  %v9298_v56 = vld [vmem:[#allocation5 + $0x28] sm:$0xff]  }
 0x16c   :  { %v10223_v62 = vsel %vm803_vm5, %v916_v14, %v917_v55  ;;  %v10226_v63 = vsel %vm803_vm5, %v917_v55, 0.0  ;;  %v1245_v34 = vrot.slane %v10212_v54, 3  ;;  %v1135_v37 = vrot.slane %v10209_v53, 2  ;;  %v9292_v14 = vld [vmem:[#allocation2 + $0x80] sm:$0xff]  }
 0x16d   :  { %v949_v2 = vrot.slane %v10226_v63, 1  ;;  %v1132_v4 = vrot.slane %v10226_v63, 2  ;;  %v1240_v5 = vrot.slane %v10226_v63, 3  ;;  %v932_v6 = vpack.c.bf16 %v10223_v62, %v10218_v57 }
 0x16e   :  { %v947_v8 = vrot.slane %v10223_v62, 1  ;;  %v1238_v9 = vrot.slane %v10223_v62, 3  ;;  %v1130_v15 = vrot.slane %v10223_v62, 2  ;;  %v955_v17 = vsel %vm183_vm1, %v952_v58, %v954_v59  ;;  %v9293_v59 = vld [vmem:[#allocation5 + $0x18] sm:$0xff]  }
 0x16f   :  { %8752 = vmatprep.mubr.msk.bf16.mxu0 %vm233_vm2, %v932_v6  ;;  %v953_v18 = vsel %vm183_vm1, %v951_v0, %v952_v58  ;;  %v1246_v38 = vsel %vm477_vm3, %v1243_v33, %v1245_v34  ;;  %v1348_v39 = vrot.slane %v10226_v63, 4  ;;  %v1244_v40 = vsel %vm477_vm3, %v1242_v35, %v1243_v33  ;;  %v9295_v63 = vld [vmem:[#allocation5 + $0x10] sm:$0xff]   ;;  %v9299_v0 = vld [vmem:[#allocation5] sm:$0xff]  }
 0x170   :  { %8753 = vmatmul.mubr.msk.bf16.vlgmr.msra.gmra.mxu0 %vm233_vm2, %v933_v7  ;;  %v948_v21 = vsel %vm183_vm1, %v946_v1, %v947_v8  ;;  %v950_v22 = vsel %vm183_vm1, %v947_v8, %v949_v2  ;;  %v1239_v23 = vsel %vm477_vm3, %v1237_v3, %v1238_v9  ;;  %v1241_v24 = vsel %vm477_vm3, %v1238_v9, %v1240_v5  ;;  %v9300_v1 = vld [vmem:[#allocation5 + $0x20] sm:$0xff]   ;;  %v10285_v2 = vld [vmem:[%s11423_s8 + $0x18] sm:$0xff]  }
 0x171   :  { %8769 = vmatpush3.bf16.msra.mxu0 %v10202_v60  ;;  %v960_v25 = vpack.c.bf16 %v950_v22, %v948_v21  ;;  %v1251_v26 = vpack.c.bf16 %v1241_v24, %v1239_v23  ;;  %v1131_v27 = vsel %vm368_vm4, %v1129_v16, %v1130_v15  ;;  %v1133_v28 = vsel %vm368_vm4, %v1130_v15, %v1132_v4  ;;  %v9286_v60 = vld [vmem:[#allocation2 + $0x48] sm:$0xff]   ;;  %v10288_v3 = vld [vmem:[#allocation5 + $0x58] sm:$0xff]  }
 0x172   :  { %v961_v29 = vpack.c.bf16 %v955_v17, %v953_v18  ;;  %8770 = vmatprep.subr.bf16.mxu0 %v9283_v10  ;;  %v1143_v30 = vpack.c.bf16 %v1133_v28, %v1131_v27  ;;  %v1346_v41 = vrot.slane %v10223_v62, 4  ;;  %v1252_v11 = vpack.c.bf16 %v1246_v38, %v1244_v40  ;;  %v9294_v62 = vld [vmem:[#allocation5 + $0x38] sm:$0xff]  }
 0x173   :  { %8740 = vmatprep.mubr.msk.bf16.mxu1 %vm233_vm2, %v960_v25  ;;  %8776 = vmatprep.mubr.msk.bf16.mxu0 %vm233_vm2, %v1251_v26  ;;  %v1136_v45 = vsel %vm368_vm4, %v1134_v42, %v1135_v37  ;;  %v1351_v19 = vrot.slane %v10209_v53, 4  ;;  %v1353_v20 = vrot.slane %v10212_v54, 4  ;;  %v9296_v53 = vld [vmem:[#allocation5 + $0x30] sm:$0xff]  }
 0x174   :  { %8741 = vmatmul.mubr.msk.bf16.vlgmr.msra.gmra.mxu1 %vm233_vm2, %v961_v29  ;;  %v1347_v46 = vsel %vm586_vm6, %v1345_v43, %v1346_v41  ;;  %v1349_v47 = vsel %vm586_vm6, %v1346_v41, %v1348_v39 }
 0x175   :  { %8757 = vmatpush3.bf16.msra.mxu1 %v10205_v61  ;;  %8764 = vmatprep.mubr.msk.bf16.mxu1 %vm233_vm2, %v1143_v30  ;;  %v1137_v61 = vrot.slane %v10212_v54, 2  ;;  %v1359_v50 = vpack.c.bf16 %v1349_v47, %v1347_v46  ;;  %v1354_v55 = vsel %vm586_vm6, %v1351_v19, %v1353_v20  ;;  %v1352_v57 = vsel %vm586_vm6, %v1350_v52, %v1351_v19  ;;  %v9297_v54 = vld [vmem:[#allocation5 + $0x8] sm:$0xff]  }
 0x176   :  { %8771 = vmatpush3.bf16.msra.mxu0 %v9283_v10  ;;  %8758 = vmatprep.subr.bf16.mxu1 %v9284_v13  ;;  %v1360_v58 = vpack.c.bf16 %v1354_v55, %v1352_v57 }
 0x177   :  { %8772 = vmatprep.subr.bf16.mxu0 %v9285_v31  ;;  %v1138_v12 = vsel %vm368_vm4, %v1135_v37, %v1137_v61 }
 0x178   :  { %v1144_v48 = vpack.c.bf16 %v1138_v12, %v1136_v45 }
 0x179   :  { %8759 = vmatpush3.bf16.msra.mxu1 %v9284_v13 }
 0x17a   :  { %8773 = vmatpush3.bf16.msra.mxu0 %v9285_v31  ;;  %8760 = vmatprep.subr.bf16.mxu1 %v9286_v60 }
 0x17b   :  { %8774 = vmatprep.subr.bf16.mxu0 %v9287_v32 }
 0x17d   :  { %8761 = vmatpush3.bf16.msra.mxu1 %v9286_v60 }
 0x17e   :  { %8775 = vmatpush3.bf16.msra.mxu0 %v9287_v32  ;;  %8762 = vmatprep.subr.bf16.mxu1 %v9288_v36 }
 0x17f   :  { %8792 = vmatprep.subr.bf16.mxu0 %v9294_v62 }
 0x181   :  { %8763 = vmatpush3.bf16.msra.mxu1 %v9288_v36  ;;  %8777 = vmatmul.mubr.msk.bf16.vlgmr.msra.gmra.mxu0 %vm233_vm2, %v1252_v11 }
 0x182   :  { %8780 = vmatprep.subr.bf16.mxu1 %v9289_v44  ;;  %8793 = vmatpush3.bf16.msra.mxu0 %v9294_v62 }
 0x183   :  { %8794 = vmatprep.subr.bf16.mxu0 %v9296_v53 }
 0x184   :  { %8765 = vmatmul.mubr.msk.bf16.vlgmr.msra.gmra.mxu1 %vm233_vm2, %v1144_v48 }
 0x185   :  { %8781 = vmatpush3.bf16.msra.mxu1 %v9289_v44  ;;  %8788 = vmatprep.mubr.msk.bf16.mxu1 %vm233_vm2, %v1359_v50 }
 0x186   :  { %8782 = vmatprep.subr.bf16.mxu1 %v9290_v49  ;;  %8795 = vmatpush3.bf16.msra.mxu0 %v9296_v53 }
 0x187   :  { %8796 = vmatprep.subr.bf16.mxu0 %v9298_v56 }
 0x189   :  { %8783 = vmatpush3.bf16.msra.mxu1 %v9290_v49 }
 0x18a   :  { %8784 = vmatprep.subr.bf16.mxu1 %v9291_v51  ;;  %8797 = vmatpush3.bf16.msra.mxu0 %v9298_v56 }
 0x18b   :  { %8798 = vmatprep.subr.bf16.mxu0 %v9300_v1 }
 0x18d   :  { %8785 = vmatpush3.bf16.msra.mxu1 %v9291_v51 }
 0x18e   :  { %8786 = vmatprep.subr.bf16.mxu1 %v9292_v14  ;;  %8799 = vmatpush3.bf16.msra.mxu0 %v9300_v1  ;;  %v9303_v1 = vld [vmem:[%s11423_s8 + $0x10] sm:$0xff]  }
 0x18f   :  { %8816 = vmatprep.subr.bf16.mxu0 %v10288_v3 }
 0x191   :  { %8787 = vmatpush3.bf16.msra.mxu1 %v9292_v14 }
 0x192   :  { %8804 = vmatprep.subr.bf16.mxu1 %v9293_v59 }
 0x194   :  { %8789 = vmatmul.mubr.msk.bf16.vlgmr.msra.gmra.mxu1 %vm233_vm2, %v1360_v58 }
 0x195   :  { %8805 = vmatpush3.bf16.msra.mxu1 %v9293_v59 }
 0x196   :  { %8806 = vmatprep.subr.bf16.mxu1 %v9295_v63 }
 0x199   :  { %8807 = vmatpush3.bf16.msra.mxu1 %v9295_v63 }
 0x19a   :  { %8808 = vmatprep.subr.bf16.mxu1 %v9297_v54 }
 0x19d   :  { %8809 = vmatpush3.bf16.msra.mxu1 %v9297_v54 }
 0x19e   :  { %8810 = vmatprep.subr.bf16.mxu1 %v9299_v0 }
 0x1a1   :  { %8811 = vmatpush3.bf16.msra.mxu1 %v9299_v0 }
 0x1a2   :  { %8828 = vmatprep.subr.bf16.mxu1 %v10285_v2 }
 0x230   :  { %v8754_v6 = vpop.f32.mrf.mxu0 }
 0x232   :  { %v1114_v8 = vpop.f32.mrf.mxu0 }
 0x234   :  { %v8742_v4 = vpop.f32.mrf.mxu1  ;;  %v8755_v10 = vpop.f32.mrf.mxu0 }
 0x235   :  { %v1123_v21 = vadd.f32 %v8754_v6, %v8742_v4 }
 0x236   :  { %v1035_v5 = vpop.f32.mrf.mxu1  ;;  %v1117_v16 = vpop.f32.mrf.mxu0 }
 0x237   :  { %v1115_v23 = vadd.f32 %v1114_v8, %v1035_v5  ;;  %v9304_v8 = vld [vmem:[#allocation5 + $0x50] sm:$0xff]  }
 0x238   :  { %v8743_v7 = vpop.f32.mrf.mxu1 }
 0x239   :  { %v1126_v26 = vadd.f32 %v8755_v10, %v8743_v7  ;;  %v9673_v10 = vld [vmem:[%s11456_s27 + $0x8] sm:$0xff] }
 0x23a   :  { %v1038_v9 = vpop.f32.mrf.mxu1 }
 0x23b   :  { %v1118_v29 = vadd.f32 %v1117_v16, %v1038_v9  ;;  %v9672_v9 = vld [vmem:[%s11456_s27] sm:$0xff] }
 0x241   :  { %v8778_v18 = vpop.f32.mrf.mxu0 }
 0x243   :  { %v1326_v25 = vpop.f32.mrf.mxu0 }
 0x244   :  { %v8766_v15 = vpop.f32.mrf.mxu1 }
 0x245   :  { %v1235_v24 = vadd.f32 %v8766_v15, %v1123_v21  ;;  %v8779_v31 = vpop.f32.mrf.mxu0  ;;  %v1779_v15 = vpack.c.bf16 %v9673_v10, %v9672_v9  ;;  %v9308_v21 = vld [vmem:[#allocation5 + $0x40] sm:$0xff]  }
 0x246   :  { %v1218_v17 = vpop.f32.mrf.mxu1 }
 0x247   :  { %v1233_v27 = vadd.f32 %v1218_v17, %v1115_v23  ;;  %v1343_v30 = vadd.f32 %v8778_v18, %v1235_v24  ;;  %v1329_v61 = vpop.f32.mrf.mxu0  ;;  %v9305_v17 = vld [vmem:[%s11423_s8 + $0x8] sm:$0xff]   ;;  %v9674_v24 = vld [vmem:[%s11456_s27 + $0x10] sm:$0xff] }
 0x248   :  { %v8767_v22 = vpop.f32.mrf.mxu1  ;;  %v9306_v18 = vld [vmem:[#allocation5 + $0x48] sm:$0xff]  }
 0x249   :  { %v1236_v13 = vadd.f32 %v8767_v22, %v1126_v26  ;;  %v1341_v34 = vadd.f32 %v1326_v25, %v1233_v27  ;;  %v9675_v25 = vld [vmem:[%s11456_s27 + $0x18] sm:$0xff] }
 0x24a   :  { %v1221_v28 = vpop.f32.mrf.mxu1  ;;  %v1780_v26 = vpack.c.bf16 %v9675_v25, %v9674_v24 }
 0x24b   :  { %v1234_v32 = vadd.f32 %v1221_v28, %v1118_v29  ;;  %v1344_v37 = vadd.f32 %v8779_v31, %v1236_v13  ;;  %v9309_v13 = vld [vmem:[#allocation7 + $0x18] sm:$0xff]   ;;  %v9311_v31 = vld [vmem:[#allocation7 + $0x10] sm:$0xff]  }
 0x24d   :  { %v1342_v42 = vadd.f32 %v1329_v61, %v1234_v32  ;;  %v9313_v32 = vld [vmem:[#allocation7 + $0x8] sm:$0xff]  }
 0x254   :  { %v8790_v60 = vpop.f32.mrf.mxu1 }
 0x255   :  { %v1451_v33 = vadd.f32 %v8790_v60, %v1343_v30  ;;  %v9310_v30 = vld [vmem:[#allocation7 + $0x38] sm:$0xff]   ;;  %v9312_v60 = vld [vmem:[#allocation7 + $0x30] sm:$0xff]  }
 0x256   :  { %v1434_v35 = vpop.f32.mrf.mxu1 }
 0x257   :  { %v1449_v36 = vadd.f32 %v1434_v35, %v1341_v34  ;;  %v1461_v38 = vrot.slane %v1451_v33, 7  ;;  %v9314_v33 = vld [vmem:[#allocation7 + $0x28] sm:$0xff]   ;;  %v9315_v34 = vld [vmem:[#allocation7] sm:$0xff]  }
 0x258   :  { %v8791_v39 = vpop.f32.mrf.mxu1  ;;  %v9316_v35 = vld [vmem:[#allocation7 + $0x20] sm:$0xff]  }
 0x259   :  { %v1458_v40 = vrot.slane %v1449_v36, 7  ;;  %v1452_v41 = vadd.f32 %v8791_v39, %v1344_v37  ;;  %v1471_v11 = vsel %vm1457_vm7, 0.0, %v1461_v38  ;;  %v10336_v36 = vld [vmem:[#allocation7 + $0x58] sm:$0xff]  }
 0x25a   :  { %v1437_v43 = vpop.f32.mrf.mxu1  ;;  %v1493_v51 = vrot.slane %v1471_v11, 1 }
 0x25b   :  { %v1462_v44 = vrot.slane %v1452_v41, 7  ;;  %v1450_v12 = vadd.f32 %v1437_v43, %v1342_v42  ;;  %v1470_v45 = vsel %vm1457_vm7, 0.0, %v1458_v40  ;;  %v7682_v43 = vld [vmem:[%s11424_s9] ss:$0 sm:$0xff] }
 0x25c   :  { %v1488_v20 = vrot.slane %v1470_v45, 1  ;;  %v1671_v55 = vrot.slane %v1470_v45, 2 }
 0x25d   :  { %v1463_v46 = vsel %vm1457_vm7, %v1461_v38, %v1462_v44  ;;  %v1473_v47 = vsel %vm1457_vm7, %v1462_v44, 0.0  ;;  %v1459_v48 = vrot.slane %v1450_v12, 7 }
 0x25e   :  { %v1494_v49 = vrot.slane %v1463_v46, 1  ;;  %v1496_v50 = vrot.slane %v1473_v47, 1  ;;  %v1475_v56 = vpack.c.bf16 %v1463_v46, %v1471_v11  ;;  %v1677_v22 = vrot.slane %v1463_v46, 2 }
 0x25f   :  { %v1460_v14 = vsel %vm1457_vm7, %v1458_v40, %v1459_v48  ;;  %v1472_v19 = vsel %vm1457_vm7, %v1459_v48, 0.0  ;;  %v1679_v23 = vrot.slane %v1473_v47, 2 }
 0x260   :  { %v1489_v52 = vrot.slane %v1460_v14, 1  ;;  %v1495_v57 = vsel %vm183_vm1, %v1493_v51, %v1494_v49  ;;  %v1491_v58 = vrot.slane %v1472_v19, 1  ;;  %v1672_v59 = vrot.slane %v1460_v14, 2 }
 0x261   :  { %v1497_v62 = vsel %vm183_vm1, %v1494_v49, %v1496_v50  ;;  %v1674_v63 = vrot.slane %v1472_v19, 2  ;;  %v1474_v53 = vpack.c.bf16 %v1460_v14, %v1470_v45  ;;  %v1680_v28 = vsel %vm368_vm4, %v1677_v22, %v1679_v23 }
 0x262   :  { %v1490_v54 = vsel %vm183_vm1, %v1488_v20, %v1489_v52  ;;  %v1492_v0 = vsel %vm183_vm1, %v1489_v52, %v1491_v58  ;;  %v1673_v4 = vsel %vm368_vm4, %v1671_v55, %v1672_v59  ;;  %v1503_v7 = vpack.c.bf16 %v1497_v62, %v1495_v57 }
 0x263   :  { %8812 = vmatprep.mubr.msk.bf16.mxu1 %vm233_vm2, %v1474_v53  ;;  %v1502_v5 = vpack.c.bf16 %v1492_v0, %v1490_v54  ;;  %v1675_v6 = vsel %vm368_vm4, %v1672_v59, %v1674_v63 }
 0x264   :  { %8813 = vmatmul.mubr.msk.bf16.vlgmr.msra.gmra.mxu1 %vm233_vm2, %v1475_v56  ;;  %v1685_v16 = vpack.c.bf16 %v1675_v6, %v1673_v4 }
 0x265   :  { %8829 = vmatpush3.bf16.msra.mxu1 %v10285_v2  ;;  %8800 = vmatprep.mubr.msk.bf16.mxu0 %vm233_vm2, %v1502_v5  ;;  %v9307_v2 = vld [vmem:[%s11423_s8] sm:$0xff]  }
 0x266   :  { %8801 = vmatmul.mubr.msk.bf16.vlgmr.msra.gmra.mxu0 %vm233_vm2, %v1503_v7  ;;  %8830 = vmatprep.subr.bf16.mxu1 %v9303_v1 }
 0x267   :  { %8817 = vmatpush3.bf16.msra.mxu0 %v10288_v3  ;;  %8824 = vmatprep.mubr.msk.bf16.mxu0 %vm233_vm2, %v1685_v16  ;;  %v1676_v3 = vrot.slane %v1471_v11, 2  ;;  %v7683_v11 = vld [vmem:[%s11425_s10] ss:$0 sm:$0xff] }
 0x268   :  { %8818 = vmatprep.subr.bf16.mxu0 %v9304_v8  ;;  %8836 = vmatprep.mubr.msk.bf16.mxu1 %vm233_vm2, %v1779_v15 }
 0x269   :  { %8831 = vmatpush3.bf16.msra.mxu1 %v9303_v1  ;;  %v1678_v27 = vsel %vm368_vm4, %v1676_v3, %v1677_v22 }
 0x26a   :  { %8832 = vmatprep.subr.bf16.mxu1 %v9305_v17  ;;  %v1686_v29 = vpack.c.bf16 %v1680_v28, %v1678_v27 }
 0x26b   :  { %8819 = vmatpush3.bf16.msra.mxu0 %v9304_v8 }
 0x26c   :  { %8820 = vmatprep.subr.bf16.mxu0 %v9306_v18 }
 0x26d   :  { %8833 = vmatpush3.bf16.msra.mxu1 %v9305_v17 }
 0x26e   :  { %8834 = vmatprep.subr.bf16.mxu1 %v9307_v2 }
 0x26f   :  { %8821 = vmatpush3.bf16.msra.mxu0 %v9306_v18 }
 0x270   :  { %8822 = vmatprep.subr.bf16.mxu0 %v9308_v21 }
 0x271   :  { %8835 = vmatpush3.bf16.msra.mxu1 %v9307_v2 }
 0x272   :  { %8852 = vmatprep.subr.bf16.mxu1 %v9309_v13 }
 0x273   :  { %8823 = vmatpush3.bf16.msra.mxu0 %v9308_v21 }
 0x274   :  { %8837 = vmatmul.mubr.msk.bf16.vlgmr.msra.gmra.mxu1 %vm233_vm2, %v1780_v26  ;;  %8840 = vmatprep.subr.bf16.mxu0 %v9310_v30 }
 0x275   :  { %8853 = vmatpush3.bf16.msra.mxu1 %v9309_v13 }
 0x276   :  { %8825 = vmatmul.mubr.msk.bf16.vlgmr.msra.gmra.mxu0 %vm233_vm2, %v1686_v29  ;;  %8854 = vmatprep.subr.bf16.mxu1 %v9311_v31 }
 0x277   :  { %8841 = vmatpush3.bf16.msra.mxu0 %v9310_v30 }
 0x278   :  { %8842 = vmatprep.subr.bf16.mxu0 %v9312_v60 }
 0x279   :  { %8855 = vmatpush3.bf16.msra.mxu1 %v9311_v31 }
 0x27a   :  { %8856 = vmatprep.subr.bf16.mxu1 %v9313_v32 }
 0x27b   :  { %8843 = vmatpush3.bf16.msra.mxu0 %v9312_v60 }
 0x27c   :  { %8844 = vmatprep.subr.bf16.mxu0 %v9314_v33 }
 0x27d   :  { %8857 = vmatpush3.bf16.msra.mxu1 %v9313_v32 }
 0x27e   :  { %8858 = vmatprep.subr.bf16.mxu1 %v9315_v34 }
 0x27f   :  { %8845 = vmatpush3.bf16.msra.mxu0 %v9314_v33 }
 0x280   :  { %8846 = vmatprep.subr.bf16.mxu0 %v9316_v35 }
 0x281   :  { %8859 = vmatpush3.bf16.msra.mxu1 %v9315_v34 }
 0x283   :  { %8847 = vmatpush3.bf16.msra.mxu0 %v9316_v35 }
 0x284   :  { %8864 = vmatprep.subr.bf16.mxu0 %v10336_v36 }
 0x324   :  { %v8814_v37 = vpop.f32.mrf.mxu1 }
 0x326   :  { %v8802_v61 = vpop.f32.mrf.mxu0  ;;  %v1656_v38 = vpop.f32.mrf.mxu1 }
 0x327   :  { %v1665_v45 = vadd.f32 %v8814_v37, %v8802_v61 }
 0x328   :  { %v1577_v39 = vpop.f32.mrf.mxu0  ;;  %v8815_v40 = vpop.f32.mrf.mxu1 }
 0x329   :  { %v1657_v49 = vadd.f32 %v1656_v38, %v1577_v39 }
 0x32a   :  { %v8803_v41 = vpop.f32.mrf.mxu0  ;;  %v1659_v42 = vpop.f32.mrf.mxu1 }
 0x32b   :  { %v1668_v59 = vadd.f32 %v8815_v40, %v8803_v41 }
 0x32c   :  { %v1580_v44 = vpop.f32.mrf.mxu0 }
 0x32d   :  { %v1660_v62 = vadd.f32 %v1659_v42, %v1580_v44  ;;  %v9318_v44 = vld [vmem:[#allocation7 + $0x50] sm:$0xff]  }
 0x334   :  { %v8838_v12 = vpop.f32.mrf.mxu1 }
 0x335   :  { %v1877_v46 = vmul.f32 %v8838_v12, %v7682_v43 }
 0x336   :  { %v1853_v47 = vpop.f32.mrf.mxu1  ;;  %v8826_v48 = vpop.f32.mrf.mxu0 }
 0x337   :  { %v1888_v50 = vadd.f32 %v7683_v11, %v1877_v46  ;;  %v1875_v51 = vmul.f32 %v7682_v43, %v1853_v47  ;;  %v1777_v14 = vadd.f32 %v8826_v48, %v1665_v45  ;;  %v9320_v45 = vld [vmem:[#allocation7 + $0x40] sm:$0xff]  }
 0x338   :  { %v8839_v19 = vpop.f32.mrf.mxu1  ;;  %v1760_v20 = vpop.f32.mrf.mxu0 }
 0x339   :  { %v1886_v52 = vadd.f32 %v7683_v11, %v1875_v51  ;;  %v1892_v55 = vadd.f32 %v1888_v50, %v1777_v14  ;;  %v1878_v57 = vmul.f32 %v8839_v19, %v7682_v43  ;;  %v1775_v58 = vadd.f32 %v1760_v20, %v1657_v49  ;;  %v9323_v14 = vld [vmem:[#allocation8 + $0x74] ss:$8 sps:$4 sm:$0xff]   ;;  %v9324_v19 = vld [vmem:[#allocation8 + $0xf0] ss:$8 sps:$4 sm:$0xff]  }
 0x33a   :  { %v1856_v63 = vpop.f32.mrf.mxu1  ;;  %v8827_v53 = vpop.f32.mrf.mxu0  ;;  %v9326_v20 = vld [vmem:[#allocation8 + $0xf4] ss:$8 sps:$4 sm:$0xff]  }
 0x33b   :  { %v1896_v54 = vmax.f32 %v1892_v55, 0.0  ;;  %v1889_v56 = vadd.f32 %v7683_v11, %v1878_v57  ;;  %v1890_v0 = vadd.f32 %v1886_v52, %v1775_v58  ;;  %v1876_v1 = vmul.f32 %v7682_v43, %v1856_v63  ;;  %v9327_v52 = vld [vmem:[#allocation8 + $0x60] ss:$8 sps:$4 sm:$0xff]   ;;  %v9329_v55 = vld [vmem:[#allocation8 + $0x64] ss:$8 sps:$4 sm:$0xff]   ;;  %2412 = vmatprep.subr.bf16.mxu1 %v9326_v20 }
 0x33c   :  { %v1778_v4 = vadd.f32 %v8827_v53, %v1668_v59  ;;  %v1763_v5 = vpop.f32.mrf.mxu0  ;;  %v9332_v57 = vld [vmem:[#allocation8 + $0xe4] ss:$8 sps:$4 sm:$0xff]   ;;  %v9335_v58 = vld [vmem:[#allocation8 + $0x54] ss:$8 sps:$4 sm:$0xff]   ;;  %v9330_v59 = vld [vmem:[#allocation8 + $0xe0] ss:$8 sps:$4 sm:$0xff]  }
 0x33d   :  { %v1894_v6 = vmax.f32 %v1890_v0, 0.0  ;;  %v1887_v7 = vadd.f32 %v7683_v11, %v1876_v1  ;;  %v1776_v8 = vadd.f32 %v1763_v5, %v1660_v62  ;;  %v1905_v10 = vrot.slane %v1896_v54, 7  ;;  %v9319_v11 = vld [vmem:[#allocation7 + $0x48] sm:$0xff]   ;;  %v9338_v62 = vld [vmem:[#allocation8 + $0xd4] ss:$8 sps:$4 sm:$0xff]  }
 0x33e   :  { %v1893_v9 = vadd.f32 %v1889_v56, %v1778_v4  ;;  %v9333_v63 = vld [vmem:[#allocation8 + $0x50] ss:$8 sps:$4 sm:$0xff]   ;;  %v9341_v54 = vld [vmem:[#allocation8 + $0x44] ss:$8 sps:$4 sm:$0xff]   ;;  %v9339_v56 = vld [vmem:[#allocation8 + $0x40] ss:$8 sps:$4 sm:$0xff]  }
 0x33f   :  { %v1902_v15 = vrot.slane %v1894_v6, 7  ;;  %v1891_v16 = vadd.f32 %v1887_v7, %v1776_v8  ;;  %v1915_v21 = vsel %vm1457_vm7, 0.0, %v1905_v10  ;;  %v9336_v53 = vld [vmem:[#allocation8 + $0xd0] ss:$8 sps:$4 sm:$0xff]   ;;  %v9344_v0 = vld [vmem:[#allocation8 + $0xc4] ss:$8 sps:$4 sm:$0xff]  }
 0x340   :  { %v1897_v17 = vmax.f32 %v1893_v9, 0.0  ;;  %v1937_v27 = vrot.slane %v1915_v21, 1  ;;  %v2120_v48 = vrot.slane %v1915_v21, 2  ;;  %v9342_v1 = vld [vmem:[#allocation8 + $0xc0] ss:$8 sps:$4 sm:$0xff]  }
 0x341   :  { %v1895_v18 = vmax.f32 %v1891_v16, 0.0  ;;  %v1914_v22 = vsel %vm1457_vm7, 0.0, %v1902_v15  ;;  %v9347_v4 = vld [vmem:[#allocation8 + $0x34] ss:$8 sps:$4 sm:$0xff]   ;;  %v9345_v5 = vld [vmem:[#allocation8 + $0x30] ss:$8 sps:$4 sm:$0xff]  }
 0x342   :  { %v1906_v2 = vrot.slane %v1897_v17, 7  ;;  %v1932_v28 = vrot.slane %v1914_v22, 1  ;;  %v2115_v30 = vrot.slane %v1914_v22, 2  ;;  %v9350_v6 = vld [vmem:[#allocation8 + $0xb4] ss:$8 sps:$4 sm:$0xff]  }
 0x343   :  { %v1903_v23 = vrot.slane %v1895_v18, 7  ;;  %v9348_v7 = vld [vmem:[#allocation8 + $0xb0] ss:$8 sps:$4 sm:$0xff]   ;;  %v9353_v8 = vld [vmem:[#allocation8 + $0x24] ss:$8 sps:$4 sm:$0xff]  }
 0x344   :  { %v1907_v3 = vsel %vm1457_vm7, %v1905_v10, %v1906_v2  ;;  %v1917_v24 = vsel %vm1457_vm7, %v1906_v2, 0.0  ;;  %v9351_v9 = vld [vmem:[#allocation8 + $0x20] ss:$8 sps:$4 sm:$0xff]   ;;  %v9356_v10 = vld [vmem:[#allocation8 + $0xa4] ss:$8 sps:$4 sm:$0xff]  }
 0x345   :  { %v1938_v25 = vrot.slane %v1907_v3, 1  ;;  %v1940_v26 = vrot.slane %v1917_v24, 1  ;;  %v1904_v29 = vsel %vm1457_vm7, %v1902_v15, %v1903_v23  ;;  %v1916_v13 = vsel %vm1457_vm7, %v1903_v23, 0.0  ;;  %v9354_v15 = vld [vmem:[#allocation8 + $0xa0] ss:$8 sps:$4 sm:$0xff]  }
 0x346   :  { %v1933_v31 = vrot.slane %v1904_v29, 1  ;;  %v1935_v60 = vrot.slane %v1916_v13, 1  ;;  %v2116_v32 = vrot.slane %v1904_v29, 2  ;;  %v2118_v34 = vrot.slane %v1916_v13, 2  ;;  %v9359_v16 = vld [vmem:[#allocation8 + $0x14] ss:$8 sps:$4 sm:$0xff]  }
 0x347   :  { %v1941_v33 = vsel %vm183_vm1, %v1938_v25, %v1940_v26  ;;  %v1918_v35 = vpack.c.bf16 %v1904_v29, %v1914_v22  ;;  %v1939_v37 = vsel %vm183_vm1, %v1937_v27, %v1938_v25  ;;  %v1919_v61 = vpack.c.bf16 %v1907_v3, %v1915_v21  ;;  %v9357_v17 = vld [vmem:[#allocation8 + $0x10] ss:$8 sps:$4 sm:$0xff]   ;;  %v9362_v18 = vld [vmem:[#allocation8 + $0x94] ss:$8 sps:$4 sm:$0xff]   ;;  %v9365_v21 = vld [vmem:[#allocation8 + $0x4] ss:$8 sps:$4 sm:$0xff]  }
 0x348   :  { %v1934_v38 = vsel %vm183_vm1, %v1932_v28, %v1933_v31  ;;  %v1936_v39 = vsel %vm183_vm1, %v1933_v31, %v1935_v60  ;;  %v2117_v40 = vsel %vm368_vm4, %v2115_v30, %v2116_v32  ;;  %v2119_v42 = vsel %vm368_vm4, %v2116_v32, %v2118_v34  ;;  %v9360_v2 = vld [vmem:[#allocation8 + $0x90] ss:$8 sps:$4 sm:$0xff]   ;;  %v9363_v22 = vld [vmem:[#allocation8] ss:$8 sps:$4 sm:$0xff]   ;;  %v9368_v23 = vld [vmem:[#allocation8 + $0x84] ss:$8 sps:$4 sm:$0xff]  }
 0x349   :  { %8860 = vmatprep.mubr.msk.bf16.mxu1 %vm233_vm2, %v1918_v35  ;;  %v1946_v41 = vpack.c.bf16 %v1936_v39, %v1934_v38  ;;  %v1947_v43 = vpack.c.bf16 %v1941_v33, %v1939_v37  ;;  %v2129_v12 = vpack.c.bf16 %v2119_v42, %v2117_v40  ;;  %v2121_v46 = vrot.slane %v1907_v3, 2  ;;  %v9366_v3 = vld [vmem:[#allocation8 + $0x80] ss:$8 sps:$4 sm:$0xff]   ;;  %v9371_v25 = vld [vmem:[#allocation8 + $0x174] ss:$8 sps:$4 sm:$0xff]  }
 0x34a   :  { %8861 = vmatmul.mubr.msk.bf16.vlgmr.msra.gmra.mxu1 %vm233_vm2, %v1919_v61  ;;  %v2123_v47 = vrot.slane %v1917_v24, 2  ;;  %v9835_v24 = vmov 0   ;;  %v7702_v35 = vld [vmem:[%s11427_s12] ss:$0 sm:$0xff] }
 0x34b   :  { %8848 = vmatprep.mubr.msk.bf16.mxu0 %vm233_vm2, %v1946_v41  ;;  %v2122_v50 = vsel %vm368_vm4, %v2120_v48, %v2121_v46  ;;  %2413 = vmatpush1.bf16.msra.mxu1 %v9324_v19 }
 0x34c   :  { %8849 = vmatmul.mubr.msk.bf16.vlgmr.msra.gmra.mxu0 %vm233_vm2, %v1947_v43  ;;  %v2124_v49 = vsel %vm368_vm4, %v2121_v46, %v2123_v47  ;;  %2414 = vmatprep.subr.bf16.mxu1 %v9332_v57 }
 0x34d   :  { %8865 = vmatpush3.bf16.msra.mxu0 %v10336_v36  ;;  %8872 = vmatprep.mubr.msk.bf16.mxu0 %vm233_vm2, %v2129_v12  ;;  %v2130_v51 = vpack.c.bf16 %v2124_v49, %v2122_v50  ;;  %v9321_v36 = vld [vmem:[#allocation8 + $0x70] ss:$8 sps:$4 sm:$0xff]   ;;  %v7703_v12 = vld [vmem:[%s11428_s13] ss:$0 sm:$0xff] }
 0x34e   :  { %8866 = vmatprep.subr.bf16.mxu0 %v9318_v44  ;;  %2444 = vmatprep.mubr.bf16.mxu1 %v9835_v24 }
 0x34f   :  { %2415 = vmatpush1.bf16.msra.mxu1 %v9330_v59  ;;  %9238 = vset.pattern.permute.xlu0 %v9835_v24 }
 0x350   :  { %2416 = vmatprep.subr.bf16.mxu1 %v9338_v62  ;;  %9239 = vset.pattern.permute.xlu1 %v9835_v24 }
 0x351   :  { %8867 = vmatpush3.bf16.msra.mxu0 %v9318_v44 }
 0x352   :  { %8868 = vmatprep.subr.bf16.mxu0 %v9319_v11 }
 0x353   :  { %2417 = vmatpush1.bf16.msra.mxu1 %v9336_v53 }
 0x354   :  { %2418 = vmatprep.subr.bf16.mxu1 %v9344_v0 }
 0x355   :  { %8869 = vmatpush3.bf16.msra.mxu0 %v9319_v11 }
 0x356   :  { %8870 = vmatprep.subr.bf16.mxu0 %v9320_v45 }
 0x357   :  { %2419 = vmatpush1.bf16.msra.mxu1 %v9342_v1  ;;  %v9436_v1 = vld [vmem:[#allocation10 + $0x118] sm:$0xff]  }
 0x358   :  { %2420 = vmatprep.subr.bf16.mxu1 %v9350_v6 }
 0x359   :  { %8871 = vmatpush3.bf16.msra.mxu0 %v9320_v45 }
 0x35a   :  { %2545 = vmatprep.subr.bf16.mxu0 %v9323_v14 }
 0x35b   :  { %2421 = vmatpush1.bf16.msra.mxu1 %v9348_v7 }
 0x35c   :  { %8873 = vmatmul.mubr.msk.bf16.vlgmr.msra.gmra.mxu0 %vm233_vm2, %v2130_v51  ;;  %2422 = vmatprep.subr.bf16.mxu1 %v9356_v10 }
 0x35d   :  { %2546 = vmatpush1.bf16.msra.mxu0 %v9321_v36  ;;  %2577 = vmatprep.mubr.bf16.mxu0 %v9835_v24 }
 0x35e   :  { %2547 = vmatprep.subr.bf16.mxu0 %v9329_v55 }
 0x35f   :  { %2423 = vmatpush1.bf16.msra.mxu1 %v9354_v15  ;;  %v9369_v15 = vld [vmem:[#allocation8 + $0x170] ss:$8 sps:$4 sm:$0xff]  }
 0x360   :  { %2424 = vmatprep.subr.bf16.mxu1 %v9362_v18 }
 0x361   :  { %2548 = vmatpush1.bf16.msra.mxu0 %v9327_v52 }
 0x362   :  { %2549 = vmatprep.subr.bf16.mxu0 %v9335_v58 }
 0x363   :  { %2425 = vmatpush1.bf16.msra.mxu1 %v9360_v2  ;;  %v9374_v2 = vld [vmem:[#allocation8 + $0x164] ss:$8 sps:$4 sm:$0xff]  }
 0x364   :  { %2426 = vmatprep.subr.bf16.mxu1 %v9368_v23 }
 0x365   :  { %2550 = vmatpush1.bf16.msra.mxu0 %v9333_v63 }
 0x366   :  { %2551 = vmatprep.subr.bf16.mxu0 %v9341_v54 }
 0x367   :  { %2427 = vmatpush1.bf16.msra.mxu1 %v9366_v3  ;;  %v9372_v3 = vld [vmem:[#allocation8 + $0x160] ss:$8 sps:$4 sm:$0xff]  }
 0x368   :  { %2711 = vmatprep.subr.bf16.mxu1 %v9371_v25 }
 0x369   :  { %2552 = vmatpush1.bf16.msra.mxu0 %v9339_v56 }
 0x36a   :  { %2553 = vmatprep.subr.bf16.mxu0 %v9347_v4 }
 0x36d   :  { %2554 = vmatpush1.bf16.msra.mxu0 %v9345_v5 }
 0x36e   :  { %2555 = vmatprep.subr.bf16.mxu0 %v9353_v8 }
 0x371   :  { %2556 = vmatpush1.bf16.msra.mxu0 %v9351_v9 }
 0x372   :  { %2557 = vmatprep.subr.bf16.mxu0 %v9359_v16 }
 0x375   :  { %2558 = vmatpush1.bf16.msra.mxu0 %v9357_v17 }
 0x376   :  { %2559 = vmatprep.subr.bf16.mxu0 %v9365_v21 }
 0x379   :  { %2560 = vmatpush1.bf16.msra.mxu0 %v9363_v22 }
 0x40a   :  { %v8862_v28 = vpop.f32.mrf.mxu1 }
 0x40c   :  { %v8850_v26 = vpop.f32.mrf.mxu0  ;;  %v2100_v13 = vpop.f32.mrf.mxu1 }
 0x40d   :  { %v2109_v31 = vadd.f32 %v8862_v28, %v8850_v26 }
 0x40e   :  { %v2021_v27 = vpop.f32.mrf.mxu0  ;;  %v8863_v32 = vpop.f32.mrf.mxu1 }
 0x40f   :  { %v2101_v33 = vadd.f32 %v2100_v13, %v2021_v27  ;;  %v9377_v27 = vld [vmem:[#allocation8 + $0x154] ss:$8 sps:$4 sm:$0xff]   ;;  %v9375_v13 = vld [vmem:[#allocation8 + $0x150] ss:$8 sps:$4 sm:$0xff]  }
 0x410   :  { %v8851_v29 = vpop.f32.mrf.mxu0  ;;  %v2103_v40 = vpop.f32.mrf.mxu1 }
 0x411   :  { %v2112_v61 = vadd.f32 %v8863_v32, %v8851_v29  ;;  %v9383_v32 = vld [vmem:[#allocation8 + $0x134] ss:$8 sps:$4 sm:$0xff]  }
 0x412   :  { %v2024_v30 = vpop.f32.mrf.mxu0 }
 0x413   :  { %v2104_v44 = vadd.f32 %v2103_v40, %v2024_v30 }
 0x41c   :  { %v8874_v60 = vpop.f32.mrf.mxu0 }
 0x41d   :  { %v2221_v34 = vadd.f32 %v8874_v60, %v2109_v31  ;;  %v9380_v31 = vld [vmem:[#allocation8 + $0x144] ss:$8 sps:$4 sm:$0xff]   ;;  %v9378_v60 = vld [vmem:[#allocation8 + $0x140] ss:$8 sps:$4 sm:$0xff]  }
 0x41e   :  { %v2204_v37 = vpop.f32.mrf.mxu0 }
 0x41f   :  { %v2219_v38 = vadd.f32 %v2204_v37, %v2101_v33  ;;  %v2232_v41 = vmul.f32 %v7702_v35, %v2221_v34  ;;  %v9381_v33 = vld [vmem:[#allocation8 + $0x130] ss:$8 sps:$4 sm:$0xff]   ;;  %v9386_v34 = vld [vmem:[#allocation8 + $0x124] ss:$8 sps:$4 sm:$0xff]   ;;  %v9389_v37 = vld [vmem:[#allocation8 + $0x114] ss:$8 sps:$4 sm:$0xff]  }
 0x420   :  { %v8875_v39 = vpop.f32.mrf.mxu0 }
 0x421   :  { %v2230_v42 = vmul.f32 %v7702_v35, %v2219_v38  ;;  %v2222_v43 = vadd.f32 %v8875_v39, %v2112_v61  ;;  %v2243_v48 = vadd.f32 %v7703_v12, %v2232_v41  ;;  %v9387_v61 = vld [vmem:[#allocation8 + $0x110] ss:$8 sps:$4 sm:$0xff]   ;;  %v9392_v38 = vld [vmem:[#allocation8 + $0x104] ss:$8 sps:$4 sm:$0xff]  }
 0x422   :  { %v2207_v11 = vpop.f32.mrf.mxu0 }
 0x423   :  { %v2241_v45 = vadd.f32 %v7703_v12, %v2230_v42  ;;  %v2233_v46 = vmul.f32 %v7702_v35, %v2222_v43  ;;  %v2220_v47 = vadd.f32 %v2207_v11, %v2104_v44  ;;  %v2251_v20 = vmul.f32 0.2, %v2243_v48  ;;  %v9390_v42 = vld [vmem:[#allocation8 + $0x100] ss:$8 sps:$4 sm:$0xff]  }
 0x424   :  { %vm2247_vm10 = vcmp.gt.f32.partialorder %v2243_v48, 0.0 }
 0x425   :  { %vm2245_vm8 = vcmp.gt.f32.partialorder %v2241_v45, 0.0  ;;  %v2249_v49 = vmul.f32 0.2, %v2241_v45  ;;  %v2244_v50 = vadd.f32 %v7703_v12, %v2233_v46  ;;  %v2231_v51 = vmul.f32 %v7702_v35, %v2220_v47  ;;  %v9384_v35 = vld [vmem:[#allocation8 + $0x120] ss:$8 sps:$4 sm:$0xff]  }
 0x426   :  { %v2255_v62 = vsel %vm2247_vm10, %v2243_v48, %v2251_v20  ;;  %v9399_v20 = vld [vmem:[#allocation10 + $0xf0] sm:$0xff]  }
 0x427   :  { %v2253_v36 = vsel %vm2245_vm8, %v2241_v45, %v2249_v49  ;;  %v2252_v14 = vmul.f32 0.2, %v2244_v50  ;;  %vm2248_vm9 = vcmp.gt.f32.partialorder %v2244_v50, 0.0  ;;  %v2242_v19 = vadd.f32 %v7703_v12, %v2231_v51  ;;  %v9394_v51 = vld [vmem:[#allocation10 + $0x38] sm:$0xff]  }
 0x428   :  { %v2261_v52 = vrot.slane %v2253_v36, 7  ;;  %v2264_v4 = vrot.slane %v2255_v62, 7  ;;  %v9395_v36 = vld [vmem:[#allocation10 + $0xf8] sm:$0xff]   ;;  %v9403_v62 = vld [vmem:[#allocation10 + $0xe8] sm:$0xff]  }
 0x429   :  { %vm2246_vm11 = vcmp.gt.f32.partialorder %v2242_v19, 0.0  ;;  %v2250_v55 = vmul.f32 0.2, %v2242_v19  ;;  %v2256_v57 = vsel %vm2248_vm9, %v2244_v50, %v2252_v14  ;;  %v9393_v50 = vld [vmem:[#allocation10 + $0x78] sm:$0xff]   ;;  %8309 = vmatprep.subr.bf16.mxu0 %v9395_v36 }
 0x42a   :  { %v10382_v53 = vsel %vm1457_vm7, 0.0, %v2261_v52  ;;  %v2265_v54 = vrot.slane %v2256_v57, 7  ;;  %v2274_v21 = vsel %vm1457_vm7, 0.0, %v2264_v4  ;;  %v9396_v14 = vld [vmem:[#allocation10 + $0xb8] sm:$0xff]   ;;  %v9401_v57 = vld [vmem:[#allocation10 + $0x68] sm:$0xff]  }
 0x42b   :  { %v2254_v58 = vsel %vm2246_vm11, %v2242_v19, %v2250_v55  ;;  %v2299_v7 = vrot.slane %v10382_v53, 1  ;;  %v2304_v25 = vrot.slane %v2274_v21, 1  ;;  %v2598_v41 = vrot.slane %v10382_v53, 2  ;;  %v9397_v19 = vld [vmem:[#allocation10 + $0x70] sm:$0xff]   ;;  %v9405_v53 = vld [vmem:[#allocation10 + $0x60] sm:$0xff]  }
 0x42c   :  { %v2262_v63 = vrot.slane %v2254_v58, 7  ;;  %v10403_v9 = vsel %vm1457_vm7, %v2264_v4, %v2265_v54  ;;  %v2276_v10 = vsel %vm1457_vm7, %v2265_v54, 0.0  ;;  %v2603_v46 = vrot.slane %v2274_v21, 2  ;;  %v9400_v55 = vld [vmem:[#allocation10 + $0xb0] sm:$0xff]   ;;  %v9402_v58 = vld [vmem:[#allocation10 + $0x28] sm:$0xff]   ;;  %v9406_v54 = vld [vmem:[#allocation10 + $0x20] sm:$0xff]  }
 0x42d   :  { %v2305_v22 = vrot.slane %v10403_v9, 1  ;;  %v2307_v23 = vrot.slane %v2276_v10, 1  ;;  %v7742_v26 = vpack.c.bf16 %v10403_v9, %v2264_v4  ;;  %v2604_v11 = vrot.slane %v10403_v9, 2  ;;  %v9409_v4 = vld [vmem:[#allocation10 + $0x58] sm:$0xff]   ;;  %v9414_v9 = vld [vmem:[#allocation10 + $0x10] sm:$0xff]   ;;  %v9421_v21 = vld [vmem:[#allocation10 + $0x40] sm:$0xff]  }
 0x42e   :  { %v10385_v56 = vsel %vm1457_vm7, %v2261_v52, %v2262_v63  ;;  %v10388_v0 = vsel %vm1457_vm7, %v2262_v63, 0.0  ;;  %v2606_v45 = vrot.slane %v2276_v10, 2  ;;  %v9404_v63 = vld [vmem:[#allocation10 + $0xa8] sm:$0xff]   ;;  %v9415_v10 = vld [vmem:[#allocation10 + $0xd0] sm:$0xff]  }
 0x42f   :  { %v2302_v5 = vrot.slane %v10388_v0, 1  ;;  %v7738_v6 = vpack.c.bf16 %v10385_v56, %v2261_v52  ;;  %v2300_v8 = vrot.slane %v10385_v56, 1  ;;  %v2306_v28 = vsel %vm183_vm1, %v2304_v25, %v2305_v22  ;;  %v9398_v52 = vld [vmem:[#allocation10 + $0x30] sm:$0xff]   ;;  %v3552_v25 = vld [vmem:[%s11461_s25] sm:$0xff] }
 0x430   :  { %v2308_v29 = vsel %vm183_vm1, %v2305_v22, %v2307_v23  ;;  %v2599_v39 = vrot.slane %v10385_v56, 2  ;;  %v2601_v40 = vrot.slane %v10388_v0, 2  ;;  %v2605_v47 = vsel %vm368_vm4, %v2603_v46, %v2604_v11  ;;  %v9407_v56 = vld [vmem:[#allocation10 + $0xe0] sm:$0xff]  }
 0x431   :  { %7739 = vmatmul.mubr.msk.bf16.vlgmr.msra.gmra.mxu0 %vm10392_vm14, %v7738_v6  ;;  %v2301_v16 = vsel %vm183_vm1, %v2299_v7, %v2300_v8  ;;  %v2303_v17 = vsel %vm183_vm1, %v2300_v8, %v2302_v5  ;;  %v2314_v30 = vpack.c.bf16 %v2308_v29, %v2306_v28  ;;  %v2607_v48 = vsel %vm368_vm4, %v2604_v11, %v2606_v45  ;;  %v9408_v0 = vld [vmem:[#allocation10 + $0xa0] sm:$0xff]   ;;  %v9410_v5 = vld [vmem:[#allocation10 + $0x18] sm:$0xff]   ;;  %v9413_v8 = vld [vmem:[#allocation10 + $0x50] sm:$0xff]  }
 0x432   :  { %2587 = vmatprep.mubr.bf16.mxu0 %v9835_v24  ;;  %v2313_v18 = vpack.c.bf16 %v2303_v17, %v2301_v16  ;;  %v2600_v43 = vsel %vm368_vm4, %v2598_v41, %v2599_v39  ;;  %v2602_v44 = vsel %vm368_vm4, %v2599_v39, %v2601_v40  ;;  %v2613_v49 = vpack.c.bf16 %v2607_v48, %v2605_v47  ;;  %v9411_v6 = vld [vmem:[#allocation10 + $0xd8] sm:$0xff]   ;;  %v9417_v16 = vld [vmem:[#allocation10 + $0x48] sm:$0xff]   ;;  %v9422_v22 = vld [vmem:[#allocation10] sm:$0xff]  }
 0x433   :  { %v2612_v12 = vpack.c.bf16 %v2602_v44, %v2600_v43  ;;  %8310 = vmatpush3.bf16.msra.mxu0 %v9396_v14  ;;  %v9412_v7 = vld [vmem:[#allocation10 + $0x98] sm:$0xff]   ;;  %v9418_v17 = vld [vmem:[#allocation10 + $0x8] sm:$0xff]   ;;  %v9423_v23 = vld [vmem:[#allocation10 + $0xc0] sm:$0xff]  }
 0x434   :  { %2445 = vmatmul.mubr.bf16.vlgmr.msra.gmra.mxu1 %v2313_v18  ;;  %8311 = vmatprep.subr.bf16.mxu0 %v9399_v20  ;;  %v9419_v18 = vld [vmem:[#allocation10 + $0xc8] sm:$0xff]   ;;  %v3561_v29 = vld [vmem:[%s11462_s0 + $0x10] sm:$0xff]  ;;  %v2792_v46 = vld [vmem:[%s11431_s16] sm:$0x3] }
 0x435   :  { %2712 = vmatpush1.bf16.msra.mxu1 %v9369_v15  ;;  %2454 = vmatprep.mubr.bf16.mxu1 %v9835_v24  ;;  %v9416_v15 = vld [vmem:[#allocation10 + $0x90] sm:$0xff]  }
 0x436   :  { %2713 = vmatprep.subr.bf16.mxu1 %v9374_v2  ;;  %v9420_v2 = vld [vmem:[#allocation10 + $0x88] sm:$0xff]   ;;  %3575 = vperm.xlu0 %9238, %v3561_v29  }
 0x437   :  { %8312 = vmatpush3.bf16.msra.mxu0 %v9400_v55 }
 0x438   :  { %8313 = vmatprep.subr.bf16.mxu0 %v9403_v62 }
 0x439   :  { %7743 = vmatmul.mubr.msk.bf16.gmra.mxu0 %vm10392_vm14, %v7742_v26  ;;  %2714 = vmatpush1.bf16.msra.mxu1 %v9372_v3  ;;  %v9424_v3 = vld [vmem:[#allocation10 + $0x80] sm:$0xff]   ;;  %v3553_v26 = vld [vmem:[%s11461_s25 + $0x8] sm:$0xff] }
 0x43a   :  { %2715 = vmatprep.subr.bf16.mxu1 %v9377_v27  ;;  %v9425_v27 = vld [vmem:[#allocation10 + $0x178] sm:$0xff]   ;;  %v10433_v28 = vpack.c.bf16 %v3553_v26, %v3552_v25 }
 0x43b   :  { %8314 = vmatpush3.bf16.msra.mxu0 %v9404_v63 }
 0x43c   :  { %2455 = vmatmul.mubr.bf16.gmra.mxu1 %v2314_v30  ;;  %8315 = vmatprep.subr.bf16.mxu0 %v9407_v56  ;;  %v3562_v30 = vld [vmem:[%s11462_s0 + $0x18] sm:$0xff] }
 0x43d   :  { %2716 = vmatpush1.bf16.msra.mxu1 %v9375_v13  ;;  %2743 = vmatprep.mubr.bf16.mxu1 %v9835_v24  ;;  %v3559_v13 = vld [vmem:[%s11462_s0] sm:$0xff] }
 0x43e   :  { %2717 = vmatprep.subr.bf16.mxu1 %v9380_v31  ;;  %3565 = vperm.xlu1 %9239, %v3559_v13   ;;  %v3560_v31 = vld [vmem:[%s11462_s0 + $0x8] sm:$0xff] }
 0x43f   :  { %8316 = vmatpush3.bf16.msra.mxu0 %v9408_v0  ;;  %3580 = vperm.xlu0 %9238, %v3562_v30  }
 0x440   :  { %8317 = vmatprep.subr.bf16.mxu0 %v9411_v6 }
 0x441   :  { %2718 = vmatpush1.bf16.msra.mxu1 %v9378_v60 }
 0x442   :  { %2719 = vmatprep.subr.bf16.mxu1 %v9383_v32  ;;  %3570 = vperm.xlu1 %9239, %v3560_v31  }
 0x443   :  { %8318 = vmatpush3.bf16.msra.mxu0 %v9412_v7 }
 0x444   :  { %8319 = vmatprep.subr.bf16.mxu0 %v9415_v10 }
 0x445   :  { %2720 = vmatpush1.bf16.msra.mxu1 %v9381_v33 }
 0x446   :  { %2721 = vmatprep.subr.bf16.mxu1 %v9386_v34 }
 0x447   :  { %8320 = vmatpush3.bf16.msra.mxu0 %v9416_v15 }
 0x448   :  { %8321 = vmatprep.subr.bf16.mxu0 %v9419_v18 }
 0x449   :  { %2722 = vmatpush1.bf16.msra.mxu1 %v9384_v35 }
 0x44a   :  { %2723 = vmatprep.subr.bf16.mxu1 %v9389_v37 }
 0x44b   :  { %8322 = vmatpush3.bf16.msra.mxu0 %v9420_v2 }
 0x44c   :  { %8323 = vmatprep.subr.bf16.mxu0 %v9423_v23 }
 0x44d   :  { %2724 = vmatpush1.bf16.msra.mxu1 %v9387_v61  ;;  %v2774_v61 = vlaneseq }
 0x44e   :  { %2725 = vmatprep.subr.bf16.mxu1 %v9392_v38 }
 0x44f   :  { %8324 = vmatpush3.bf16.msra.mxu0 %v9424_v3  ;;  %v2775_v40 = vshrl.u32 %v2774_v61, 7 }
 0x450   :  { %8365 = vmatprep.subr.bf16.mxu0 %v9425_v27 }
 0x451   :  { %2726 = vmatpush1.bf16.msra.mxu1 %v9390_v42  ;;  %v10448_v43 = vsub.s32 0, %v2775_v40  ;;  %v10453_v11 = vsub.s32 1, %v2775_v40 }
 0x452   :  { %8337 = vmatprep.subr.bf16.mxu1 %v9393_v50 }
 0x453   :  { %v10462_v14 = vrot.slane %v2792_v46, %v10448_v43 }
 0x454   :  { %2744 = vmatmul.mubr.bf16.vlgmr.msra.gmra.mxu1 %v2612_v12  ;;  %v2772_v12 = vld [vmem:[%s11430_s15] sm:$0x3] }
 0x455   :  { %2753 = vmatprep.mubr.bf16.mxu1 %v9835_v24  ;;  %8338 = vmatpush3.bf16.msra.mxu1 %v9394_v51  ;;  %v10459_v48 = vrot.slane %v2772_v12, %v10448_v43 }
 0x456   :  { %8339 = vmatprep.subr.bf16.mxu1 %v9397_v19  ;;  %v10465_v19 = vrot.slane %v2772_v12, %v10453_v11 }
 0x459   :  { %8340 = vmatpush3.bf16.msra.mxu1 %v9398_v52 }
 0x45a   :  { %8341 = vmatprep.subr.bf16.mxu1 %v9401_v57 }
 0x45c   :  { %2754 = vmatmul.mubr.bf16.gmra.mxu1 %v2613_v49 }
 0x45d   :  { %8342 = vmatpush3.bf16.msra.mxu1 %v9402_v58  ;;  %v10469_v58 = vrot.slane %v2792_v46, %v10453_v11 }
 0x45e   :  { %8343 = vmatprep.subr.bf16.mxu1 %v9405_v53 }
 0x461   :  { %8344 = vmatpush3.bf16.msra.mxu1 %v9406_v54 }
 0x462   :  { %8345 = vmatprep.subr.bf16.mxu1 %v9409_v4 }
 0x465   :  { %8346 = vmatpush3.bf16.msra.mxu1 %v9410_v5 }
 0x466   :  { %8347 = vmatprep.subr.bf16.mxu1 %v9413_v8 }
 0x469   :  { %8348 = vmatpush3.bf16.msra.mxu1 %v9414_v9 }
 0x46a   :  { %8349 = vmatprep.subr.bf16.mxu1 %v9417_v16 }
 0x46d   :  { %8350 = vmatpush3.bf16.msra.mxu1 %v9418_v17 }
 0x46e   :  { %8351 = vmatprep.subr.bf16.mxu1 %v9421_v21 }
 0x471   :  { %8352 = vmatpush3.bf16.msra.mxu1 %v9422_v22 }
 0x472   :  { %8876 = vmatprep.subr.bf16.mxu1 %v10433_v28 }
 0x4f1   :  { %v2579_v35 = vpop.f32.mrf.mxu0 }
 0x4f3   :  { %v2581_v38 = vpop.f32.mrf.mxu0 }
 0x4f4   :  { %v2446_v60 = vpop.f32.mrf.mxu1 }
 0x4f5   :  { %v2583_v41 = vpop.f32.mrf.mxu0  ;;  %v2580_v47 = vadd.f32 %v2579_v35, %v2446_v60 }
 0x4f6   :  { %v2448_v32 = vpop.f32.mrf.mxu1 }
 0x4f7   :  { %v2585_v44 = vpop.f32.mrf.mxu0  ;;  %v2582_v51 = vadd.f32 %v2581_v38, %v2448_v32 }
 0x4f8   :  { %v2450_v33 = vpop.f32.mrf.mxu1 }
 0x4f9   :  { %v2589_v49 = vpop.f32.mrf.mxu0  ;;  %v2584_v52 = vadd.f32 %v2583_v41, %v2450_v33 }
 0x4fa   :  { %v2452_v34 = vpop.f32.mrf.mxu1 }
 0x4fb   :  { %v2591_v62 = vpop.f32.mrf.mxu0  ;;  %v2586_v0 = vadd.f32 %v2585_v44, %v2452_v34 }
 0x4fc   :  { %v2456_v37 = vpop.f32.mrf.mxu1 }
 0x4fd   :  { %v2590_v8 = vadd.f32 %v2589_v49, %v2456_v37  ;;  %v2593_v9 = vpop.f32.mrf.mxu0 }
 0x4fe   :  { %v2458_v39 = vpop.f32.mrf.mxu1 }
 0x4ff   :  { %v2592_v10 = vadd.f32 %v2591_v62, %v2458_v39  ;;  %v2595_v29 = vpop.f32.mrf.mxu0 }
 0x500   :  { %v2460_v42 = vpop.f32.mrf.mxu1 }
 0x501   :  { %v2594_v13 = vadd.f32 %v2593_v9, %v2460_v42 }
 0x502   :  { %v2462_v45 = vpop.f32.mrf.mxu1 }
 0x503   :  { %v2596_v33 = vadd.f32 %v2595_v29, %v2462_v45 }
 0x514   :  { %v2745_v50 = vpop.f32.mrf.mxu1 }
 0x515   :  { %v2764_v36 = vadd.f32 %v2745_v50, %v2580_v47 }
 0x516   :  { %v2747_v20 = vpop.f32.mrf.mxu1 }
 0x517   :  { %v2784_v55 = vmul.f32 %v10459_v48, %v2764_v36  ;;  %v2765_v57 = vadd.f32 %v2747_v20, %v2582_v51 }
 0x518   :  { %v2749_v63 = vpop.f32.mrf.mxu1 }
 0x519   :  { %v2804_v53 = vadd.f32 %v10462_v14, %v2784_v55  ;;  %v2785_v54 = vmul.f32 %v10465_v19, %v2765_v57  ;;  %v2766_v56 = vadd.f32 %v2749_v63, %v2584_v52 }
 0x51a   :  { %v2751_v4 = vpop.f32.mrf.mxu1 }
 0x51b   :  { %vm2812_vm15 = vcmp.gt.f32.partialorder %v2804_v53, 0.0  ;;  %v2820_v5 = vmul.f32 0.25, %v2804_v53  ;;  %v2805_v6 = vadd.f32 %v10469_v58, %v2785_v54  ;;  %v2786_v7 = vmul.f32 %v10459_v48, %v2766_v56 }
 0x51c   :  { %v2767_v15 = vadd.f32 %v2751_v4, %v2586_v0  ;;  %v2755_v16 = vpop.f32.mrf.mxu1 }
 0x51d   :  { %v2828_v17 = vsel %vm2812_vm15, %v2804_v53, %v2820_v5  ;;  %vm2813_vm8 = vcmp.gt.f32.partialorder %v2805_v6, 0.0  ;;  %v2821_v18 = vmul.f32 0.25, %v2805_v6  ;;  %v2806_v2 = vadd.f32 %v10462_v14, %v2786_v7 }
 0x51e   :  { %v10476_v21 = vrot.slane %v2828_v17, 7  ;;  %v2787_v22 = vmul.f32 %v10465_v19, %v2767_v15  ;;  %v2768_v23 = vadd.f32 %v2755_v16, %v2590_v8  ;;  %v2757_v3 = vpop.f32.mrf.mxu1 }
 0x51f   :  { %v2829_v25 = vsel %vm2813_vm8, %v2805_v6, %v2821_v18  ;;  %vm2814_vm9 = vcmp.gt.f32.partialorder %v2806_v2, 0.0  ;;  %v2822_v26 = vmul.f32 0.25, %v2806_v2  ;;  %v2769_v27 = vadd.f32 %v2757_v3, %v2592_v10 }
 0x520   :  { %v2845_v30 = vrot.slane %v2829_v25, 7  ;;  %v2807_v31 = vadd.f32 %v10469_v58, %v2787_v22  ;;  %v2788_v60 = vmul.f32 %v10459_v48, %v2768_v23  ;;  %v2759_v32 = vpop.f32.mrf.mxu1  ;;  %v10483_v34 = vsel %vm1457_vm7, 0.0, %v10476_v21  ;;  %v9426_v22 = vld [vmem:[#allocation10 + $0x138] sm:$0xff]  }
 0x521   :  { %v2830_v35 = vsel %vm2814_vm9, %v2806_v2, %v2822_v26  ;;  %v2789_v37 = vmul.f32 %v10465_v19, %v2769_v27  ;;  %v2770_v42 = vadd.f32 %v2759_v32, %v2594_v13  ;;  %v2920_v49 = vrot.slane %v10483_v34, 1  ;;  %v9427_v26 = vld [vmem:[#allocation10 + $0x170] sm:$0xff]  }
 0x522   :  { %v2846_v61 = vrot.slane %v2830_v35, 7  ;;  %vm2815_vm10 = vcmp.gt.f32.partialorder %v2807_v31, 0.0  ;;  %v2823_v38 = vmul.f32 0.25, %v2807_v31  ;;  %v2808_v39 = vadd.f32 %v10462_v14, %v2788_v60  ;;  %v2761_v40 = vpop.f32.mrf.mxu1  ;;  %v9428_v35 = vld [vmem:[#allocation10 + $0x130] sm:$0xff]  }
 0x523   :  { %v2809_v41 = vadd.f32 %v10469_v58, %v2789_v37  ;;  %v2771_v44 = vadd.f32 %v2761_v40, %v2596_v33  ;;  %v10496_v47 = vsel %vm1457_vm7, 0.0, %v2845_v30  ;;  %v2790_v57 = vmul.f32 %v10459_v48, %v2770_v42 }
 0x524   :  { %v10490_v12 = vsel %vm1457_vm7, %v10476_v21, %v2846_v61  ;;  %v10493_v45 = vsel %vm1457_vm7, %v2846_v61, 0.0  ;;  %v2831_v46 = vsel %vm2815_vm10, %v2807_v31, %v2823_v38  ;;  %vm2816_vm11 = vcmp.gt.f32.partialorder %v2808_v39, 0.0 }
 0x525   :  { %v2921_v50 = vrot.slane %v10490_v12, 1  ;;  %v2926_v51 = vrot.slane %v10493_v45, 1  ;;  %v7798_v36 = vpack.c.bf16 %v10490_v12, %v10476_v21  ;;  %v2848_v20 = vrot.slane %v2831_v46, 7 }
 0x526   :  { %v2824_v52 = vmul.f32 0.25, %v2808_v39  ;;  %vm2817_vm13 = vcmp.gt.f32.partialorder %v2809_v41, 0.0  ;;  %v2825_v55 = vmul.f32 0.25, %v2809_v41  ;;  %v2791_v62 = vmul.f32 %v10465_v19, %v2771_v44 }
 0x527   :  { %v2923_v63 = vrot.slane %v10496_v47, 1  ;;  %v10507_v54 = vsel %vm1457_vm7, %v2845_v30, %v2848_v20  ;;  %v2873_v56 = vsel %vm1457_vm7, %v2848_v20, 0.0  ;;  %v2922_v0 = vsel %vm183_vm1, %v2920_v49, %v2921_v50 }
 0x528   :  { %v2832_v53 = vsel %vm2816_vm11, %v2808_v39, %v2824_v52  ;;  %v2833_v5 = vsel %vm2817_vm13, %v2809_v41, %v2825_v55  ;;  %v2810_v6 = vadd.f32 %v10462_v14, %v2790_v57  ;;  %v2811_v7 = vadd.f32 %v10469_v58, %v2791_v62  ;;  %v9429_v39 = vld [vmem:[#allocation10 + $0x168] sm:$0xff]   ;;  %v9431_v62 = vld [vmem:[#allocation10 + $0x160] sm:$0xff]  }
 0x529   :  { %v2850_v4 = vrot.slane %v2832_v53, 7  ;;  %v2851_v8 = vrot.slane %v2833_v5, 7  ;;  %v7794_v48 = vpack.c.bf16 %v10507_v54, %v2845_v30  ;;  %v2924_v19 = vrot.slane %v10507_v54, 1  ;;  %v9430_v55 = vld [vmem:[#allocation10 + $0x128] sm:$0xff]   ;;  %v9432_v53 = vld [vmem:[#allocation10 + $0x120] sm:$0xff]  }
 0x52a   :  { %v2928_v9 = vrot.slane %v2873_v56, 1  ;;  %vm2818_vm15 = vcmp.gt.f32.partialorder %v2810_v6, 0.0  ;;  %v2826_v10 = vmul.f32 0.25, %v2810_v6  ;;  %vm2819_vm8 = vcmp.gt.f32.partialorder %v2811_v7, 0.0  ;;  %v9439_v5 = vld [vmem:[#allocation10 + $0x148] sm:$0xff]  }
 0x52b   :  { %v2827_v15 = vmul.f32 0.25, %v2811_v7  ;;  %7795 = vmatprep.mubr.msk.bf16.mxu1 %vm10392_vm14, %v7794_v48  ;;  %v2925_v16 = vsel %vm183_vm1, %v2923_v63, %v2924_v19  ;;  %v2927_v14 = vsel %vm183_vm1, %v2921_v50, %v2926_v51  ;;  %v10521_v58 = vsel %vm1457_vm7, 0.0, %v2851_v8  ;;  %v9433_v50 = vld [vmem:[%s11463_s7] sm:$0xff]  }
 0x52c   :  { %v2929_v17 = vsel %vm183_vm1, %v2924_v19, %v2928_v9  ;;  %v2834_v18 = vsel %vm2818_vm15, %v2810_v6, %v2826_v10  ;;  %7799 = vmatmul.mubr.msk.bf16.vlgmr.msra.gmra.mxu1 %vm10392_vm14, %v7798_v36  ;;  %v2948_v25 = vpack.c.bf16 %v2927_v14, %v2922_v0  ;;  %v2933_v27 = vrot.slane %v10521_v58, 1  ;;  %v9437_v0 = vld [vmem:[#allocation10 + $0x150] sm:$0xff]   ;;  %v9440_v6 = vld [vmem:[#allocation10 + $0x108] sm:$0xff]  }
 0x52d   :  { %v2835_v2 = vsel %vm2819_vm8, %v2811_v7, %v2827_v15  ;;  %v2949_v21 = vpack.c.bf16 %v2929_v17, %v2925_v16  ;;  %v2852_v23 = vrot.slane %v2834_v18, 7  ;;  %8877 = vmatpush3.bf16.msra.mxu1 %v10433_v28  ;;  %v10528_v29 = vsel %vm1457_vm7, 0.0, %v2850_v4  ;;  %v9441_v7 = vld [vmem:[#allocation10 + $0x140] sm:$0xff]  }
 0x52e   :  { %v2854_v3 = vrot.slane %v2835_v2, 7  ;;  %v3279_v13 = vrot.slane %v10507_v54, 2  ;;  %v3283_v30 = vrot.slane %v2873_v56, 2  ;;  %v3278_v38 = vrot.slane %v10496_v47, 2  ;;  %v9434_v54 = vld [vmem:[%s11463_s7 + $0x8] sm:$0xff]   ;;  %v9435_v56 = vld [vmem:[#allocation10 + $0x158] sm:$0xff]  }
 0x52f   :  { %3113 = vmatprep.mubr.bf16.mxu0 %v2949_v21  ;;  %v10535_v60 = vsel %vm1457_vm7, %v2850_v4, %v2852_v23  ;;  %v10541_v32 = vsel %vm1457_vm7, %v2852_v23, 0.0  ;;  %v2930_v40 = vrot.slane %v10528_v29, 1  ;;  %vm3593_vm9 = vcmask 130048   ;;  %v9442_v15 = vld [vmem:[#allocation10 + $0x100] sm:$0xff]  }
 0x530   :  { %3114 = vmatmul.mubr.bf16.vlgmr.msra.gmra.mxu0 %v2948_v25  ;;  %v10532_v31 = vsel %vm1457_vm7, %v2851_v8, %v2854_v3  ;;  %v10538_v28 = vsel %vm1457_vm7, %v2854_v3, 0.0  ;;  %v2931_v41 = vrot.slane %v10535_v60, 1  ;;  %v2936_v42 = vrot.slane %v10541_v32, 1 }
 0x531   :  { %8366 = vmatpush3.bf16.msra.mxu0 %v9426_v22  ;;  %v7802_v33 = vpack.c.bf16 %v10532_v31, %v2851_v8  ;;  %v2934_v37 = vrot.slane %v10532_v31, 1  ;;  %v2938_v61 = vrot.slane %v10538_v28, 1  ;;  %v7806_v44 = vpack.c.bf16 %v10535_v60, %v2850_v4  ;;  %v9438_v4 = vld [vmem:[#allocation10 + $0x110] sm:$0xff]  }
 0x532   :  { %8367 = vmatprep.subr.bf16.mxu0 %v9427_v26  ;;  %v3280_v47 = vsel %vm368_vm4, %v3278_v38, %v3279_v13  ;;  %v2932_v36 = vsel %vm183_vm1, %v2930_v40, %v2931_v41  ;;  %v2937_v20 = vsel %vm183_vm1, %v2931_v41, %v2936_v42  ;;  %v3284_v52 = vsel %vm368_vm4, %v3279_v13, %v3283_v30 }
 0x533   :  { %7803 = vmatprep.mubr.msk.bf16.mxu1 %vm10392_vm14, %v7802_v33  ;;  %v2935_v46 = vsel %vm183_vm1, %v2933_v27, %v2934_v37  ;;  %v2939_v49 = vsel %vm183_vm1, %v2934_v37, %v2938_v61  ;;  %v2950_v57 = vpack.c.bf16 %v2937_v20, %v2932_v36  ;;  %v3304_v63 = vpack.c.bf16 %v3284_v52, %v3280_v47  ;;  %v3566_v61 = vpop.permute.xlu1 %3565 }
 0x534   :  { %v2951_v51 = vpack.c.bf16 %v2939_v49, %v2935_v46  ;;  %7807 = vmatmul.mubr.msk.bf16.gmra.mxu1 %vm10392_vm14, %v7806_v44  ;;  %v3276_v8 = vrot.slane %v10490_v12, 2  ;;  %v3281_v48 = vrot.slane %v10493_v45, 2  ;;  %v3289_v19 = vrot.slane %v10532_v31, 2 }
 0x535   :  { %8368 = vmatpush3.bf16.msra.mxu0 %v9428_v35  ;;  %8878 = vmatprep.mubr.msk.bf16.mxu1 %vm3593_vm9, %v9433_v50  ;;  %v3293_v9 = vrot.slane %v10538_v28, 2  ;;  %v3275_v10 = vrot.slane %v10483_v34, 2  ;;  %v3288_v16 = vrot.slane %v10521_v58, 2  ;;  %v3286_v21 = vrot.slane %v10535_v60, 2  ;;  %v3576_v35 = vpop.permute.xlu0 %3575 }
 0x536   :  { %3121 = vmatprep.mubr.bf16.mxu0 %v2951_v51  ;;  %8369 = vmatprep.subr.bf16.mxu0 %v9429_v39  ;;  %v3282_v14 = vsel %vm368_vm4, %v3276_v8, %v3281_v48  ;;  %v3291_v34 = vrot.slane %v10541_v32, 2  ;;  %v3285_v22 = vrot.slane %v10528_v29, 2  ;;  %v9837_v25 = vmov 0.0  }
 0x537   :  { %v3277_v17 = vsel %vm368_vm4, %v3275_v10, %v3276_v8  ;;  %v3290_v18 = vsel %vm368_vm4, %v3288_v16, %v3289_v19  ;;  %v3294_v12 = vsel %vm368_vm4, %v3289_v19, %v3293_v9  ;;  %8882 = vmatprep.subr.bf16.mxu1 %v9837_v25  ;;  %vm9838_vm14 = vmmov 0   ;;  %v3571_v36 = vpop.permute.xlu1 %3570  ;;  %v7824_v10 = vld [vmem:[%s11433_s18] ss:$0 sm:$0xff] }
 0x538   :  { %3122 = vmatmul.mubr.bf16.gmra.mxu0 %v2950_v57  ;;  %v3303_v45 = vpack.c.bf16 %v3282_v14, %v3277_v17  ;;  %v3306_v2 = vpack.c.bf16 %v3294_v12, %v3290_v18  ;;  %v3287_v58 = vsel %vm368_vm4, %v3285_v22, %v3286_v21  ;;  %v3292_v23 = vsel %vm368_vm4, %v3286_v21, %v3291_v34 }
 0x539   :  { %8370 = vmatpush3.bf16.msra.mxu0 %v9430_v55  ;;  %3468 = vmatprep.mubr.bf16.mxu0 %v3304_v63  ;;  %v3305_v3 = vpack.c.bf16 %v3292_v23, %v3287_v58  ;;  %v3581_v46 = vpop.permute.xlu0 %3580  ;;  %vm3682_vm10 = vcmask 261120  }
 0x53a   :  { %8371 = vmatprep.subr.bf16.mxu0 %v9431_v62 }
 0x53c   :  { %8879 = vmatmul.mubr.msk.bf16.vlgmr.msra.gmra.mxu1 %vm3593_vm9, %v9434_v54  ;;  %vm7224_vm9 = vcmask 1041409  }
 0x53d   :  { %8372 = vmatpush3.bf16.msra.mxu0 %v9432_v53  ;;  %8886 = vmatprep.mubr.msk.bf16.mxu1 %vm9838_vm14, %v9837_v25 }
 0x53e   :  { %8373 = vmatprep.subr.bf16.mxu0 %v9435_v56 }
 0x541   :  { %8374 = vmatpush3.bf16.msra.mxu0 %v9436_v1 }
 0x542   :  { %8375 = vmatprep.subr.bf16.mxu0 %v9437_v0 }
 0x545   :  { %8376 = vmatpush3.bf16.msra.mxu0 %v9438_v4 }
 0x546   :  { %8377 = vmatprep.subr.bf16.mxu0 %v9439_v5 }
 0x549   :  { %8378 = vmatpush3.bf16.msra.mxu0 %v9440_v6 }
 0x54a   :  { %8379 = vmatprep.subr.bf16.mxu0 %v9441_v7 }
 0x54d   :  { %8380 = vmatpush3.bf16.msra.mxu0 %v9442_v15 }
 0x550   :  { %3469 = vmatmul.mubr.bf16.vlgmr.msra.gmra.mxu0 %v3303_v45 }
 0x551   :  { %3476 = vmatprep.mubr.bf16.mxu0 %v3306_v2  ;;  %v7825_v2 = vld [vmem:[%s11434_s19] ss:$0 sm:$0xff] }
 0x558   :  { %3477 = vmatmul.mubr.bf16.gmra.mxu0 %v3305_v3 }
 0x5ec   :  { %v8353_v26 = vpop.f32.mrf.mxu1 }
 0x5ee   :  { %v8354_v27 = vpop.f32.mrf.mxu1 }
 0x5ef   :  { %v8355_v0 = vadd.f32 %v8354_v27, %v8353_v26 }
 0x5f0   :  { %v8356_v13 = vpop.f32.mrf.mxu1  ;;  %v8325_v30 = vpop.f32.mrf.mxu0 }
 0x5f2   :  { %v8357_v31 = vpop.f32.mrf.mxu1  ;;  %v8326_v29 = vpop.f32.mrf.mxu0 }
 0x5f3   :  { %v8327_v56 = vadd.f32 %v8326_v29, %v8325_v30  ;;  %v8358_v17 = vadd.f32 %v8357_v31, %v8356_v13 }
 0x5f4   :  { %v8359_v60 = vpop.f32.mrf.mxu1  ;;  %v8328_v33 = vpop.f32.mrf.mxu0 }
 0x5f5   :  { %v3261_v8 = vadd.f32 %v8355_v0, %v8327_v56 }
 0x5f6   :  { %v8360_v28 = vpop.f32.mrf.mxu1  ;;  %v8329_v39 = vpop.f32.mrf.mxu0 }
 0x5f7   :  { %v8330_v48 = vadd.f32 %v8329_v39, %v8328_v33  ;;  %v8361_v23 = vadd.f32 %v8360_v28, %v8359_v60 }
 0x5f8   :  { %v10587_v32 = vpop.f32.mrf.mxu1  ;;  %v8331_v47 = vpop.f32.mrf.mxu0 }
 0x5f9   :  { %v3264_v34 = vadd.f32 %v8358_v17, %v8330_v48 }
 0x5fa   :  { %v10589_v37 = vpop.f32.mrf.mxu1  ;;  %v8332_v57 = vpop.f32.mrf.mxu0 }
 0x5fb   :  { %v8333_v18 = vadd.f32 %v8332_v57, %v8331_v47 }
 0x5fc   :  { %v8880_v38 = vpop.f32.mrf.mxu1  ;;  %v8334_v63 = vpop.f32.mrf.mxu0 }
 0x5fd   :  { %v3643_v40 = vadd.f32 %v8880_v38, %v3576_v35  ;;  %v3269_v13 = vadd.f32 %v8361_v23, %v8333_v18  ;;  %v8364_v38 = vadd.f32 %v10589_v37, %v10587_v32 }
 0x5fe   :  { %v3634_v41 = vpop.f32.mrf.mxu1  ;;  %v8335_v53 = vpop.f32.mrf.mxu0 }
 0x5ff   :  { %v7836_v42 = vmul.f32 -1.442695, %v3643_v40  ;;  %v3635_v44 = vadd.f32 %v3634_v41, %v3566_v61  ;;  %v8336_v31 = vadd.f32 %v8335_v53, %v8334_v63 }
 0x600   :  { %v8881_v49 = vpop.f32.mrf.mxu1 }
 0x601   :  { %9640 = vpow2.f32 %v7836_v42  ;;  %v7834_v50 = vmul.f32 -1.442695, %v3635_v44  ;;  %v3646_v51 = vadd.f32 %v8881_v49, %v3581_v46  ;;  %v3272_v60 = vadd.f32 %v8364_v38, %v8336_v31  ;;  %v9444_v31 = vld [vmem:[%s11455_s24 + $0xf8] sm:$0xff]  }
 0x602   :  { %v3637_v20 = vpop.f32.mrf.mxu1 }
 0x603   :  { %v7837_v52 = vmul.f32 -1.442695, %v3646_v51  ;;  %v3638_v55 = vadd.f32 %v3637_v20, %v3571_v36  ;;  %9642 = vpow2.f32 %v7834_v50 }
 0x605   :  { %9644 = vpow2.f32 %v7837_v52  ;;  %v7835_v62 = vmul.f32 -1.442695, %v3638_v55 }
 0x607   :  { %9646 = vpow2.f32 %v7835_v62  ;;  %v9443_v62 = vld [vmem:[%s11464_s5] sm:$0xff]  }
 0x60e   :  { %v9641_v54 = vpop.eup %9640 }
 0x60f   :  { %v3663_v4 = vadd.f32 1.0, %v9641_v54 }
 0x610   :  { %v8381_v1 = vpop.f32.mrf.mxu0  ;;  %v9643_v5 = vpop.eup %9642 }
 0x611   :  { %9648 = vrcp.f32 %v3663_v4  ;;  %v3661_v12 = vadd.f32 1.0, %v9643_v5 }
 0x612   :  { %v8382_v6 = vpop.f32.mrf.mxu0  ;;  %v9645_v7 = vpop.eup %9644 }
 0x613   :  { %v8383_v19 = vadd.f32 %v8382_v6, %v8381_v1  ;;  %v3664_v9 = vadd.f32 1.0, %v9645_v7 }
 0x614   :  { %v8384_v15 = vpop.f32.mrf.mxu0  ;;  %v9647_v16 = vpop.eup %9646 }
 0x615   :  { %v3485_v14 = vadd.f32 %v8383_v19, %v3261_v8  ;;  %9650 = vrcp.f32 %v3664_v9  ;;  %v3662_v45 = vadd.f32 1.0, %v9647_v16 }
 0x616   :  { %v8385_v21 = vpop.f32.mrf.mxu0 }
 0x617   :  { %v3496_v22 = vmul.f32 %v7824_v10, %v3485_v14  ;;  %v8386_v58 = vadd.f32 %v8385_v21, %v8384_v15  ;;  %9652 = vrcp.f32 %v3662_v45 }
 0x618   :  { %v8387_v3 = vpop.f32.mrf.mxu0  ;;  %9654 = vrcp.f32 %v3661_v12 }
 0x619   :  { %v3507_v26 = vadd.f32 %v7825_v2, %v3496_v22  ;;  %v3486_v27 = vadd.f32 %v8386_v58, %v3264_v34 }
 0x61a   :  { %v8388_v30 = vpop.f32.mrf.mxu0 }
 0x61b   :  { %v3515_v29 = vmul.f32 1.442695, %v3507_v26  ;;  %v3497_v33 = vmul.f32 %v7824_v10, %v3486_v27  ;;  %v8389_v35 = vadd.f32 %v8388_v30, %v8387_v3  ;;  %vm3511_vm11 = vcmp.gt.f32.partialorder %v3507_v26, 0.0 }
 0x61c   :  { %v8390_v61 = vpop.f32.mrf.mxu0 }
 0x61d   :  { %9656 = vpow2.f32 %v3515_v29  ;;  %v3508_v39 = vadd.f32 %v7825_v2, %v3497_v33  ;;  %v3487_v40 = vadd.f32 %v8389_v35, %v3269_v13  ;;  %v9445_v29 = vld [vmem:[%s11455_s24 + $0x118] sm:$0xff]   ;;  %v9446_v33 = vld [vmem:[%s11455_s24 + $0xf0] sm:$0xff]  }
 0x61e   :  { %v8391_v41 = vpop.f32.mrf.mxu0  ;;  %v9649_v47 = vpop.eup %9648  ;;  %v9447_v35 = vld [vmem:[%s11455_s24 + $0x110] sm:$0xff]   ;;  %8890 = vmatprep.subr.bf16.mxu0 %v9445_v29 }
 0x61f   :  { %v3517_v28 = vmul.f32 1.442695, %v3508_v39  ;;  %v3498_v42 = vmul.f32 %v7824_v10, %v3487_v40  ;;  %v8392_v44 = vadd.f32 %v8391_v41, %v8390_v61  ;;  %vm3512_vm13 = vcmp.gt.f32.partialorder %v3508_v39, 0.0  ;;  %8891 = vmatpush3.bf16.msra.mxu0 %v9445_v29  ;;  %v9448_v61 = vld [vmem:[%s11455_s24 + $0xe8] sm:$0xff]   ;;  %v9450_v41 = vld [vmem:[%s11455_s24 + $0xe0] sm:$0xff]  }
 0x620   :  { %8892 = vmatprep.subr.bf16.mxu0 %v9447_v35  ;;  %v9449_v40 = vld [vmem:[%s11455_s24 + $0x108] sm:$0xff]  }
 0x621   :  { %9658 = vpow2.f32 %v3517_v28  ;;  %v3509_v46 = vadd.f32 %v7825_v2, %v3498_v42  ;;  %v3488_v49 = vadd.f32 %v8392_v44, %v3272_v60  ;;  %v9451_v60 = vld [vmem:[%s11455_s24 + $0x100] sm:$0xff]   ;;  %v9452_v42 = vld [vmem:[%s11455_s24 + $0x158] sm:$0xff]  }
 0x622   :  { %v9651_v50 = vpop.eup %9650 }
 0x623   :  { %v3519_v51 = vmul.f32 1.442695, %v3509_v46  ;;  %v3499_v36 = vmul.f32 %v7824_v10, %v3488_v49  ;;  %v3676_v20 = vpack.c.bf16 %v9651_v50, %v9649_v47  ;;  %vm3513_vm15 = vcmp.gt.f32.partialorder %v3509_v46, 0.0  ;;  %8893 = vmatpush3.bf16.msra.mxu0 %v9447_v35  ;;  %v9453_v49 = vld [vmem:[%s11455_s24 + $0x138] sm:$0xff]  }
 0x624   :  { %v9653_v52 = vpop.eup %9652  ;;  %8894 = vmatprep.subr.bf16.mxu0 %v9449_v40 }
 0x625   :  { %9660 = vpow2.f32 %v3519_v51  ;;  %v3510_v55 = vadd.f32 %v7825_v2, %v3499_v36  ;;  %8883 = vmatpush3.bf16.msra.mxu1 %v3676_v20  ;;  %v9655_v32 = vpop.eup %9654 }
 0x626   :  { %8884 = vmatprep.subr.bf16.mxu1 %v9837_v25  ;;  %v3675_v57 = vpack.c.bf16 %v9653_v52, %v9655_v32 }
 0x627   :  { %v3521_v37 = vmul.f32 1.442695, %v3510_v55  ;;  %vm3514_vm8 = vcmp.gt.f32.partialorder %v3510_v55, 0.0  ;;  %8895 = vmatpush3.bf16.msra.mxu0 %v9449_v40  ;;  %v9458_v40 = vld [vmem:[%s11455_s24 + $0x140] sm:$0xff]  }
 0x628   :  { %8896 = vmatprep.subr.bf16.mxu0 %v9451_v60 }
 0x629   :  { %9662 = vpow2.f32 %v3521_v37  ;;  %8885 = vmatpush3.bf16.msra.mxu1 %v3675_v57 }
 0x62a   :  { %v9657_v63 = vpop.eup %9656  ;;  %8902 = vmatprep.subr.bf16.mxu1 %v9444_v31 }
 0x62b   :  { %v7826_v53 = vadd.f32 -1.0, %v9657_v63  ;;  %8897 = vmatpush3.bf16.msra.mxu0 %v9451_v60 }
 0x62c   :  { %8887 = vmatmul.mubr.msk.bf16.vlgmr.msra.gmra.mxu1 %vm3682_vm10, %v9443_v62  ;;  %8914 = vmatprep.subr.bf16.mxu0 %v9453_v49 }
 0x62d   :  { %v3527_v56 = vmul.f32 0.3, %v7826_v53  ;;  %8903 = vmatpush3.bf16.msra.mxu1 %v9444_v31 }
 0x62e   :  { %v9659_v54 = vpop.eup %9658  ;;  %8904 = vmatprep.subr.bf16.mxu1 %v9446_v33 }
 0x62f   :  { %v7827_v1 = vadd.f32 -1.0, %v9659_v54  ;;  %v3531_v5 = vsel %vm3511_vm11, %v3507_v26, %v3527_v56 }
 0x631   :  { %v3528_v0 = vmul.f32 0.3, %v7827_v1  ;;  %8905 = vmatpush3.bf16.msra.mxu1 %v9446_v33  ;;  %v9455_v33 = vld [vmem:[%s11455_s24 + $0x130] sm:$0xff]  }
 0x632   :  { %v9661_v4 = vpop.eup %9660  ;;  %8906 = vmatprep.subr.bf16.mxu1 %v9448_v61 }
 0x633   :  { %v3532_v6 = vsel %vm3512_vm13, %v3508_v39, %v3528_v0  ;;  %v7828_v7 = vadd.f32 -1.0, %v9661_v4 }
 0x634   :  { %v3535_v8 = vadd.f32 %v3532_v6, %v3531_v5 }
 0x635   :  { %v3529_v9 = vmul.f32 0.3, %v7828_v7  ;;  %8907 = vmatpush3.bf16.msra.mxu1 %v9448_v61  ;;  %v9456_v61 = vld [vmem:[%s11455_s24 + $0x148] sm:$0xff]  }
 0x636   :  { %v9663_v48 = vpop.eup %9662  ;;  %v3536_v19 = vrot.slane %v3535_v8, 4  ;;  %8908 = vmatprep.subr.bf16.mxu1 %v9450_v41 }
 0x637   :  { %v7829_v10 = vadd.f32 -1.0, %v9663_v48  ;;  %v3533_v14 = vsel %vm3513_vm15, %v3509_v46, %v3529_v9 }
 0x638   :  { %v3537_v15 = vadd.f32 %v3536_v19, %v3535_v8 }
 0x639   :  { %v3530_v16 = vmul.f32 0.3, %v7829_v10  ;;  %8909 = vmatpush3.bf16.msra.mxu1 %v9450_v41 }
 0x63a   :  { %v3538_v17 = vrot.slane %v3537_v15, 2  ;;  %8926 = vmatprep.subr.bf16.mxu1 %v9452_v42 }
 0x63b   :  { %v3534_v18 = vsel %vm3514_vm8, %v3510_v55, %v3530_v16 }
 0x63c   :  { %v3542_v12 = vadd.f32 %v3534_v18, %v3533_v14  ;;  %v3539_v2 = vadd.f32 %v3538_v17, %v3537_v15 }
 0x63e   :  { %v3543_v45 = vrot.slane %v3542_v12, 4  ;;  %v3540_v22 = vrot.slane %v3539_v2, 1 }
 0x640   :  { %v3544_v21 = vadd.f32 %v3543_v45, %v3542_v12  ;;  %v3541_v23 = vadd.f32 %v3540_v22, %v3539_v2  ;;  %v9454_v12 = vld [vmem:[%s11455_s24 + $0x150] sm:$0xff]  }
 0x642   :  { %v3545_v34 = vrot.slane %v3544_v21, 2  ;;  %v3550_v27 = vmul.f32 0.0625, %v3541_v23 }
 0x644   :  { %v3546_v58 = vadd.f32 %v3545_v34, %v3544_v21 }
 0x646   :  { %v3547_v3 = vrot.slane %v3546_v58, 1 }
 0x648   :  { %v3548_v26 = vadd.f32 %v3547_v3, %v3546_v58 }
 0x64a   :  { %v3551_v13 = vmul.f32 0.0625, %v3548_v26 }
 0x64c   :  { %v10604_v30 = vsel %vm7224_vm9, %v3551_v13, %v3550_v27 }
 0x64d   :  { %7227 = vst [vmem:[#allocation11] sm:$0x3] %v10604_v30 }
 0x6ec   :  { %v10622_v38 = vpop.f32.mrf.mxu1 }
 0x6ed   :  { %v3735_v47 = vrot.slane %v10622_v38, 5 }
 0x6ee   :  { %v8888_v39 = vpop.f32.mrf.mxu1 }
 0x6ef   :  { %v10651_v52 = vsel %vm152_vm0, 0.0, %v3735_v47  ;;  %v10658_v37 = vsel %vm152_vm0, %v3735_v47, 0.0  ;;  %v9457_v39 = vld [vmem:[%s11455_s24 + $0x128] sm:$0xff]  }
 0x6f0   :  { %v10633_v28 = vpop.f32.mrf.mxu1  ;;  %v3770_v0 = vrot.slane %v10651_v52, 1  ;;  %v3771_v7 = vrot.slane %v10658_v37, 1  ;;  %v4065_v8 = vrot.slane %v10651_v52, 3  ;;  %v4066_v48 = vrot.slane %v10658_v37, 3 }
 0x6f1   :  { %v9240_v44 = vpack.i.bf16 %v10633_v28, %v10622_v38  ;;  %v3737_v50 = vrot.slane %v10633_v28, 5  ;;  %v3955_v19 = vrot.slane %v10651_v52, 2  ;;  %v3956_v45 = vrot.slane %v10658_v37, 2 }
 0x6f2   :  { %v8889_v46 = vpop.f32.mrf.mxu1  ;;  %v3772_v2 = vsel %vm183_vm1, %v3770_v0, %v3771_v7  ;;  %v4067_v23 = vsel %vm477_vm3, %v4065_v8, %v4066_v48 }
 0x6f3   :  { %9241 = vrot.lane.b32.xlu0 %v9240_v44, %s9828_s1  ;;  %v10661_v57 = vsel %vm152_vm0, 0.0, %v3737_v50  ;;  %v10664_v62 = vsel %vm152_vm0, %v3737_v50, 0.0  ;;  %v3957_v29 = vsel %vm368_vm4, %v3955_v19, %v3956_v45 }
 0x6f4   :  { %v3776_v4 = vrot.slane %v10661_v57, 1  ;;  %v3777_v5 = vrot.slane %v10664_v62, 1  ;;  %v4072_v46 = vrot.slane %v10664_v62, 3  ;;  %v4071_v47 = vrot.slane %v10661_v57, 3 }
 0x6f5   :  { %v3962_v7 = vrot.slane %v10664_v62, 2  ;;  %v3961_v48 = vrot.slane %v10661_v57, 2 }
 0x6f6   :  { %v3778_v21 = vsel %vm183_vm1, %v3776_v4, %v3777_v5  ;;  %v4073_v19 = vsel %vm477_vm3, %v4071_v47, %v4072_v46  ;;  %v9468_v46 = vld [vmem:[%s11455_s24 + $0x1b8] sm:$0xff]   ;;  %v4396_v47 = vrot.slane %v10658_v37, 6 }
 0x765   :  { %v10646_v51 = vpop.permute.xlu0 %9241 }
 0x766   :  { %v9244_v36 = vunpack.i.h.bf16 %v10646_v51  ;;  %v9243_v20 = vunpack.i.l.bf16 %v10646_v51  ;;  %v9511_v51 = vld [vmem:[#allocation7 + $0x90] sm:$0xff]  }
 0x768   :  { %v3738_v55 = vrot.slane %v9244_v36, 5  ;;  %v3736_v32 = vrot.slane %v9243_v20, 5 }
 0x76a   :  { %v10667_v63 = vsel %vm152_vm0, 0.0, %v3738_v55  ;;  %v10670_v53 = vsel %vm152_vm0, %v3738_v55, 0.0  ;;  %v10675_v1 = vsel %vm152_vm0, 0.0, %v3736_v32  ;;  %v10681_v6 = vsel %vm152_vm0, %v3736_v32, 0.0  ;;  %v9460_v32 = vld [vmem:[%s11455_s24 + $0x198] sm:$0xff]  }
 0x76b   :  { %v3779_v54 = vrot.slane %v10667_v63, 1  ;;  %v3780_v56 = vrot.slane %v10670_v53, 1  ;;  %v3751_v10 = vpack.c.bf16 %v10675_v1, %v10651_v52  ;;  %v3752_v15 = vpack.c.bf16 %v10667_v63, %v10661_v57 }
 0x76c   :  { %v3773_v16 = vrot.slane %v10675_v1, 1  ;;  %v3774_v17 = vrot.slane %v10681_v6, 1  ;;  %v4068_v14 = vrot.slane %v10675_v1, 3  ;;  %v4069_v18 = vrot.slane %v10681_v6, 3 }
 0x76d   :  { %v3781_v9 = vsel %vm183_vm1, %v3779_v54, %v3780_v56  ;;  %8910 = vmatprep.mubr.msk.bf16.mxu1 %vm233_vm2, %v3751_v10  ;;  %v3958_v34 = vrot.slane %v10675_v1, 2  ;;  %v3959_v22 = vrot.slane %v10681_v6, 2  ;;  %v4074_v41 = vrot.slane %v10667_v63, 3 }
 0x76e   :  { %8911 = vmatmul.mubr.msk.bf16.vlgmr.msra.gmra.mxu1 %vm233_vm2, %v3752_v15  ;;  %v3775_v58 = vsel %vm183_vm1, %v3773_v16, %v3774_v17  ;;  %v4070_v3 = vsel %vm477_vm3, %v4068_v14, %v4069_v18  ;;  %v3787_v26 = vpack.c.bf16 %v3781_v9, %v3778_v21  ;;  %v4075_v60 = vrot.slane %v10670_v53, 3  ;;  %v9461_v14 = vld [vmem:[%s11455_s24 + $0x178] sm:$0xff]   ;;  %v9462_v18 = vld [vmem:[%s11455_s24 + $0x190] sm:$0xff]  }
 0x76f   :  { %8927 = vmatpush3.bf16.msra.mxu1 %v9452_v42  ;;  %v3786_v27 = vpack.c.bf16 %v3775_v58, %v3772_v2  ;;  %v4081_v13 = vpack.c.bf16 %v4070_v3, %v4067_v23  ;;  %v3960_v31 = vsel %vm368_vm4, %v3958_v34, %v3959_v22  ;;  %v4288_v42 = vrot.slane %v10675_v1, 5  ;;  %v9463_v22 = vld [vmem:[%s11455_s24 + $0x170] sm:$0xff]   ;;  %v9464_v23 = vld [vmem:[%s11455_s24 + $0x188] sm:$0xff]  }
 0x770   :  { %8928 = vmatprep.subr.bf16.mxu1 %v9454_v12  ;;  %v3971_v35 = vpack.c.bf16 %v3960_v31, %v3957_v29  ;;  %v4289_v44 = vrot.slane %v10681_v6, 5  ;;  %v3964_v50 = vrot.slane %v10667_v63, 2  ;;  %v3965_v55 = vrot.slane %v10670_v53, 2  ;;  %v9465_v3 = vld [vmem:[%s11455_s24 + $0x168] sm:$0xff]   ;;  %v9467_v29 = vld [vmem:[%s11455_s24 + $0x160] sm:$0xff]  }
 0x771   :  { %8898 = vmatprep.mubr.msk.bf16.mxu0 %vm233_vm2, %v3786_v27  ;;  %8934 = vmatprep.mubr.msk.bf16.mxu1 %vm233_vm2, %v4081_v13  ;;  %v4285_v54 = vrot.slane %v10651_v52, 5  ;;  %v4286_v56 = vrot.slane %v10658_v37, 5  ;;  %v4076_v0 = vsel %vm477_vm3, %v4074_v41, %v4075_v60  ;;  %v4178_v4 = vrot.slane %v10675_v1, 4 }
 0x772   :  { %8899 = vmatmul.mubr.msk.bf16.vlgmr.msra.gmra.mxu0 %vm233_vm2, %v3787_v26  ;;  %v4179_v5 = vrot.slane %v10681_v6, 4  ;;  %v4290_v8 = vsel %vm152_vm0, %v4288_v42, %v4289_v44  ;;  %v4175_v9 = vrot.slane %v10651_v52, 4  ;;  %v4176_v10 = vrot.slane %v10658_v37, 4  ;;  %v9466_v26 = vld [vmem:[%s11455_s24 + $0x180] sm:$0xff]   ;;  %v9470_v37 = vld [vmem:[%s11455_s24 + $0x1a8] sm:$0xff]  }
 0x773   :  { %8915 = vmatpush3.bf16.msra.mxu0 %v9453_v49  ;;  %8922 = vmatprep.mubr.msk.bf16.mxu0 %vm233_vm2, %v3971_v35  ;;  %v9459_v49 = vld [vmem:[%s11455_s24 + $0x120] sm:$0xff]   ;;  %v4082_v15 = vpack.c.bf16 %v4076_v0, %v4073_v19  ;;  %v4287_v16 = vsel %vm152_vm0, %v4285_v54, %v4286_v56  ;;  %v3966_v17 = vsel %vm368_vm4, %v3964_v50, %v3965_v55  ;;  %v4294_v27 = vrot.slane %v10667_v63, 5 }
 0x774   :  { %8929 = vmatpush3.bf16.msra.mxu1 %v9454_v12  ;;  %8916 = vmatprep.subr.bf16.mxu0 %v9455_v33  ;;  %v4301_v12 = vpack.c.bf16 %v4290_v8, %v4287_v16  ;;  %v4180_v45 = vsel %vm586_vm6, %v4178_v4, %v4179_v5  ;;  %v3963_v2 = vsel %vm368_vm4, %v3961_v48, %v3962_v7  ;;  %v4295_v13 = vrot.slane %v10670_v53, 5  ;;  %v9471_v0 = vld [vmem:[%s11455_s24 + $0x1a0] sm:$0xff]  }
 0x775   :  { %8930 = vmatprep.subr.bf16.mxu1 %v9456_v61  ;;  %v3972_v21 = vpack.c.bf16 %v3966_v17, %v3963_v2  ;;  %v4177_v34 = vsel %vm586_vm6, %v4175_v9, %v4176_v10  ;;  %v4292_v31 = vrot.slane %v10664_v62, 5  ;;  %v4184_v35 = vrot.slane %v10667_v63, 4  ;;  %v9472_v10 = vld [vmem:[#allocation2 + $0xb8] sm:$0xff]   ;;  %v9478_v16 = vld [vmem:[#allocation2 + $0xa0] sm:$0xff]  }
 0x776   :  { %v4191_v58 = vpack.c.bf16 %v4180_v45, %v4177_v34  ;;  %v4399_v41 = vrot.slane %v10681_v6, 6  ;;  %v4182_v60 = vrot.slane %v10664_v62, 4  ;;  %v4181_v42 = vrot.slane %v10661_v57, 4  ;;  %v9479_v17 = vld [vmem:[#allocation2 + $0xc0] sm:$0xff]  }
 0x777   :  { %8917 = vmatpush3.bf16.msra.mxu0 %v9455_v33  ;;  %v4291_v33 = vrot.slane %v10661_v57, 5  ;;  %v4404_v4 = vrot.slane %v10667_v63, 6  ;;  %v4405_v5 = vrot.slane %v10670_v53, 6  ;;  %v4402_v7 = vrot.slane %v10664_v62, 6  ;;  %v9473_v63 = vld [vmem:[#allocation2 + $0xd8] sm:$0xff]   ;;  %v9475_v62 = vld [vmem:[#allocation2 + $0xd0] sm:$0xff]  }
 0x778   :  { %8931 = vmatpush3.bf16.msra.mxu1 %v9456_v61  ;;  %8918 = vmatprep.subr.bf16.mxu0 %v9457_v39  ;;  %v4185_v61 = vrot.slane %v10670_v53, 4  ;;  %v4183_v55 = vsel %vm586_vm6, %v4181_v42, %v4182_v60  ;;  %v4401_v8 = vrot.slane %v10661_v57, 6  ;;  %v9476_v57 = vld [vmem:[#allocation2 + $0xa8] sm:$0xff]  }
 0x779   :  { %8932 = vmatprep.subr.bf16.mxu1 %v9458_v40  ;;  %v4293_v44 = vsel %vm152_vm0, %v4291_v33, %v4292_v31  ;;  %v4406_v48 = vsel %vm803_vm5, %v4404_v4, %v4405_v5  ;;  %v9477_v53 = vld [vmem:[#allocation2 + $0xc8] sm:$0xff]  }
 0x77a   :  { %v4186_v6 = vsel %vm586_vm6, %v4184_v35, %v4185_v61  ;;  %v4403_v19 = vsel %vm803_vm5, %v4401_v8, %v4402_v7 }
 0x77b   :  { %8919 = vmatpush3.bf16.msra.mxu0 %v9457_v39  ;;  %v4296_v39 = vsel %vm152_vm0, %v4294_v27, %v4295_v13  ;;  %v4412_v9 = vpack.c.bf16 %v4406_v48, %v4403_v19 }
 0x77c   :  { %8933 = vmatpush3.bf16.msra.mxu1 %v9458_v40  ;;  %8920 = vmatprep.subr.bf16.mxu0 %v9459_v49  ;;  %v4398_v40 = vrot.slane %v10675_v1, 6  ;;  %v4302_v1 = vpack.c.bf16 %v4296_v39, %v4293_v44 }
 0x77d   :  { %8950 = vmatprep.subr.bf16.mxu1 %v9460_v32 }
 0x77e   :  { %v4400_v50 = vsel %vm803_vm5, %v4398_v40, %v4399_v41 }
 0x77f   :  { %8921 = vmatpush3.bf16.msra.mxu0 %v9459_v49  ;;  %8935 = vmatmul.mubr.msk.bf16.vlgmr.msra.gmra.mxu1 %vm233_vm2, %v4082_v15  ;;  %v4395_v49 = vrot.slane %v10651_v52, 6  ;;  %v9469_v52 = vld [vmem:[%s11455_s24 + $0x1b0] sm:$0xff]  }
 0x780   :  { %8951 = vmatpush3.bf16.msra.mxu1 %v9460_v32  ;;  %8958 = vmatprep.mubr.msk.bf16.mxu1 %vm233_vm2, %v4301_v12  ;;  %v4192_v32 = vpack.c.bf16 %v4186_v6, %v4183_v55  ;;  %v9474_v15 = vld [vmem:[#allocation2 + $0xb0] sm:$0xff]  }
 0x781   :  { %8938 = vmatprep.subr.bf16.mxu0 %v9461_v14  ;;  %8952 = vmatprep.subr.bf16.mxu1 %v9462_v18  ;;  %v4397_v54 = vsel %vm803_vm5, %v4395_v49, %v4396_v47 }
 0x782   :  { %8923 = vmatmul.mubr.msk.bf16.vlgmr.msra.gmra.mxu0 %vm233_vm2, %v3972_v21  ;;  %v4411_v56 = vpack.c.bf16 %v4400_v50, %v4397_v54 }
 0x783   :  { %8939 = vmatpush3.bf16.msra.mxu0 %v9461_v14  ;;  %8946 = vmatprep.mubr.msk.bf16.mxu0 %vm233_vm2, %v4191_v58  ;;  %v10822_v14 = vld [vmem:[#allocation2 + $0x118] sm:$0xff]  }
 0x784   :  { %8953 = vmatpush3.bf16.msra.mxu1 %v9462_v18  ;;  %8940 = vmatprep.subr.bf16.mxu0 %v9463_v22  ;;  %v10825_v18 = vld [vmem:[#allocation2 + $0xf8] sm:$0xff]  }
 0x785   :  { %8954 = vmatprep.subr.bf16.mxu1 %v9464_v23 }
 0x787   :  { %8941 = vmatpush3.bf16.msra.mxu0 %v9463_v22 }
 0x788   :  { %8955 = vmatpush3.bf16.msra.mxu1 %v9464_v23  ;;  %8942 = vmatprep.subr.bf16.mxu0 %v9465_v3 }
 0x789   :  { %8956 = vmatprep.subr.bf16.mxu1 %v9466_v26 }
 0x78b   :  { %8943 = vmatpush3.bf16.msra.mxu0 %v9465_v3 }
 0x78c   :  { %8957 = vmatpush3.bf16.msra.mxu1 %v9466_v26  ;;  %8944 = vmatprep.subr.bf16.mxu0 %v9467_v29 }
 0x78d   :  { %8974 = vmatprep.subr.bf16.mxu1 %v9473_v63 }
 0x78f   :  { %8945 = vmatpush3.bf16.msra.mxu0 %v9467_v29  ;;  %8959 = vmatmul.mubr.msk.bf16.vlgmr.msra.gmra.mxu1 %vm233_vm2, %v4302_v1 }
 0x790   :  { %8962 = vmatprep.subr.bf16.mxu0 %v9468_v46  ;;  %8975 = vmatpush3.bf16.msra.mxu1 %v9473_v63 }
 0x791   :  { %8976 = vmatprep.subr.bf16.mxu1 %v9475_v62 }
 0x792   :  { %8947 = vmatmul.mubr.msk.bf16.vlgmr.msra.gmra.mxu0 %vm233_vm2, %v4192_v32 }
 0x793   :  { %8963 = vmatpush3.bf16.msra.mxu0 %v9468_v46  ;;  %8970 = vmatprep.mubr.msk.bf16.mxu0 %vm233_vm2, %v4411_v56 }
 0x794   :  { %8964 = vmatprep.subr.bf16.mxu0 %v9469_v52  ;;  %8977 = vmatpush3.bf16.msra.mxu1 %v9475_v62 }
 0x795   :  { %8978 = vmatprep.subr.bf16.mxu1 %v9477_v53 }
 0x797   :  { %8965 = vmatpush3.bf16.msra.mxu0 %v9469_v52 }
 0x798   :  { %8966 = vmatprep.subr.bf16.mxu0 %v9470_v37  ;;  %8979 = vmatpush3.bf16.msra.mxu1 %v9477_v53 }
 0x799   :  { %8980 = vmatprep.subr.bf16.mxu1 %v9479_v17 }
 0x79b   :  { %8967 = vmatpush3.bf16.msra.mxu0 %v9470_v37 }
 0x79c   :  { %8968 = vmatprep.subr.bf16.mxu0 %v9471_v0  ;;  %8981 = vmatpush3.bf16.msra.mxu1 %v9479_v17 }
 0x79d   :  { %8998 = vmatprep.subr.bf16.mxu1 %v10825_v18 }
 0x79f   :  { %8969 = vmatpush3.bf16.msra.mxu0 %v9471_v0 }
 0x7a0   :  { %8986 = vmatprep.subr.bf16.mxu0 %v9472_v10 }
 0x7a2   :  { %8971 = vmatmul.mubr.msk.bf16.vlgmr.msra.gmra.mxu0 %vm233_vm2, %v4412_v9 }
 0x7a3   :  { %8987 = vmatpush3.bf16.msra.mxu0 %v9472_v10 }
 0x7a4   :  { %8988 = vmatprep.subr.bf16.mxu0 %v9474_v15 }
 0x7a7   :  { %8989 = vmatpush3.bf16.msra.mxu0 %v9474_v15 }
 0x7a8   :  { %8990 = vmatprep.subr.bf16.mxu0 %v9476_v57 }
 0x7ab   :  { %8991 = vmatpush3.bf16.msra.mxu0 %v9476_v57 }
 0x7ac   :  { %8992 = vmatprep.subr.bf16.mxu0 %v9478_v16 }
 0x7af   :  { %8993 = vmatpush3.bf16.msra.mxu0 %v9478_v16 }
 0x7b0   :  { %9010 = vmatprep.subr.bf16.mxu0 %v10822_v14 }
 0x82e   :  { %v8912_v21 = vpop.f32.mrf.mxu1 }
 0x830   :  { %v3940_v22 = vpop.f32.mrf.mxu1 }
 0x832   :  { %v8900_v12 = vpop.f32.mrf.mxu0  ;;  %v8913_v23 = vpop.f32.mrf.mxu1 }
 0x833   :  { %v3949_v35 = vadd.f32 %v8912_v21, %v8900_v12 }
 0x834   :  { %v3861_v45 = vpop.f32.mrf.mxu0  ;;  %v3943_v26 = vpop.f32.mrf.mxu1 }
 0x835   :  { %v3941_v61 = vadd.f32 %v3940_v22, %v3861_v45 }
 0x836   :  { %v8901_v2 = vpop.f32.mrf.mxu0 }
 0x837   :  { %v3952_v42 = vadd.f32 %v8913_v23, %v8901_v2 }
 0x838   :  { %v3864_v34 = vpop.f32.mrf.mxu0 }
 0x839   :  { %v3944_v50 = vadd.f32 %v3943_v26, %v3864_v34 }
 0x83f   :  { %v8936_v13 = vpop.f32.mrf.mxu1 }
 0x841   :  { %v4156_v29 = vpop.f32.mrf.mxu1 }
 0x842   :  { %v8924_v58 = vpop.f32.mrf.mxu0 }
 0x843   :  { %v8937_v39 = vpop.f32.mrf.mxu1  ;;  %v4063_v41 = vadd.f32 %v8924_v58, %v3949_v35 }
 0x844   :  { %v4046_v3 = vpop.f32.mrf.mxu0 }
 0x845   :  { %v4061_v60 = vadd.f32 %v4046_v3, %v3941_v61  ;;  %v4159_v44 = vpop.f32.mrf.mxu1  ;;  %v4173_v1 = vadd.f32 %v8936_v13, %v4063_v41 }
 0x846   :  { %v8925_v27 = vpop.f32.mrf.mxu0 }
 0x847   :  { %v4064_v49 = vadd.f32 %v8925_v27, %v3952_v42  ;;  %v4171_v6 = vadd.f32 %v4156_v29, %v4061_v60 }
 0x848   :  { %v4049_v31 = vpop.f32.mrf.mxu0 }
 0x849   :  { %v4062_v52 = vadd.f32 %v4049_v31, %v3944_v50  ;;  %v4174_v56 = vadd.f32 %v8937_v39, %v4064_v49 }
 0x84b   :  { %v4172_v48 = vadd.f32 %v4159_v44, %v4062_v52 }
 0x84f   :  { %v8960_v47 = vpop.f32.mrf.mxu1 }
 0x851   :  { %v4376_v37 = vpop.f32.mrf.mxu1 }
 0x852   :  { %v8948_v33 = vpop.f32.mrf.mxu0 }
 0x853   :  { %v4283_v55 = vadd.f32 %v8948_v33, %v4173_v1  ;;  %v8961_v19 = vpop.f32.mrf.mxu1 }
 0x854   :  { %v4266_v40 = vpop.f32.mrf.mxu0 }
 0x855   :  { %v4281_v32 = vadd.f32 %v4266_v40, %v4171_v6  ;;  %v4393_v5 = vadd.f32 %v8960_v47, %v4283_v55  ;;  %v4379_v53 = vpop.f32.mrf.mxu1 }
 0x856   :  { %v8949_v46 = vpop.f32.mrf.mxu0 }
 0x857   :  { %v4284_v4 = vadd.f32 %v8949_v46, %v4174_v56  ;;  %v4391_v7 = vadd.f32 %v4376_v37, %v4281_v32 }
 0x858   :  { %v4269_v54 = vpop.f32.mrf.mxu0 }
 0x859   :  { %v4282_v15 = vadd.f32 %v4269_v54, %v4172_v48  ;;  %v4394_v62 = vadd.f32 %v8961_v19, %v4284_v4 }
 0x85b   :  { %v4392_v45 = vadd.f32 %v4379_v53, %v4282_v15  ;;  %v9484_v15 = vld [vmem:[#allocation2 + $0x108] sm:$0xff]  }
 0x862   :  { %v8972_v0 = vpop.f32.mrf.mxu0 }
 0x863   :  { %v4503_v9 = vadd.f32 %v8972_v0, %v4393_v5 }
 0x864   :  { %v4486_v8 = vpop.f32.mrf.mxu0 }
 0x865   :  { %v4501_v10 = vadd.f32 %v4486_v8, %v4391_v7  ;;  %v4511_v16 = vrot.slane %v4503_v9, 6  ;;  %v9482_v7 = vld [vmem:[#allocation2 + $0x110] sm:$0xff]  }
 0x866   :  { %v8973_v63 = vpop.f32.mrf.mxu0  ;;  %v9483_v9 = vld [vmem:[#allocation2 + $0xf0] sm:$0xff]  }
 0x867   :  { %v4504_v57 = vadd.f32 %v8973_v63, %v4394_v62  ;;  %v4509_v17 = vrot.slane %v4501_v10, 6  ;;  %v10829_v34 = vsel %vm803_vm5, 0.0, %v4511_v16  ;;  %v10832_v22 = vsel %vm803_vm5, %v4511_v16, 0.0  ;;  %v9485_v62 = vld [vmem:[#allocation2 + $0xe8] sm:$0xff]   ;;  %v9487_v16 = vld [vmem:[#allocation2 + $0xe0] sm:$0xff]  }
 0x868   :  { %v4489_v12 = vpop.f32.mrf.mxu0  ;;  %v4550_v13 = vrot.slane %v10829_v34, 1  ;;  %v4551_v31 = vrot.slane %v10832_v22, 1 }
 0x869   :  { %v4512_v2 = vrot.slane %v4504_v57, 6  ;;  %v4502_v21 = vadd.f32 %v4489_v12, %v4392_v45  ;;  %v10835_v58 = vsel %vm803_vm5, 0.0, %v4509_v17  ;;  %v10838_v23 = vsel %vm803_vm5, %v4509_v17, 0.0 }
 0x86a   :  { %v4544_v35 = vrot.slane %v10835_v58, 1  ;;  %v4545_v61 = vrot.slane %v10838_v23, 1  ;;  %v4839_v41 = vrot.slane %v10835_v58, 3  ;;  %v4840_v60 = vrot.slane %v10838_v23, 3 }
 0x86b   :  { %v10841_v3 = vsel %vm803_vm5, 0.0, %v4512_v2  ;;  %v10844_v26 = vsel %vm803_vm5, %v4512_v2, 0.0  ;;  %v4510_v27 = vrot.slane %v4502_v21, 6  ;;  %v4729_v46 = vrot.slane %v10835_v58, 2 }
 0x86c   :  { %v4553_v29 = vrot.slane %v10841_v3, 1  ;;  %v4554_v33 = vrot.slane %v10844_v26, 1  ;;  %v4730_v6 = vrot.slane %v10838_v23, 2  ;;  %v4552_v54 = vsel %vm183_vm1, %v4550_v13, %v4551_v31 }
 0x86d   :  { %v10853_v39 = vsel %vm803_vm5, 0.0, %v4510_v27  ;;  %v10856_v40 = vsel %vm803_vm5, %v4510_v27, 0.0  ;;  %v4526_v52 = vpack.c.bf16 %v10841_v3, %v10829_v34  ;;  %v4546_v56 = vsel %vm183_vm1, %v4544_v35, %v4545_v61  ;;  %v9488_v35 = vld [vmem:[#allocation2 + $0x138] sm:$0xff]  }
 0x86e   :  { %v4547_v42 = vrot.slane %v10853_v39, 1  ;;  %v4548_v44 = vrot.slane %v10856_v40, 1  ;;  %v4732_v49 = vrot.slane %v10853_v39, 2  ;;  %v4733_v47 = vrot.slane %v10856_v40, 2 }
 0x86f   :  { %v4842_v1 = vrot.slane %v10853_v39, 3  ;;  %v4555_v50 = vsel %vm183_vm1, %v4553_v29, %v4554_v33  ;;  %v4843_v55 = vrot.slane %v10856_v40, 3  ;;  %v4525_v32 = vpack.c.bf16 %v10853_v39, %v10835_v58 }
 0x870   :  { %v4549_v37 = vsel %vm183_vm1, %v4547_v42, %v4548_v44  ;;  %v4841_v4 = vsel %vm477_vm3, %v4839_v41, %v4840_v60  ;;  %v4734_v8 = vsel %vm368_vm4, %v4732_v49, %v4733_v47  ;;  %v4561_v19 = vpack.c.bf16 %v4555_v50, %v4552_v54  ;;  %v9491_v49 = vld [vmem:[#allocation2 + $0x120] sm:$0xff]  }
 0x871   :  { %8994 = vmatprep.mubr.msk.bf16.mxu0 %vm233_vm2, %v4525_v32  ;;  %v4560_v0 = vpack.c.bf16 %v4549_v37, %v4546_v56  ;;  %v4844_v5 = vsel %vm477_vm3, %v4842_v1, %v4843_v55  ;;  %v4731_v10 = vsel %vm368_vm4, %v4729_v46, %v4730_v6  ;;  %v4848_v57 = vrot.slane %v10841_v3, 3  ;;  %v9490_v46 = vld [vmem:[#allocation2 + $0x128] sm:$0xff]   ;;  %v9494_v56 = vld [vmem:[#allocation5 + $0x70] sm:$0xff]   ;;  %v9498_v37 = vld [vmem:[#allocation5 + $0x60] sm:$0xff]  }
 0x872   :  { %8995 = vmatmul.mubr.msk.bf16.vlgmr.msra.gmra.mxu0 %vm233_vm2, %v4526_v52  ;;  %v4855_v48 = vpack.c.bf16 %v4844_v5, %v4841_v4  ;;  %v4745_v63 = vpack.c.bf16 %v4734_v8, %v4731_v10  ;;  %v4849_v53 = vrot.slane %v10844_v26, 3  ;;  %v4845_v17 = vrot.slane %v10829_v34, 3  ;;  %v9492_v52 = vld [vmem:[#allocation5 + $0x78] sm:$0xff]  }
 0x873   :  { %9011 = vmatpush3.bf16.msra.mxu0 %v10822_v14  ;;  %8982 = vmatprep.mubr.msk.bf16.mxu1 %vm233_vm2, %v4560_v0  ;;  %v9486_v14 = vld [vmem:[#allocation2 + $0x100] sm:$0xff]   ;;  %v4846_v12 = vrot.slane %v10832_v22, 3  ;;  %v4739_v45 = vrot.slane %v10844_v26, 2  ;;  %v4952_v2 = vrot.slane %v10853_v39, 4  ;;  %v4953_v21 = vrot.slane %v10856_v40, 4  ;;  %v10919_v4 = vld [vmem:[%s11423_s8 + $0x38] sm:$0xff]  }
 0x874   :  { %9018 = vmatprep.mubr.msk.bf16.mxu0 %vm233_vm2, %v4855_v48  ;;  %8983 = vmatmul.mubr.msk.bf16.vlgmr.msra.gmra.mxu1 %vm233_vm2, %v4561_v19  ;;  %v4735_v27 = vrot.slane %v10829_v34, 2  ;;  %v4736_v13 = vrot.slane %v10832_v22, 2  ;;  %v4850_v31 = vsel %vm477_vm3, %v4848_v57, %v4849_v53  ;;  %v4949_v29 = vrot.slane %v10835_v58, 4  ;;  %v9499_v0 = vld [vmem:[#allocation5 + $0x80] sm:$0xff]   ;;  %v10922_v5 = vld [vmem:[#allocation5 + $0xb8] sm:$0xff]  }
 0x875   :  { %8999 = vmatpush3.bf16.msra.mxu1 %v10825_v18  ;;  %9012 = vmatprep.subr.bf16.mxu0 %v9482_v7  ;;  %v4738_v18 = vrot.slane %v10841_v3, 2  ;;  %v4950_v33 = vrot.slane %v10838_v23, 4  ;;  %v4847_v61 = vsel %vm477_vm3, %v4845_v17, %v4846_v12  ;;  %v4954_v41 = vsel %vm586_vm6, %v4952_v2, %v4953_v21  ;;  %v9489_v23 = vld [vmem:[#allocation2 + $0x130] sm:$0xff]  }
 0x876   :  { %9006 = vmatprep.mubr.msk.bf16.mxu1 %vm233_vm2, %v4745_v63  ;;  %9000 = vmatprep.subr.bf16.mxu1 %v9483_v9  ;;  %v4856_v40 = vpack.c.bf16 %v4850_v31, %v4847_v61  ;;  %v4737_v60 = vsel %vm368_vm4, %v4735_v27, %v4736_v13  ;;  %v4958_v47 = vrot.slane %v10841_v3, 4  ;;  %v4959_v1 = vrot.slane %v10844_v26, 4  ;;  %v9493_v3 = vld [vmem:[#allocation5 + $0x98] sm:$0xff]   ;;  %v9497_v26 = vld [vmem:[#allocation5 + $0x88] sm:$0xff]  }
 0x877   :  { %9013 = vmatpush3.bf16.msra.mxu0 %v9482_v7  ;;  %v4740_v39 = vsel %vm368_vm4, %v4738_v18, %v4739_v45  ;;  %v4951_v58 = vsel %vm586_vm6, %v4949_v29, %v4950_v33  ;;  %v4955_v6 = vrot.slane %v10829_v34, 4  ;;  %v4956_v50 = vrot.slane %v10832_v22, 4  ;;  %v9495_v34 = vld [vmem:[#allocation5 + $0x90] sm:$0xff]   ;;  %v9496_v22 = vld [vmem:[#allocation5 + $0x68] sm:$0xff]  }
 0x878   :  { %9014 = vmatprep.subr.bf16.mxu0 %v9484_v15  ;;  %v4746_v42 = vpack.c.bf16 %v4740_v39, %v4737_v60  ;;  %v4965_v44 = vpack.c.bf16 %v4954_v41, %v4951_v58  ;;  %v4960_v55 = vsel %vm586_vm6, %v4958_v47, %v4959_v1 }
 0x879   :  { %9001 = vmatpush3.bf16.msra.mxu1 %v9483_v9  ;;  %v4957_v32 = vsel %vm586_vm6, %v4955_v6, %v4956_v50  ;;  %vm11020_vm6 = vmpackc.low %vm10377_vm12, %vm10377_vm12 }
 0x87a   :  { %9002 = vmatprep.subr.bf16.mxu1 %v9485_v62  ;;  %v4966_v54 = vpack.c.bf16 %v4960_v55, %v4957_v32 }
 0x87b   :  { %9015 = vmatpush3.bf16.msra.mxu0 %v9484_v15 }
 0x87c   :  { %9016 = vmatprep.subr.bf16.mxu0 %v9486_v14 }
 0x87d   :  { %9003 = vmatpush3.bf16.msra.mxu1 %v9485_v62 }
 0x87e   :  { %9004 = vmatprep.subr.bf16.mxu1 %v9487_v16 }
 0x87f   :  { %9017 = vmatpush3.bf16.msra.mxu0 %v9486_v14 }
 0x880   :  { %9034 = vmatprep.subr.bf16.mxu0 %v9493_v3 }
 0x881   :  { %9005 = vmatpush3.bf16.msra.mxu1 %v9487_v16 }
 0x882   :  { %9019 = vmatmul.mubr.msk.bf16.vlgmr.msra.gmra.mxu0 %vm233_vm2, %v4856_v40  ;;  %9022 = vmatprep.subr.bf16.mxu1 %v9488_v35 }
 0x883   :  { %9035 = vmatpush3.bf16.msra.mxu0 %v9493_v3 }
 0x884   :  { %9007 = vmatmul.mubr.msk.bf16.vlgmr.msra.gmra.mxu1 %vm233_vm2, %v4746_v42  ;;  %9036 = vmatprep.subr.bf16.mxu0 %v9495_v34 }
 0x885   :  { %9023 = vmatpush3.bf16.msra.mxu1 %v9488_v35  ;;  %9030 = vmatprep.mubr.msk.bf16.mxu1 %vm233_vm2, %v4965_v44 }
 0x886   :  { %9024 = vmatprep.subr.bf16.mxu1 %v9489_v23 }
 0x887   :  { %9037 = vmatpush3.bf16.msra.mxu0 %v9495_v34 }
 0x888   :  { %9038 = vmatprep.subr.bf16.mxu0 %v9497_v26 }
 0x889   :  { %9025 = vmatpush3.bf16.msra.mxu1 %v9489_v23 }
 0x88a   :  { %9026 = vmatprep.subr.bf16.mxu1 %v9490_v46 }
 0x88b   :  { %9039 = vmatpush3.bf16.msra.mxu0 %v9497_v26 }
 0x88c   :  { %9040 = vmatprep.subr.bf16.mxu0 %v9499_v0 }
 0x88d   :  { %9027 = vmatpush3.bf16.msra.mxu1 %v9490_v46 }
 0x88e   :  { %9028 = vmatprep.subr.bf16.mxu1 %v9491_v49 }
 0x88f   :  { %9041 = vmatpush3.bf16.msra.mxu0 %v9499_v0 }
 0x890   :  { %9058 = vmatprep.subr.bf16.mxu0 %v10922_v5 }
 0x891   :  { %9029 = vmatpush3.bf16.msra.mxu1 %v9491_v49 }
 0x892   :  { %9046 = vmatprep.subr.bf16.mxu1 %v9492_v52 }
 0x894   :  { %9031 = vmatmul.mubr.msk.bf16.vlgmr.msra.gmra.mxu1 %vm233_vm2, %v4966_v54 }
 0x895   :  { %9047 = vmatpush3.bf16.msra.mxu1 %v9492_v52 }
 0x896   :  { %9048 = vmatprep.subr.bf16.mxu1 %v9494_v56 }
 0x899   :  { %9049 = vmatpush3.bf16.msra.mxu1 %v9494_v56 }
 0x89a   :  { %9050 = vmatprep.subr.bf16.mxu1 %v9496_v22 }
 0x89d   :  { %9051 = vmatpush3.bf16.msra.mxu1 %v9496_v22 }
 0x89e   :  { %9052 = vmatprep.subr.bf16.mxu1 %v9498_v37 }
 0x8a1   :  { %9053 = vmatpush3.bf16.msra.mxu1 %v9498_v37 }
 0x8a2   :  { %9070 = vmatprep.subr.bf16.mxu1 %v10919_v4 }
 0x932   :  { %v8996_v48 = vpop.f32.mrf.mxu0 }
 0x934   :  { %v8984_v7 = vpop.f32.mrf.mxu1  ;;  %v4714_v9 = vpop.f32.mrf.mxu0 }
 0x935   :  { %v4723_v53 = vadd.f32 %v8996_v48, %v8984_v7 }
 0x936   :  { %v4635_v8 = vpop.f32.mrf.mxu1  ;;  %v8997_v63 = vpop.f32.mrf.mxu0 }
 0x937   :  { %v4715_v17 = vadd.f32 %v4714_v9, %v4635_v8 }
 0x938   :  { %v8985_v19 = vpop.f32.mrf.mxu1  ;;  %v4717_v62 = vpop.f32.mrf.mxu0 }
 0x939   :  { %v4726_v45 = vadd.f32 %v8997_v63, %v8985_v19 }
 0x93a   :  { %v4638_v10 = vpop.f32.mrf.mxu1 }
 0x93b   :  { %v4718_v27 = vadd.f32 %v4717_v62, %v4638_v10 }
 0x942   :  { %v9020_v57 = vpop.f32.mrf.mxu0 }
 0x944   :  { %v9008_v15 = vpop.f32.mrf.mxu1  ;;  %v4930_v18 = vpop.f32.mrf.mxu0 }
 0x945   :  { %v4837_v12 = vadd.f32 %v9008_v15, %v4723_v53 }
 0x946   :  { %v4820_v14 = vpop.f32.mrf.mxu1  ;;  %v9021_v29 = vpop.f32.mrf.mxu0 }
 0x947   :  { %v4835_v2 = vadd.f32 %v4820_v14, %v4715_v17  ;;  %v4947_v31 = vadd.f32 %v9020_v57, %v4837_v12  ;;  %v5393_v17 = vpack.c.bf16 %v9243_v20, %v10622_v38  ;;  %v9503_v20 = vld [vmem:[#allocation5 + $0xb0] sm:$0xff]  }
 0x948   :  { %v9009_v16 = vpop.f32.mrf.mxu1  ;;  %v4933_v42 = vpop.f32.mrf.mxu0 }
 0x949   :  { %v4838_v13 = vadd.f32 %v9009_v16, %v4726_v45  ;;  %v4945_v39 = vadd.f32 %v4930_v18, %v4835_v2  ;;  %v9502_v16 = vld [vmem:[%s11423_s8 + $0x30] sm:$0xff]  }
 0x94a   :  { %v4823_v21 = vpop.f32.mrf.mxu1 }
 0x94b   :  { %v4836_v35 = vadd.f32 %v4823_v21, %v4718_v27  ;;  %v4948_v60 = vadd.f32 %v9021_v29, %v4838_v13  ;;  %v9506_v29 = vld [vmem:[%s11423_s8 + $0x20] sm:$0xff]  }
 0x94d   :  { %v4946_v49 = vadd.f32 %v4933_v42, %v4836_v35 }
 0x954   :  { %v9032_v33 = vpop.f32.mrf.mxu1 }
 0x955   :  { %v5057_v61 = vadd.f32 %v9032_v33, %v4947_v31  ;;  %v9504_v31 = vld [vmem:[%s11423_s8 + $0x28] sm:$0xff]   ;;  %v9507_v33 = vld [vmem:[#allocation5 + $0xa0] sm:$0xff]  }
 0x956   :  { %v5040_v40 = vpop.f32.mrf.mxu1 }
 0x957   :  { %v5055_v41 = vadd.f32 %v5040_v40, %v4945_v39  ;;  %v5065_v58 = vrot.slane %v5057_v61, 7  ;;  %v5394_v40 = vpack.c.bf16 %v9244_v36, %v10633_v28  ;;  %v9512_v28 = vld [vmem:[#allocation7 + $0x68] sm:$0xff]  }
 0x958   :  { %v9033_v23 = vpop.f32.mrf.mxu1  ;;  %v9513_v36 = vld [vmem:[#allocation7 + $0x88] sm:$0xff]  }
 0x959   :  { %v5063_v44 = vrot.slane %v5055_v41, 7  ;;  %v5058_v46 = vadd.f32 %v9033_v23, %v4948_v60  ;;  %v10926_v50 = vsel %vm1457_vm7, 0.0, %v5065_v58  ;;  %v5077_v3 = vsel %vm1457_vm7, %v5065_v58, 0.0  ;;  %v9508_v58 = vld [vmem:[#allocation7 + $0x78] sm:$0xff]  }
 0x95a   :  { %v5043_v47 = vpop.f32.mrf.mxu1  ;;  %v5104_v26 = vrot.slane %v10926_v50, 1  ;;  %v5105_v7 = vrot.slane %v5077_v3, 1  ;;  %v5289_v39 = vrot.slane %v10926_v50, 2  ;;  %v9509_v23 = vld [vmem:[#allocation7 + $0x98] sm:$0xff]  }
 0x95b   :  { %v5066_v1 = vrot.slane %v5058_v46, 7  ;;  %v5056_v6 = vadd.f32 %v5043_v47, %v4946_v49  ;;  %v5071_v55 = vsel %vm1457_vm7, 0.0, %v5063_v44  ;;  %v5075_v32 = vsel %vm1457_vm7, %v5063_v44, 0.0  ;;  %v9510_v44 = vld [vmem:[#allocation7 + $0x70] sm:$0xff]   ;;  %v9514_v46 = vld [vmem:[#allocation7 + $0x60] sm:$0xff]   ;;  %v10971_v47 = vld [vmem:[#allocation7 + $0xb8] sm:$0xff]  }
 0x95c   :  { %v5098_v37 = vrot.slane %v5071_v55, 1  ;;  %v5099_v0 = vrot.slane %v5075_v32, 1  ;;  %v5283_v8 = vrot.slane %v5071_v55, 2  ;;  %v5284_v9 = vrot.slane %v5075_v32, 2  ;;  %v9515_v49 = vld [vmem:[#allocation7 + $0x80] sm:$0xff]  }
 0x95d   :  { %v5074_v54 = vsel %vm1457_vm7, 0.0, %v5066_v1  ;;  %v5078_v52 = vsel %vm1457_vm7, %v5066_v1, 0.0  ;;  %v5064_v22 = vrot.slane %v5056_v6, 7  ;;  %v5106_v45 = vsel %vm183_vm1, %v5104_v26, %v5105_v7 }
 0x95e   :  { %v5107_v56 = vrot.slane %v5074_v54, 1  ;;  %v5108_v34 = vrot.slane %v5078_v52, 1  ;;  %v5080_v62 = vpack.c.bf16 %v5074_v54, %v10926_v50  ;;  %v5100_v12 = vsel %vm183_vm1, %v5098_v37, %v5099_v0 }
 0x95f   :  { %v5072_v48 = vsel %vm1457_vm7, 0.0, %v5064_v22  ;;  %v5076_v19 = vsel %vm1457_vm7, %v5064_v22, 0.0  ;;  %v5285_v38 = vsel %vm368_vm4, %v5283_v8, %v5284_v9  ;;  %v5292_v35 = vrot.slane %v5074_v54, 2 }
 0x960   :  { %v5079_v10 = vpack.c.bf16 %v5072_v48, %v5071_v55  ;;  %v5101_v63 = vrot.slane %v5072_v48, 1  ;;  %v5102_v15 = vrot.slane %v5076_v19, 1  ;;  %v5109_v14 = vsel %vm183_vm1, %v5107_v56, %v5108_v34  ;;  %v8003_v34 = vld [vmem:[%s11425_s10 + $0x1] ss:$0 sm:$0xff] }
 0x961   :  { %v5286_v57 = vrot.slane %v5072_v48, 2  ;;  %v5287_v53 = vrot.slane %v5076_v19, 2  ;;  %v5115_v27 = vpack.c.bf16 %v5109_v14, %v5106_v45  ;;  %v5293_v61 = vrot.slane %v5078_v52, 2 }
 0x962   :  { %9054 = vmatprep.mubr.msk.bf16.mxu1 %vm233_vm2, %v5079_v10  ;;  %v5103_v18 = vsel %vm183_vm1, %v5101_v63, %v5102_v15 }
 0x963   :  { %9055 = vmatmul.mubr.msk.bf16.vlgmr.msra.gmra.mxu1 %vm233_vm2, %v5080_v62  ;;  %v5114_v2 = vpack.c.bf16 %v5103_v18, %v5100_v12  ;;  %v5288_v21 = vsel %vm368_vm4, %v5286_v57, %v5287_v53  ;;  %v5294_v41 = vsel %vm368_vm4, %v5292_v35, %v5293_v61 }
 0x964   :  { %9071 = vmatpush3.bf16.msra.mxu1 %v10919_v4  ;;  %9078 = vmatprep.mubr.msk.bf16.mxu1 %vm233_vm2, %v5393_v17  ;;  %v5299_v13 = vpack.c.bf16 %v5288_v21, %v5285_v38  ;;  %v9505_v4 = vld [vmem:[#allocation5 + $0xa8] sm:$0xff]  }
 0x965   :  { %9042 = vmatprep.mubr.msk.bf16.mxu0 %vm233_vm2, %v5114_v2  ;;  %9072 = vmatprep.subr.bf16.mxu1 %v9502_v16 }
 0x966   :  { %9043 = vmatmul.mubr.msk.bf16.vlgmr.msra.gmra.mxu0 %vm233_vm2, %v5115_v27 }
 0x967   :  { %9059 = vmatpush3.bf16.msra.mxu0 %v10922_v5  ;;  %9066 = vmatprep.mubr.msk.bf16.mxu0 %vm233_vm2, %v5299_v13  ;;  %v5290_v5 = vrot.slane %v5077_v3, 2  ;;  %v8001_v3 = vld [vmem:[%s11424_s9 + $0x1] ss:$0 sm:$0xff]  ;;  %s9839_s9 = smov [#allocation11]  }
 0x968   :  { %9073 = vmatpush3.bf16.msra.mxu1 %v9502_v16  ;;  %9060 = vmatprep.subr.bf16.mxu0 %v9503_v20  ;;  %s7513_s10 = sshll.u32 %s9839_s9, 4  ;;  %s7514_s10 = int_to_ptr.vmem [resolvable:$true] %s7513_s10 }
 0x969   :  { %9074 = vmatprep.subr.bf16.mxu1 %v9504_v31  ;;  %v5291_v60 = vsel %vm368_vm4, %v5289_v39, %v5290_v5  ;;  %s9776_s4 = scalar_lea.vmem %s7514_s10, 32  ;;  %p9781_p12 = scmp.lt.s32.totalorder %s7514_s10, %s7514_s10 }
 0x96a   :  { %v5300_v42 = vpack.c.bf16 %v5294_v41, %v5291_v60  ;;  %p9777_p11 = scmp.ne.s32.totalorder %s7514_s10, %s9776_s4  ;;  %p9782_p13 = scmp.lt.s32.totalorder %s9776_s4, %s9776_s4 }
 0x96b   :  { %9061 = vmatpush3.bf16.msra.mxu0 %v9503_v20 }
 0x96c   :  { %9075 = vmatpush3.bf16.msra.mxu1 %v9504_v31  ;;  %9062 = vmatprep.subr.bf16.mxu0 %v9505_v4  ;;  %p9783_p0 = por %p9782_p13, %p9781_p12 }
 0x96d   :  { %9076 = vmatprep.subr.bf16.mxu1 %v9506_v29 }
 0x96e   :  { %p9784_p1 = pnand %p9783_p0, %p9777_p11 }
 0x96f   :  { %9063 = vmatpush3.bf16.msra.mxu0 %v9505_v4 }
 0x970   :  { %9077 = vmatpush3.bf16.msra.mxu1 %v9506_v29  ;;  %9064 = vmatprep.subr.bf16.mxu0 %v9507_v33 }
 0x971   :  { %9094 = vmatprep.subr.bf16.mxu1 %v9508_v58 }
 0x973   :  { %9065 = vmatpush3.bf16.msra.mxu0 %v9507_v33  ;;  %9079 = vmatmul.mubr.msk.bf16.vlgmr.msra.gmra.mxu1 %vm233_vm2, %v5394_v40 }
 0x974   :  { %9095 = vmatpush3.bf16.msra.mxu1 %v9508_v58  ;;  %9082 = vmatprep.subr.bf16.mxu0 %v9509_v23 }
 0x975   :  { %9096 = vmatprep.subr.bf16.mxu1 %v9510_v44 }
 0x976   :  { %9067 = vmatmul.mubr.msk.bf16.vlgmr.msra.gmra.mxu0 %vm233_vm2, %v5300_v42 }
 0x977   :  { %9083 = vmatpush3.bf16.msra.mxu0 %v9509_v23 }
 0x978   :  { %9097 = vmatpush3.bf16.msra.mxu1 %v9510_v44  ;;  %9084 = vmatprep.subr.bf16.mxu0 %v9511_v51 }
 0x979   :  { %9098 = vmatprep.subr.bf16.mxu1 %v9512_v28 }
 0x97b   :  { %9085 = vmatpush3.bf16.msra.mxu0 %v9511_v51 }
 0x97c   :  { %9099 = vmatpush3.bf16.msra.mxu1 %v9512_v28  ;;  %9086 = vmatprep.subr.bf16.mxu0 %v9513_v36 }
 0x97d   :  { %9100 = vmatprep.subr.bf16.mxu1 %v9514_v46 }
 0x97f   :  { %9087 = vmatpush3.bf16.msra.mxu0 %v9513_v36 }
 0x980   :  { %9101 = vmatpush3.bf16.msra.mxu1 %v9514_v46  ;;  %9088 = vmatprep.subr.bf16.mxu0 %v9515_v49 }
 0x983   :  { %9089 = vmatpush3.bf16.msra.mxu0 %v9515_v49 }
 0x984   :  { %9106 = vmatprep.subr.bf16.mxu0 %v10971_v47 }
 0xa23   :  { %v9056_v1 = vpop.f32.mrf.mxu1 }
 0xa25   :  { %v5268_v50 = vpop.f32.mrf.mxu1 }
 0xa26   :  { %v9044_v6 = vpop.f32.mrf.mxu0 }
 0xa27   :  { %v9057_v32 = vpop.f32.mrf.mxu1  ;;  %v5277_v37 = vadd.f32 %v9056_v1, %v9044_v6 }
 0xa28   :  { %v5189_v55 = vpop.f32.mrf.mxu0 }
 0xa29   :  { %v5271_v52 = vpop.f32.mrf.mxu1  ;;  %v5269_v19 = vadd.f32 %v5268_v50, %v5189_v55 }
 0xa2a   :  { %v9045_v54 = vpop.f32.mrf.mxu0 }
 0xa2b   :  { %v5280_v14 = vadd.f32 %v9057_v32, %v9045_v54 }
 0xa2c   :  { %v5192_v22 = vpop.f32.mrf.mxu0 }
 0xa2d   :  { %v5272_v45 = vadd.f32 %v5271_v52, %v5192_v22 }
 0xa33   :  { %v9080_v56 = vpop.f32.mrf.mxu1 }
 0xa34   :  { %v5493_v26 = vmul.f32 %v9080_v56, %v8001_v3 }
 0xa35   :  { %v5468_v0 = vpop.f32.mrf.mxu1 }
 0xa36   :  { %v5505_v7 = vadd.f32 %v8003_v34, %v5493_v26  ;;  %v5491_v8 = vmul.f32 %v8001_v3, %v5468_v0  ;;  %v9068_v48 = vpop.f32.mrf.mxu0 }
 0xa37   :  { %v5391_v9 = vadd.f32 %v9068_v48, %v5277_v37  ;;  %v9081_v10 = vpop.f32.mrf.mxu1 }
 0xa38   :  { %v5503_v63 = vadd.f32 %v8003_v34, %v5491_v8  ;;  %v5494_v15 = vmul.f32 %v9081_v10, %v8001_v3  ;;  %v5374_v62 = vpop.f32.mrf.mxu0  ;;  %v9517_v10 = vld [vmem:[#allocation7 + $0xb0] sm:$0xff]  }
 0xa39   :  { %v5509_v57 = vadd.f32 %v5505_v7, %v5391_v9  ;;  %v5389_v53 = vadd.f32 %v5374_v62, %v5269_v19  ;;  %v5471_v16 = vpop.f32.mrf.mxu1  ;;  %v9519_v62 = vld [vmem:[#allocation7 + $0xa0] sm:$0xff]  }
 0xa3a   :  { %v5506_v17 = vadd.f32 %v8003_v34, %v5494_v15  ;;  %v5492_v12 = vmul.f32 %v8001_v3, %v5471_v16  ;;  %v9069_v18 = vpop.f32.mrf.mxu0  ;;  %v9518_v15 = vld [vmem:[#allocation7 + $0xa8] sm:$0xff]  }
 0xa3b   :  { %v5507_v2 = vadd.f32 %v5503_v63, %v5389_v53  ;;  %v5392_v21 = vadd.f32 %v9069_v18, %v5280_v14  ;;  %v5513_v27 = vmax.f32 %v5509_v57, 0.0 }
 0xa3c   :  { %v5377_v38 = vpop.f32.mrf.mxu0  ;;  %v5504_v13 = vadd.f32 %v8003_v34, %v5492_v12 }
 0xa3d   :  { %v5511_v20 = vmax.f32 %v5507_v2, 0.0  ;;  %v5510_v31 = vadd.f32 %v5506_v17, %v5392_v21  ;;  %v5390_v4 = vadd.f32 %v5377_v38, %v5272_v45  ;;  %v5521_v33 = vrot.slane %v5513_v27, 7  ;;  %v9520_v45 = vld [vmem:[#allocation8 + $0x1f0] ss:$8 sps:$4 sm:$0xff]   ;;  %v9525_v2 = vld [vmem:[#allocation8 + $0x274] ss:$8 sps:$4 sm:$0xff]  }
 0xa3e   :  { %v9523_v21 = vld [vmem:[#allocation8 + $0x270] ss:$8 sps:$4 sm:$0xff]   ;;  %v9528_v27 = vld [vmem:[#allocation8 + $0x1e4] ss:$8 sps:$4 sm:$0xff]   ;;  %6047 = vmatprep.subr.bf16.mxu1 %v9525_v2  ;;  %v9526_v38 = vld [vmem:[#allocation8 + $0x1e0] ss:$8 sps:$4 sm:$0xff]  }
 0xa3f   :  { %v5514_v29 = vmax.f32 %v5510_v31, 0.0  ;;  %v5519_v35 = vrot.slane %v5511_v20, 7  ;;  %v5508_v39 = vadd.f32 %v5504_v13, %v5390_v4  ;;  %v5529_v5 = vsel %vm1457_vm7, 0.0, %v5521_v33  ;;  %v9531_v20 = vld [vmem:[#allocation8 + $0x264] ss:$8 sps:$4 sm:$0xff]  }
 0xa40   :  { %v5533_v60 = vsel %vm1457_vm7, %v5521_v33, 0.0  ;;  %v5560_v36 = vrot.slane %v5529_v5, 1  ;;  %v5745_v53 = vrot.slane %v5529_v5, 2  ;;  %v9529_v13 = vld [vmem:[#allocation8 + $0x260] ss:$8 sps:$4 sm:$0xff]  }
 0xa41   :  { %v5522_v61 = vrot.slane %v5514_v29, 7  ;;  %v5527_v42 = vsel %vm1457_vm7, 0.0, %v5519_v35  ;;  %v5531_v58 = vsel %vm1457_vm7, %v5519_v35, 0.0  ;;  %v5512_v23 = vmax.f32 %v5508_v39, 0.0  ;;  %v9534_v31 = vld [vmem:[#allocation8 + $0x1d4] ss:$8 sps:$4 sm:$0xff]  }
 0xa42   :  { %v5561_v46 = vrot.slane %v5533_v60, 1  ;;  %v5554_v49 = vrot.slane %v5527_v42, 1  ;;  %v5555_v1 = vrot.slane %v5531_v58, 1  ;;  %v5739_v6 = vrot.slane %v5527_v42, 2  ;;  %v9532_v4 = vld [vmem:[#allocation8 + $0x1d0] ss:$8 sps:$4 sm:$0xff]  }
 0xa43   :  { %v5530_v40 = vsel %vm1457_vm7, 0.0, %v5522_v61  ;;  %v5534_v41 = vsel %vm1457_vm7, %v5522_v61, 0.0  ;;  %v5520_v28 = vrot.slane %v5512_v23, 7  ;;  %v5740_v50 = vrot.slane %v5531_v58, 2  ;;  %v9537_v29 = vld [vmem:[#allocation8 + $0x254] ss:$8 sps:$4 sm:$0xff]  }
 0xa44   :  { %v5563_v44 = vrot.slane %v5530_v40, 1  ;;  %v5564_v51 = vrot.slane %v5534_v41, 1  ;;  %v5536_v26 = vpack.c.bf16 %v5530_v40, %v5529_v5  ;;  %v5556_v37 = vsel %vm183_vm1, %v5554_v49, %v5555_v1  ;;  %v9535_v33 = vld [vmem:[#allocation8 + $0x250] ss:$8 sps:$4 sm:$0xff]   ;;  %v9540_v35 = vld [vmem:[#allocation8 + $0x1c4] ss:$8 sps:$4 sm:$0xff]  }
 0xa45   :  { %v5528_v55 = vsel %vm1457_vm7, 0.0, %v5520_v28  ;;  %v5532_v32 = vsel %vm1457_vm7, %v5520_v28, 0.0  ;;  %v5562_v8 = vsel %vm183_vm1, %v5560_v36, %v5561_v46  ;;  %v5741_v9 = vsel %vm368_vm4, %v5739_v6, %v5740_v50  ;;  %v9538_v61 = vld [vmem:[#allocation8 + $0x1c0] ss:$8 sps:$4 sm:$0xff]   ;;  %v9543_v39 = vld [vmem:[#allocation8 + $0x244] ss:$8 sps:$4 sm:$0xff]  }
 0xa46   :  { %v5557_v54 = vrot.slane %v5528_v55, 1  ;;  %v5558_v52 = vrot.slane %v5532_v32, 1  ;;  %v5742_v3 = vrot.slane %v5528_v55, 2  ;;  %v5743_v56 = vrot.slane %v5532_v32, 2  ;;  %v9541_v5 = vld [vmem:[#allocation8 + $0x240] ss:$8 sps:$4 sm:$0xff]  }
 0xa47   :  { %v5565_v34 = vsel %vm183_vm1, %v5563_v44, %v5564_v51  ;;  %v5535_v22 = vpack.c.bf16 %v5528_v55, %v5527_v42  ;;  %v5748_v14 = vrot.slane %v5530_v40, 2  ;;  %v5749_v57 = vrot.slane %v5534_v41, 2  ;;  %v9546_v40 = vld [vmem:[#allocation8 + $0x1b4] ss:$8 sps:$4 sm:$0xff]   ;;  %v9544_v41 = vld [vmem:[#allocation8 + $0x1b0] ss:$8 sps:$4 sm:$0xff]  }
 0xa48   :  { %v5559_v0 = vsel %vm183_vm1, %v5557_v54, %v5558_v52  ;;  %v5744_v7 = vsel %vm368_vm4, %v5742_v3, %v5743_v56  ;;  %v5571_v19 = vpack.c.bf16 %v5565_v34, %v5562_v8  ;;  %v5746_v16 = vrot.slane %v5533_v60, 2  ;;  %v9549_v60 = vld [vmem:[#allocation8 + $0x234] ss:$8 sps:$4 sm:$0xff]   ;;  %v9547_v42 = vld [vmem:[#allocation8 + $0x230] ss:$8 sps:$4 sm:$0xff]  }
 0xa49   :  { %9102 = vmatprep.mubr.msk.bf16.mxu1 %vm233_vm2, %v5535_v22  ;;  %v5570_v48 = vpack.c.bf16 %v5559_v0, %v5556_v37  ;;  %v5755_v63 = vpack.c.bf16 %v5744_v7, %v5741_v9  ;;  %v5750_v17 = vsel %vm368_vm4, %v5748_v14, %v5749_v57  ;;  %v9552_v58 = vld [vmem:[#allocation8 + $0x1a4] ss:$8 sps:$4 sm:$0xff]   ;;  %v9550_v23 = vld [vmem:[#allocation8 + $0x1a0] ss:$8 sps:$4 sm:$0xff]   ;;  %v9558_v28 = vld [vmem:[#allocation8 + $0x194] ss:$8 sps:$4 sm:$0xff]  }
 0xa4a   :  { %9103 = vmatmul.mubr.msk.bf16.vlgmr.msra.gmra.mxu1 %vm233_vm2, %v5536_v26  ;;  %v5747_v12 = vsel %vm368_vm4, %v5745_v53, %v5746_v16  ;;  %v9555_v44 = vld [vmem:[#allocation8 + $0x224] ss:$8 sps:$4 sm:$0xff]   ;;  %v9553_v51 = vld [vmem:[#allocation8 + $0x220] ss:$8 sps:$4 sm:$0xff]   ;;  %v9556_v36 = vld [vmem:[#allocation8 + $0x190] ss:$8 sps:$4 sm:$0xff]  }
 0xa4b   :  { %9090 = vmatprep.mubr.msk.bf16.mxu0 %vm233_vm2, %v5570_v48  ;;  %6079 = vmatprep.mubr.bf16.mxu1 %v9835_v24  ;;  %v5756_v18 = vpack.c.bf16 %v5750_v17, %v5747_v12  ;;  %v9561_v46 = vld [vmem:[#allocation8 + $0x214] ss:$8 sps:$4 sm:$0xff]   ;;  %v9559_v49 = vld [vmem:[#allocation8 + $0x210] ss:$8 sps:$4 sm:$0xff]   ;;  %v9564_v1 = vld [vmem:[#allocation8 + $0x184] ss:$8 sps:$4 sm:$0xff]  }
 0xa4c   :  { %9091 = vmatmul.mubr.msk.bf16.vlgmr.msra.gmra.mxu0 %vm233_vm2, %v5571_v19  ;;  %6048 = vmatpush1.bf16.msra.mxu1 %v9523_v21  ;;  %v9562_v6 = vld [vmem:[#allocation8 + $0x180] ss:$8 sps:$4 sm:$0xff]   ;;  %v9567_v50 = vld [vmem:[#allocation8 + $0x204] ss:$8 sps:$4 sm:$0xff]   ;;  %v9570_v32 = vld [vmem:[#allocation8 + $0x2f4] ss:$8 sps:$4 sm:$0xff]  }
 0xa4d   :  { %9107 = vmatpush3.bf16.msra.mxu0 %v10971_v47  ;;  %9114 = vmatprep.mubr.msk.bf16.mxu0 %vm233_vm2, %v5755_v63  ;;  %v9522_v47 = vld [vmem:[#allocation8 + $0x1f4] ss:$8 sps:$4 sm:$0xff]   ;;  %v9565_v55 = vld [vmem:[#allocation8 + $0x200] ss:$8 sps:$4 sm:$0xff]  }
 0xa4e   :  { %9108 = vmatprep.subr.bf16.mxu0 %v9517_v10  ;;  %6049 = vmatprep.subr.bf16.mxu1 %v9531_v20  ;;  %v8023_v48 = vld [vmem:[%s11427_s12 + $0x1] ss:$0 sm:$0xff] }
 0xa4f   :  { %v8025_v16 = vld [vmem:[%s11428_s13 + $0x1] ss:$0 sm:$0xff] }
 0xa50   :  { %6050 = vmatpush1.bf16.msra.mxu1 %v9529_v13 }
 0xa51   :  { %9109 = vmatpush3.bf16.msra.mxu0 %v9517_v10  ;;  %6051 = vmatprep.subr.bf16.mxu1 %v9537_v29 }
 0xa52   :  { %9110 = vmatprep.subr.bf16.mxu0 %v9518_v15 }
 0xa54   :  { %6052 = vmatpush1.bf16.msra.mxu1 %v9535_v33 }
 0xa55   :  { %9111 = vmatpush3.bf16.msra.mxu0 %v9518_v15  ;;  %6053 = vmatprep.subr.bf16.mxu1 %v9543_v39 }
 0xa56   :  { %9112 = vmatprep.subr.bf16.mxu0 %v9519_v62 }
 0xa58   :  { %6054 = vmatpush1.bf16.msra.mxu1 %v9541_v5 }
 0xa59   :  { %9113 = vmatpush3.bf16.msra.mxu0 %v9519_v62  ;;  %6055 = vmatprep.subr.bf16.mxu1 %v9549_v60 }
 0xa5a   :  { %6180 = vmatprep.subr.bf16.mxu0 %v9522_v47 }
 0xa5c   :  { %9115 = vmatmul.mubr.msk.bf16.vlgmr.msra.gmra.mxu0 %vm233_vm2, %v5756_v18  ;;  %6056 = vmatpush1.bf16.msra.mxu1 %v9547_v42 }
 0xa5d   :  { %6212 = vmatprep.mubr.bf16.mxu0 %v9835_v24  ;;  %6181 = vmatpush1.bf16.msra.mxu0 %v9520_v45 }
 0xa5e   :  { %6182 = vmatprep.subr.bf16.mxu0 %v9528_v27  ;;  %6057 = vmatprep.subr.bf16.mxu1 %v9555_v44 }
 0xa60   :  { %6058 = vmatpush1.bf16.msra.mxu1 %v9553_v51 }
 0xa61   :  { %6183 = vmatpush1.bf16.msra.mxu0 %v9526_v38  ;;  %6059 = vmatprep.subr.bf16.mxu1 %v9561_v46 }
 0xa62   :  { %6184 = vmatprep.subr.bf16.mxu0 %v9534_v31 }
 0xa64   :  { %6060 = vmatpush1.bf16.msra.mxu1 %v9559_v49 }
 0xa65   :  { %6185 = vmatpush1.bf16.msra.mxu0 %v9532_v4  ;;  %6061 = vmatprep.subr.bf16.mxu1 %v9567_v50 }
 0xa66   :  { %6186 = vmatprep.subr.bf16.mxu0 %v9540_v35 }
 0xa68   :  { %6062 = vmatpush1.bf16.msra.mxu1 %v9565_v55 }
 0xa69   :  { %6187 = vmatpush1.bf16.msra.mxu0 %v9538_v61  ;;  %6348 = vmatprep.subr.bf16.mxu1 %v9570_v32  ;;  %v9573_v32 = vld [vmem:[#allocation8 + $0x2e4] ss:$8 sps:$4 sm:$0xff]  }
 0xa6a   :  { %6188 = vmatprep.subr.bf16.mxu0 %v9546_v40 }
 0xa6d   :  { %6189 = vmatpush1.bf16.msra.mxu0 %v9544_v41 }
 0xa6e   :  { %6190 = vmatprep.subr.bf16.mxu0 %v9552_v58 }
 0xa71   :  { %6191 = vmatpush1.bf16.msra.mxu0 %v9550_v23 }
 0xa72   :  { %6192 = vmatprep.subr.bf16.mxu0 %v9558_v28 }
 0xa75   :  { %6193 = vmatpush1.bf16.msra.mxu0 %v9556_v36 }
 0xa76   :  { %6194 = vmatprep.subr.bf16.mxu0 %v9564_v1  ;;  %v9568_v1 = vld [vmem:[#allocation8 + $0x2f0] ss:$8 sps:$4 sm:$0xff]  }
 0xa79   :  { %6195 = vmatpush1.bf16.msra.mxu0 %v9562_v6 }
 0xb0a   :  { %v9104_v3 = vpop.f32.mrf.mxu1 }
 0xb0c   :  { %v9092_v54 = vpop.f32.mrf.mxu0  ;;  %v5724_v34 = vpop.f32.mrf.mxu1 }
 0xb0d   :  { %v5733_v26 = vadd.f32 %v9104_v3, %v9092_v54 }
 0xb0e   :  { %v5645_v52 = vpop.f32.mrf.mxu0  ;;  %v9105_v0 = vpop.f32.mrf.mxu1 }
 0xb0f   :  { %v5725_v7 = vadd.f32 %v5724_v34, %v5645_v52  ;;  %v9571_v34 = vld [vmem:[#allocation8 + $0x2e0] ss:$8 sps:$4 sm:$0xff]  }
 0xb10   :  { %v9093_v56 = vpop.f32.mrf.mxu0  ;;  %v5727_v15 = vpop.f32.mrf.mxu1 }
 0xb11   :  { %v5736_v9 = vadd.f32 %v9105_v0, %v9093_v56  ;;  %v9576_v0 = vld [vmem:[#allocation8 + $0x2d4] ss:$8 sps:$4 sm:$0xff]  }
 0xb12   :  { %v5648_v22 = vpop.f32.mrf.mxu0 }
 0xb13   :  { %v5728_v53 = vadd.f32 %v5727_v15, %v5648_v22  ;;  %v9580_v15 = vld [vmem:[#allocation8 + $0x2b0] ss:$8 sps:$4 sm:$0xff]  }
 0xb1c   :  { %v9116_v37 = vpop.f32.mrf.mxu0 }
 0xb1d   :  { %v5847_v8 = vadd.f32 %v9116_v37, %v5733_v26 }
 0xb1e   :  { %v5830_v19 = vpop.f32.mrf.mxu0 }
 0xb1f   :  { %v5845_v10 = vadd.f32 %v5830_v19, %v5725_v7  ;;  %v5859_v62 = vmul.f32 %v8023_v48, %v5847_v8  ;;  %v9574_v8 = vld [vmem:[#allocation8 + $0x2d0] ss:$8 sps:$4 sm:$0xff]  }
 0xb20   :  { %v9117_v63 = vpop.f32.mrf.mxu0 }
 0xb21   :  { %v5857_v14 = vmul.f32 %v8023_v48, %v5845_v10  ;;  %v5848_v57 = vadd.f32 %v9117_v63, %v5736_v9  ;;  %v5871_v45 = vadd.f32 %v8025_v16, %v5859_v62  ;;  %v9579_v9 = vld [vmem:[#allocation8 + $0x2c4] ss:$8 sps:$4 sm:$0xff]   ;;  %v9577_v10 = vld [vmem:[#allocation8 + $0x2c0] ss:$8 sps:$4 sm:$0xff]   ;;  %v9582_v63 = vld [vmem:[#allocation8 + $0x2b4] ss:$8 sps:$4 sm:$0xff]  }
 0xb22   :  { %v5833_v17 = vpop.f32.mrf.mxu0  ;;  %v9585_v62 = vld [vmem:[#allocation8 + $0x2a4] ss:$8 sps:$4 sm:$0xff]  }
 0xb23   :  { %v5869_v12 = vadd.f32 %v8025_v16, %v5857_v14  ;;  %v5860_v18 = vmul.f32 %v8023_v48, %v5848_v57  ;;  %v5846_v47 = vadd.f32 %v5833_v17, %v5728_v53  ;;  %v5879_v4 = vmul.f32 0.2, %v5871_v45  ;;  %v9583_v14 = vld [vmem:[#allocation8 + $0x2a0] ss:$8 sps:$4 sm:$0xff]   ;;  %v9588_v57 = vld [vmem:[#allocation8 + $0x294] ss:$8 sps:$4 sm:$0xff]  }
 0xb24   :  { %vm5875_vm3 = vcmp.gt.f32.partialorder %v5871_v45, 0.0  ;;  %v9586_v53 = vld [vmem:[#allocation8 + $0x290] ss:$8 sps:$4 sm:$0xff]  }
 0xb25   :  { %vm5873_vm0 = vcmp.gt.f32.partialorder %v5869_v12, 0.0  ;;  %v5877_v2 = vmul.f32 0.2, %v5869_v12  ;;  %v5872_v21 = vadd.f32 %v8025_v16, %v5860_v18  ;;  %v5858_v27 = vmul.f32 %v8023_v48, %v5846_v47 }
 0xb26   :  { %v5883_v39 = vsel %vm5875_vm3, %v5871_v45, %v5879_v4  ;;  %v9589_v45 = vld [vmem:[#allocation8 + $0x280] ss:$8 sps:$4 sm:$0xff]  }
 0xb27   :  { %v5881_v38 = vsel %vm5873_vm0, %v5869_v12, %v5877_v2  ;;  %v5880_v20 = vmul.f32 0.2, %v5872_v21  ;;  %vm5876_vm2 = vcmp.gt.f32.partialorder %v5872_v21, 0.0  ;;  %v5870_v31 = vadd.f32 %v8025_v16, %v5858_v27  ;;  %v9591_v16 = vld [vmem:[#allocation8 + $0x284] ss:$8 sps:$4 sm:$0xff]  }
 0xb28   :  { %v5889_v13 = vrot.slane %v5881_v38, 7  ;;  %v5891_v23 = vrot.slane %v5883_v39, 7  ;;  %v9594_v39 = vld [vmem:[#allocation10 + $0x278] sm:$0xff]  }
 0xb29   :  { %vm5874_vm5 = vcmp.gt.f32.partialorder %v5870_v31, 0.0  ;;  %v5884_v29 = vsel %vm5876_vm2, %v5872_v21, %v5880_v20  ;;  %v5878_v33 = vmul.f32 0.2, %v5870_v31  ;;  %8513 = vmatprep.subr.bf16.mxu0 %v9594_v39 }
 0xb2a   :  { %v11012_v35 = vsel %vm1457_vm7, 0.0, %v5889_v13  ;;  %v11015_v61 = vsel %vm1457_vm7, %v5889_v13, 0.0  ;;  %v5892_v40 = vrot.slane %v5884_v29, 7  ;;  %v5899_v54 = vsel %vm1457_vm7, 0.0, %v5891_v23 }
 0xb2b   :  { %v5882_v5 = vsel %vm5874_vm5, %v5870_v31, %v5878_v33  ;;  %v5932_v42 = vrot.slane %v11012_v35, 1  ;;  %v5933_v58 = vrot.slane %v11015_v61, 1  ;;  %v5903_v52 = vsel %vm1457_vm7, %v5891_v23, 0.0 }
 0xb2c   :  { %v5890_v41 = vrot.slane %v5882_v5, 7  ;;  %v11031_v59 = vsel %vm1457_vm7, 0.0, %v5892_v40  ;;  %v11034_v49 = vsel %vm1457_vm7, %v5892_v40, 0.0  ;;  %v5938_v22 = vrot.slane %v5899_v54, 1  ;;  %v9595_v5 = vld [vmem:[#allocation10 + $0x238] sm:$0xff]  }
 0xb2d   :  { %v5934_v6 = vsel %vm183_vm1, %v5932_v42, %v5933_v58  ;;  %v5941_v3 = vrot.slane %v11031_v59, 1  ;;  %v5942_v56 = vrot.slane %v11034_v49, 1  ;;  %v5939_v26 = vrot.slane %v5903_v52, 1  ;;  %v9597_v42 = vld [vmem:[#allocation10 + $0x1b0] sm:$0xff]  }
 0xb2e   :  { %v5898_v44 = vsel %vm1457_vm7, 0.0, %v5890_v41  ;;  %v5902_v51 = vsel %vm1457_vm7, %v5890_v41, 0.0  ;;  %v8061_v28 = vpack.c.bf16 %v5890_v41, %v5889_v13  ;;  %v8066_v37 = vpack.c.bf16 %v5892_v40, %v5891_v23  ;;  %v9596_v40 = vld [vmem:[#allocation10 + $0x1f0] sm:$0xff]   ;;  %v9601_v23 = vld [vmem:[#allocation10 + $0x1a8] sm:$0xff]  }
 0xb2f   :  { %v5935_v36 = vrot.slane %v5898_v44, 1  ;;  %v5936_v46 = vrot.slane %v5902_v51, 1  ;;  %v5943_v7 = vsel %vm183_vm1, %v5941_v3, %v5942_v56  ;;  %v5940_v48 = vsel %vm183_vm1, %v5938_v22, %v5939_v26  ;;  %v9598_v41 = vld [vmem:[#allocation10 + $0x270] sm:$0xff]   ;;  %v9616_v3 = vld [vmem:[#allocation10 + $0x1c8] sm:$0xff]   ;;  %v9620_v26 = vld [vmem:[#allocation10 + $0x1c0] sm:$0xff]  }
 0xb30   :  { %8062 = vmatmul.mubr.msk.bf16.vlgmr.msra.gmra.mxu0 %vm11020_vm6, %v8061_v28  ;;  %v5949_v19 = vpack.c.bf16 %v5943_v7, %v5940_v48  ;;  %v6236_v17 = vrot.slane %v5898_v44, 2  ;;  %v6237_v12 = vrot.slane %v5902_v51, 2  ;;  %v6233_v18 = vrot.slane %v11012_v35, 2  ;;  %v9592_v35 = vld [vmem:[#allocation10 + $0x1f8] sm:$0xff]   ;;  %v9599_v58 = vld [vmem:[#allocation10 + $0x230] sm:$0xff]   ;;  %v9602_v44 = vld [vmem:[#allocation10 + $0x268] sm:$0xff]  }
 0xb31   :  { %v5937_v50 = vsel %vm183_vm1, %v5935_v36, %v5936_v46  ;;  %6222 = vmatprep.mubr.bf16.mxu0 %v9835_v24  ;;  %v6234_v47 = vrot.slane %v11015_v61, 2  ;;  %v6242_v38 = vrot.slane %v11031_v59, 2  ;;  %v6243_v20 = vrot.slane %v11034_v49, 2  ;;  %v9593_v61 = vld [vmem:[#allocation10 + $0x1b8] sm:$0xff]   ;;  %8514 = vmatpush3.bf16.msra.mxu0 %v9595_v5  ;;  %v9603_v51 = vld [vmem:[#allocation10 + $0x228] sm:$0xff]   ;;  %v9604_v28 = vld [vmem:[#allocation10 + $0x1e0] sm:$0xff]  }
 0xb32   :  { %v5948_v55 = vpack.c.bf16 %v5937_v50, %v5934_v6  ;;  %v6238_v2 = vsel %vm368_vm4, %v6236_v17, %v6237_v12  ;;  %v6239_v13 = vrot.slane %v5899_v54, 2  ;;  %v6240_v31 = vrot.slane %v5903_v52, 2  ;;  %8515 = vmatprep.subr.bf16.mxu0 %v9598_v41  ;;  %v9605_v36 = vld [vmem:[#allocation10 + $0x1a0] sm:$0xff]   ;;  %v9608_v49 = vld [vmem:[#allocation10 + $0x1d8] sm:$0xff]   ;;  %v9614_v54 = vld [vmem:[#allocation10 + $0x250] sm:$0xff]  }
 0xb33   :  { %v6235_v21 = vsel %vm368_vm4, %v6233_v18, %v6234_v47  ;;  %v6244_v4 = vsel %vm368_vm4, %v6242_v38, %v6243_v20  ;;  %v9606_v46 = vld [vmem:[#allocation10 + $0x260] sm:$0xff]   ;;  %v9610_v6 = vld [vmem:[#allocation10 + $0x258] sm:$0xff]   ;;  %v9615_v52 = vld [vmem:[#allocation10 + $0x210] sm:$0xff]  }
 0xb34   :  { %6080 = vmatmul.mubr.bf16.vlgmr.msra.gmra.mxu1 %v5948_v55  ;;  %v6249_v27 = vpack.c.bf16 %v6238_v2, %v6235_v21  ;;  %v6241_v29 = vsel %vm368_vm4, %v6239_v13, %v6240_v31  ;;  %v9607_v59 = vld [vmem:[#allocation10 + $0x220] sm:$0xff]   ;;  %v9611_v50 = vld [vmem:[#allocation10 + $0x218] sm:$0xff]   ;;  %v9612_v55 = vld [vmem:[#allocation10 + $0x1d0] sm:$0xff]  }
 0xb35   :  { %6349 = vmatpush1.bf16.msra.mxu1 %v9568_v1  ;;  %6089 = vmatprep.mubr.bf16.mxu1 %v9835_v24  ;;  %v6250_v33 = vpack.c.bf16 %v6244_v4, %v6241_v29  ;;  %v9609_v1 = vld [vmem:[#allocation10 + $0x198] sm:$0xff]   ;;  %v9617_v56 = vld [vmem:[#allocation10 + $0x188] sm:$0xff]   ;;  %v9623_v7 = vld [vmem:[#allocation10 + $0x200] sm:$0xff]  }
 0xb36   :  { %6350 = vmatprep.subr.bf16.mxu1 %v9573_v32  ;;  %8516 = vmatpush3.bf16.msra.mxu0 %v9599_v58  ;;  %v9613_v32 = vld [vmem:[#allocation10 + $0x190] sm:$0xff]   ;;  %v9619_v22 = vld [vmem:[#allocation10 + $0x208] sm:$0xff]   ;;  %v8084_v17 = vld [vmem:[%s11430_s15 + $0x2] sm:$0x3] }
 0xb37   :  { %8517 = vmatprep.subr.bf16.mxu0 %v9602_v44  ;;  %v8085_v18 = vld [vmem:[%s11431_s16 + $0x2] sm:$0x3]  ;;  %v11072_v13 = vrot.slane %v8084_v17, %v10453_v11 }
 0xb38   :  { %8067 = vmatmul.mubr.msk.bf16.gmra.mxu0 %vm11020_vm6, %v8066_v37  ;;  %v9621_v37 = vld [vmem:[#allocation10 + $0x180] sm:$0xff]   ;;  %v11069_v20 = vrot.slane %v8085_v18, %v10448_v43 }
 0xb39   :  { %6351 = vmatpush1.bf16.msra.mxu1 %v9571_v34  ;;  %v9618_v34 = vld [vmem:[#allocation10 + $0x248] sm:$0xff]  }
 0xb3a   :  { %6352 = vmatprep.subr.bf16.mxu1 %v9576_v0  ;;  %8518 = vmatpush3.bf16.msra.mxu0 %v9603_v51  ;;  %v9622_v0 = vld [vmem:[#allocation10 + $0x240] sm:$0xff]  }
 0xb3b   :  { %8519 = vmatprep.subr.bf16.mxu0 %v9606_v46 }
 0xb3c   :  { %6090 = vmatmul.mubr.bf16.gmra.mxu1 %v5949_v19 }
 0xb3d   :  { %6353 = vmatpush1.bf16.msra.mxu1 %v9574_v8  ;;  %6380 = vmatprep.mubr.bf16.mxu1 %v9835_v24  ;;  %v9624_v8 = vld [vmem:[#allocation10 + $0x2f8] sm:$0xff]  }
 0xb3e   :  { %6354 = vmatprep.subr.bf16.mxu1 %v9579_v9  ;;  %8520 = vmatpush3.bf16.msra.mxu0 %v9607_v59 }
 0xb3f   :  { %8521 = vmatprep.subr.bf16.mxu0 %v9610_v6 }
 0xb41   :  { %6355 = vmatpush1.bf16.msra.mxu1 %v9577_v10 }
 0xb42   :  { %6356 = vmatprep.subr.bf16.mxu1 %v9582_v63  ;;  %8522 = vmatpush3.bf16.msra.mxu0 %v9611_v50 }
 0xb43   :  { %8523 = vmatprep.subr.bf16.mxu0 %v9614_v54 }
 0xb45   :  { %6357 = vmatpush1.bf16.msra.mxu1 %v9580_v15 }
 0xb46   :  { %6358 = vmatprep.subr.bf16.mxu1 %v9585_v62  ;;  %8524 = vmatpush3.bf16.msra.mxu0 %v9615_v52 }
 0xb47   :  { %8525 = vmatprep.subr.bf16.mxu0 %v9618_v34 }
 0xb49   :  { %6359 = vmatpush1.bf16.msra.mxu1 %v9583_v14 }
 0xb4a   :  { %6360 = vmatprep.subr.bf16.mxu1 %v9588_v57  ;;  %8526 = vmatpush3.bf16.msra.mxu0 %v9619_v22 }
 0xb4b   :  { %8527 = vmatprep.subr.bf16.mxu0 %v9622_v0 }
 0xb4d   :  { %6361 = vmatpush1.bf16.msra.mxu1 %v9586_v53 }
 0xb4e   :  { %6362 = vmatprep.subr.bf16.mxu1 %v9591_v16  ;;  %8528 = vmatpush3.bf16.msra.mxu0 %v9623_v7 }
 0xb4f   :  { %8569 = vmatprep.subr.bf16.mxu0 %v9624_v8 }
 0xb51   :  { %6363 = vmatpush1.bf16.msra.mxu1 %v9589_v45  ;;  %v11066_v45 = vrot.slane %v8084_v17, %v10448_v43 }
 0xb52   :  { %8541 = vmatprep.subr.bf16.mxu1 %v9592_v35  ;;  %v11076_v35 = vrot.slane %v8085_v18, %v10453_v11 }
 0xb54   :  { %6381 = vmatmul.mubr.bf16.vlgmr.msra.gmra.mxu1 %v6249_v27 }
 0xb55   :  { %6390 = vmatprep.mubr.bf16.mxu1 %v9835_v24  ;;  %8542 = vmatpush3.bf16.msra.mxu1 %v9593_v61  ;;  %v9600_v24 = vld [vmem:[#allocation10 + $0x1e8] sm:$0xff]  }
 0xb56   :  { %8543 = vmatprep.subr.bf16.mxu1 %v9596_v40 }
 0xb59   :  { %8544 = vmatpush3.bf16.msra.mxu1 %v9597_v42 }
 0xb5a   :  { %8545 = vmatprep.subr.bf16.mxu1 %v9600_v24 }
 0xb5c   :  { %6391 = vmatmul.mubr.bf16.gmra.mxu1 %v6250_v33 }
 0xb5d   :  { %8546 = vmatpush3.bf16.msra.mxu1 %v9601_v23 }
 0xb5e   :  { %8547 = vmatprep.subr.bf16.mxu1 %v9604_v28 }
 0xb61   :  { %8548 = vmatpush3.bf16.msra.mxu1 %v9605_v36 }
 0xb62   :  { %8549 = vmatprep.subr.bf16.mxu1 %v9608_v49 }
 0xb65   :  { %8550 = vmatpush3.bf16.msra.mxu1 %v9609_v1 }
 0xb66   :  { %8551 = vmatprep.subr.bf16.mxu1 %v9612_v55 }
 0xb69   :  { %8552 = vmatpush3.bf16.msra.mxu1 %v9613_v32 }
 0xb6a   :  { %8553 = vmatprep.subr.bf16.mxu1 %v9616_v3 }
 0xb6d   :  { %8554 = vmatpush3.bf16.msra.mxu1 %v9617_v56 }
 0xb6e   :  { %8555 = vmatprep.subr.bf16.mxu1 %v9620_v26 }
 0xb71   :  { %8556 = vmatpush3.bf16.msra.mxu1 %v9621_v37 }
 0xb72   :  { %9118 = vmatprep.subr.mxu1 %v9837_v25 }
 0xbf0   :  { %v6214_v63 = vpop.f32.mrf.mxu0 }
 0xbf2   :  { %v6216_v62 = vpop.f32.mrf.mxu0 }
 0xbf4   :  { %v6081_v48 = vpop.f32.mrf.mxu1  ;;  %v6218_v57 = vpop.f32.mrf.mxu0 }
 0xbf5   :  { %v6215_v47 = vadd.f32 %v6214_v63, %v6081_v48 }
 0xbf6   :  { %v6083_v19 = vpop.f32.mrf.mxu1  ;;  %v6220_v16 = vpop.f32.mrf.mxu0 }
 0xbf7   :  { %v6217_v27 = vadd.f32 %v6216_v62, %v6083_v19 }
 0xbf8   :  { %v6085_v9 = vpop.f32.mrf.mxu1  ;;  %v6224_v2 = vpop.f32.mrf.mxu0 }
 0xbf9   :  { %v6219_v4 = vadd.f32 %v6218_v57, %v6085_v9 }
 0xbfa   :  { %v6087_v10 = vpop.f32.mrf.mxu1  ;;  %v6226_v61 = vpop.f32.mrf.mxu0 }
 0xbfb   :  { %v6221_v43 = vadd.f32 %v6220_v16, %v6087_v10 }
 0xbfc   :  { %v6091_v15 = vpop.f32.mrf.mxu1  ;;  %v6228_v51 = vpop.f32.mrf.mxu0 }
 0xbfd   :  { %v6225_v44 = vadd.f32 %v6224_v2, %v6091_v15 }
 0xbfe   :  { %v6093_v14 = vpop.f32.mrf.mxu1  ;;  %v6230_v3 = vpop.f32.mrf.mxu0 }
 0xbff   :  { %v6227_v28 = vadd.f32 %v6226_v61, %v6093_v14 }
 0xc00   :  { %v6095_v53 = vpop.f32.mrf.mxu1 }
 0xc01   :  { %v6229_v22 = vadd.f32 %v6228_v51, %v6095_v53 }
 0xc02   :  { %v6097_v12 = vpop.f32.mrf.mxu1 }
 0xc03   :  { %v6231_v26 = vadd.f32 %v6230_v3, %v6097_v12 }
 0xc14   :  { %v6382_v21 = vpop.f32.mrf.mxu1 }
 0xc15   :  { %v6401_v38 = vadd.f32 %v6382_v21, %v6215_v47 }
 0xc16   :  { %v6384_v31 = vpop.f32.mrf.mxu1 }
 0xc17   :  { %v6422_v29 = vmul.f32 %v11066_v45, %v6401_v38  ;;  %v6402_v33 = vadd.f32 %v6384_v31, %v6217_v27 }
 0xc18   :  { %v6386_v39 = vpop.f32.mrf.mxu1 }
 0xc19   :  { %v6443_v5 = vadd.f32 %v11069_v20, %v6422_v29  ;;  %v6423_v40 = vmul.f32 %v11072_v13, %v6402_v33  ;;  %v6403_v41 = vadd.f32 %v6386_v39, %v6219_v4 }
 0xc1a   :  { %v6388_v42 = vpop.f32.mrf.mxu1 }
 0xc1b   :  { %vm6451_vm12 = vcmp.gt.f32.partialorder %v6443_v5, 0.0  ;;  %v6459_v58 = vmul.f32 0.25, %v6443_v5  ;;  %v6444_v24 = vadd.f32 %v11076_v35, %v6423_v40  ;;  %v6424_v23 = vmul.f32 %v11066_v45, %v6403_v41 }
 0xc1c   :  { %v6404_v11 = vadd.f32 %v6388_v42, %v6221_v43  ;;  %v6392_v36 = vpop.f32.mrf.mxu1 }
 0xc1d   :  { %v6467_v46 = vsel %vm6451_vm12, %v6443_v5, %v6459_v58  ;;  %vm6452_vm10 = vcmp.gt.f32.partialorder %v6444_v24, 0.0  ;;  %v6460_v59 = vmul.f32 0.25, %v6444_v24  ;;  %v6445_v49 = vadd.f32 %v11069_v20, %v6424_v23 }
 0xc1e   :  { %v6483_v1 = vrot.slane %v6467_v46, 7  ;;  %v6425_v6 = vmul.f32 %v11072_v13, %v6404_v11  ;;  %v6405_v50 = vadd.f32 %v6392_v36, %v6225_v44  ;;  %v6394_v55 = vpop.f32.mrf.mxu1 }
 0xc1f   :  { %v6468_v32 = vsel %vm6452_vm10, %v6444_v24, %v6460_v59  ;;  %vm6453_vm11 = vcmp.gt.f32.partialorder %v6445_v49, 0.0  ;;  %v6461_v54 = vmul.f32 0.25, %v6445_v49  ;;  %v6406_v52 = vadd.f32 %v6394_v55, %v6227_v28 }
 0xc20   :  { %v6446_v56 = vadd.f32 %v11076_v35, %v6425_v6  ;;  %v6396_v34 = vpop.f32.mrf.mxu1  ;;  %v6484_v37 = vrot.slane %v6468_v32, 7  ;;  %v6426_v8 = vmul.f32 %v11066_v45, %v6405_v50  ;;  %v11087_v19 = vsel %vm1457_vm7, 0.0, %v6483_v1 }
 0xc21   :  { %v6469_v0 = vsel %vm6453_vm11, %v6445_v49, %v6461_v54  ;;  %v6427_v10 = vmul.f32 %v11072_v13, %v6406_v52  ;;  %v6407_v63 = vadd.f32 %v6396_v34, %v6229_v22  ;;  %v11091_v15 = vsel %vm1457_vm7, %v6483_v1, 0.0 }
 0xc22   :  { %vm6454_vm13 = vcmp.gt.f32.partialorder %v6446_v56, 0.0  ;;  %v6462_v7 = vmul.f32 0.25, %v6446_v56  ;;  %v6398_v48 = vpop.f32.mrf.mxu1  ;;  %v6485_v9 = vrot.slane %v6469_v0, 7  ;;  %v6447_v14 = vadd.f32 %v11069_v20, %v6426_v8 }
 0xc23   :  { %v6408_v57 = vadd.f32 %v6398_v48, %v6231_v26  ;;  %v11101_v12 = vsel %vm1457_vm7, 0.0, %v6484_v37  ;;  %v11106_v21 = vsel %vm1457_vm7, %v6484_v37, 0.0  ;;  %v6448_v38 = vadd.f32 %v11076_v35, %v6427_v10  ;;  %v9626_v26 = vld [vmem:[#allocation10 + $0x2f0] sm:$0xff]  }
 0xc24   :  { %v6470_v62 = vsel %vm6454_vm13, %v6446_v56, %v6462_v7  ;;  %v11095_v53 = vsel %vm1457_vm7, 0.0, %v6485_v9  ;;  %v11098_v16 = vsel %vm1457_vm7, %v6485_v9, 0.0  ;;  %v8126_v2 = vpack.c.bf16 %v6485_v9, %v6483_v1  ;;  %v9625_v56 = vld [vmem:[#allocation10 + $0x2b8] sm:$0xff]  }
 0xc25   :  { %v6486_v17 = vrot.slane %v6470_v62, 7  ;;  %v6574_v18 = vrot.slane %v11095_v53, 1  ;;  %v6575_v47 = vrot.slane %v11098_v16, 1  ;;  %vm6455_vm15 = vcmp.gt.f32.partialorder %v6447_v14, 0.0 }
 0xc26   :  { %v6463_v27 = vmul.f32 0.25, %v6447_v14  ;;  %v6428_v31 = vmul.f32 %v11066_v45, %v6407_v63  ;;  %v6429_v4 = vmul.f32 %v11072_v13, %v6408_v57  ;;  %vm6456_vm8 = vcmp.gt.f32.partialorder %v6448_v38, 0.0  ;;  %v9627_v57 = vld [vmem:[#allocation10 + $0x2b0] sm:$0xff]  }
 0xc27   :  { %v8121_v29 = vpack.c.bf16 %v6486_v17, %v6484_v37  ;;  %v11112_v33 = vsel %vm1457_vm7, 0.0, %v6486_v17  ;;  %v11115_v61 = vsel %vm1457_vm7, %v6486_v17, 0.0  ;;  %v6464_v5 = vmul.f32 0.25, %v6448_v38 }
 0xc28   :  { %v6471_v39 = vsel %vm6455_vm15, %v6447_v14, %v6463_v27  ;;  %v6449_v40 = vadd.f32 %v11069_v20, %v6428_v31  ;;  %v6450_v43 = vadd.f32 %v11076_v35, %v6429_v4  ;;  %v6571_v45 = vrot.slane %v11101_v12, 1 }
 0xc29   :  { %v6487_v41 = vrot.slane %v6471_v39, 7  ;;  %8122 = vmatprep.mubr.msk.bf16.mxu1 %vm11020_vm6, %v8121_v29  ;;  %v6572_v13 = vrot.slane %v11106_v21, 1  ;;  %v6472_v42 = vsel %vm6456_vm8, %v6448_v38, %v6464_v5  ;;  %v6577_v24 = vrot.slane %v11112_v33, 1  ;;  %v9628_v38 = vld [vmem:[#allocation10 + $0x2e8] sm:$0xff]  }
 0xc2a   :  { %vm6457_vm0 = vcmp.gt.f32.partialorder %v6449_v40, 0.0  ;;  %v6465_v58 = vmul.f32 0.25, %v6449_v40  ;;  %8127 = vmatmul.mubr.msk.bf16.vlgmr.msra.gmra.mxu1 %vm11020_vm6, %v8126_v2  ;;  %v6568_v20 = vrot.slane %v11087_v19, 1  ;;  %v6569_v23 = vrot.slane %v11091_v15, 1 }
 0xc2b   :  { %v6488_v35 = vrot.slane %v6472_v42, 7  ;;  %vm6458_vm2 = vcmp.gt.f32.partialorder %v6450_v43, 0.0  ;;  %v11129_v44 = vsel %vm1457_vm7, 0.0, %v6487_v41  ;;  %v6466_v28 = vmul.f32 0.25, %v6450_v43  ;;  %v9634_v42 = vld [vmem:[#allocation10 + $0x2d0] sm:$0xff]  }
 0xc2c   :  { %v6473_v51 = vsel %vm6457_vm0, %v6449_v40, %v6465_v58  ;;  %v6578_v11 = vrot.slane %v11115_v61, 1  ;;  %v11133_v36 = vsel %vm1457_vm7, %v6487_v41, 0.0  ;;  %v6576_v59 = vsel %vm183_vm1, %v6574_v18, %v6575_v47  ;;  %v9629_v40 = vld [vmem:[#allocation10 + $0x2a8] sm:$0xff]   ;;  %v9635_v58 = vld [vmem:[#allocation10 + $0x290] sm:$0xff]  }
 0xc2d   :  { %v6489_v46 = vrot.slane %v6473_v51, 7  ;;  %v11137_v49 = vsel %vm1457_vm7, 0.0, %v6488_v35  ;;  %v6474_v1 = vsel %vm6458_vm2, %v6450_v43, %v6466_v28  ;;  %v6573_v6 = vsel %vm183_vm1, %v6571_v45, %v6572_v13  ;;  %v9632_v45 = vld [vmem:[#allocation10 + $0x2d8] sm:$0xff]  }
 0xc2e   :  { %v6579_v50 = vsel %vm183_vm1, %v6577_v24, %v6578_v11  ;;  %v11142_v55 = vsel %vm1457_vm7, %v6488_v35, 0.0  ;;  %v6490_v54 = vrot.slane %v6474_v1, 7  ;;  %v6570_v3 = vsel %vm183_vm1, %v6568_v20, %v6569_v23  ;;  %v9633_v13 = vld [vmem:[#allocation10 + $0x298] sm:$0xff]   ;;  %v9636_v24 = vld [vmem:[#allocation10 + $0x2c8] sm:$0xff]   ;;  %v9638_v23 = vld [vmem:[#allocation10 + $0x2c0] sm:$0xff]  }
 0xc2f   :  { %v11145_v32 = vsel %vm1457_vm7, 0.0, %v6489_v46  ;;  %v6601_v52 = vpack.c.bf16 %v6579_v50, %v6573_v6  ;;  %v11149_v34 = vsel %vm1457_vm7, %v6489_v46, 0.0  ;;  %v6600_v22 = vpack.c.bf16 %v6576_v59, %v6570_v3  ;;  %v9637_v20 = vld [vmem:[#allocation10 + $0x288] sm:$0xff]   ;;  %v9639_v1 = vld [vmem:[#allocation10 + $0x280] sm:$0xff]  }
 0xc30   :  { %v6583_v37 = vrot.slane %v11137_v49, 1  ;;  %v6584_v0 = vrot.slane %v11142_v55, 1  ;;  %v8131_v7 = vpack.c.bf16 %v6490_v54, %v6488_v35  ;;  %v8136_v8 = vpack.c.bf16 %v6489_v46, %v6487_v41 }
 0xc31   :  { %6765 = vmatprep.mubr.bf16.mxu0 %v6601_v52  ;;  %v11154_v48 = vsel %vm1457_vm7, 0.0, %v6490_v54  ;;  %v11157_v9 = vsel %vm1457_vm7, %v6490_v54, 0.0  ;;  %v6580_v62 = vrot.slane %v11129_v44, 1  ;;  %v6586_v14 = vrot.slane %v11145_v32, 1 }
 0xc32   :  { %6766 = vmatmul.mubr.bf16.vlgmr.msra.gmra.mxu0 %v6600_v22  ;;  %v6589_v10 = vrot.slane %v11154_v48, 1  ;;  %v6590_v63 = vrot.slane %v11157_v9, 1  ;;  %8132 = vmatprep.mubr.msk.bf16.mxu1 %vm11020_vm6, %v8131_v7  ;;  %v6585_v17 = vsel %vm183_vm1, %v6583_v37, %v6584_v0  ;;  %v6581_v18 = vrot.slane %v11133_v36, 1  ;;  %v7241_v37 = vld [vmem:[%s11435_s20 + $0x68] sm:$0xff]  ;;  %v7239_v0 = vld [vmem:[%s11435_s20 + $0x58] sm:$0xff]  ;;  %v7238_v7 = vld [vmem:[%s11435_s20 + $0x50] sm:$0xff] }
 0xc33   :  { %8570 = vmatpush3.bf16.msra.mxu0 %v9625_v56  ;;  %v6587_v47 = vrot.slane %v11149_v34, 1  ;;  %v6930_v2 = vrot.slane %v11101_v12, 2  ;;  %8137 = vmatmul.mubr.msk.bf16.gmra.mxu1 %vm11020_vm6, %v8136_v8  ;;  %v6931_v31 = vrot.slane %v11106_v21, 2  ;;  %v6936_v4 = vrot.slane %v11112_v33, 2  ;;  %v9630_v33 = vld [vmem:[#allocation10 + $0x2e0] sm:$0xff]   ;;  %v7242_v56 = vld [vmem:[%s11435_s20 + $0x70] sm:$0xff] }
 0xc34   :  { %8571 = vmatprep.subr.bf16.mxu0 %v9626_v26  ;;  %v6591_v27 = vsel %vm183_vm1, %v6589_v10, %v6590_v63  ;;  %v6937_v29 = vrot.slane %v11115_v61, 2  ;;  %9150 = vmatprep.mubr.msk.f32.mxu1 %vm9838_vm14, %v9837_v25  ;;  %v6582_v60 = vsel %vm183_vm1, %v6580_v62, %v6581_v18  ;;  %v9631_v61 = vld [vmem:[#allocation10 + $0x2a0] sm:$0xff]   ;;  %v6933_v35 = vrot.slane %v11095_v53, 2  ;;  %v7237_v8 = vld [vmem:[%s11435_s20 + $0x48] sm:$0xff]  ;;  %v7234_v10 = vld [vmem:[%s11435_s20 + $0x30] sm:$0xff] }
 0xc35   :  { %v6603_v39 = vpack.c.bf16 %v6591_v27, %v6585_v17  ;;  %v6588_v5 = vsel %vm183_vm1, %v6586_v14, %v6587_v47  ;;  %v6932_v21 = vsel %vm368_vm4, %v6930_v2, %v6931_v31  ;;  %v6934_v51 = vrot.slane %v11098_v16, 2  ;;  %v7233_v63 = vld [vmem:[%s11435_s20 + $0x28] sm:$0xff]  ;;  %v7232_v62 = vld [vmem:[%s11435_s20 + $0x20] sm:$0xff]  ;;  %v7231_v14 = vld [vmem:[%s11435_s20 + $0x18] sm:$0xff] }
 0xc36   :  { %v6938_v12 = vsel %vm368_vm4, %v6936_v4, %v6937_v29  ;;  %v6602_v41 = vpack.c.bf16 %v6588_v5, %v6582_v60  ;;  %v6948_v28 = vrot.slane %v11154_v48, 2  ;;  %v6949_v11 = vrot.slane %v11157_v9, 2  ;;  %v7236_v48 = vld [vmem:[%s11435_s20 + $0x40] sm:$0xff]  ;;  %v7235_v9 = vld [vmem:[%s11435_s20 + $0x38] sm:$0xff]  ;;  %v7229_v17 = vld [vmem:[%s11435_s20 + $0x8] sm:$0xff] }
 0xc37   :  { %8572 = vmatpush3.bf16.msra.mxu0 %v9627_v57  ;;  %6773 = vmatprep.mubr.bf16.mxu0 %v6603_v39  ;;  %v6960_v43 = vpack.c.bf16 %v6938_v12, %v6932_v21  ;;  %v6927_v46 = vrot.slane %v11087_v19, 2  ;;  %v6928_v59 = vrot.slane %v11091_v15, 2  ;;  %v6942_v6 = vrot.slane %v11137_v49, 2  ;;  %v7243_v15 = vld [vmem:[%s11435_s20 + $0x78] sm:$0xff]  ;;  %v7230_v57 = vld [vmem:[%s11435_s20 + $0x10] sm:$0xff]  ;;  %v7228_v18 = vld [vmem:[%s11435_s20] sm:$0xff] }
 0xc38   :  { %8573 = vmatprep.subr.bf16.mxu0 %v9628_v38  ;;  %v6943_v50 = vrot.slane %v11142_v55, 2  ;;  %v6935_v54 = vsel %vm368_vm4, %v6933_v35, %v6934_v51  ;;  %v6950_v53 = vsel %vm368_vm4, %v6948_v28, %v6949_v11  ;;  %v6945_v49 = vrot.slane %v11145_v32, 2  ;;  %v8177_v47 = vld [vmem:[%s11435_s20 + $0xf8] sm:$0xff]  ;;  %v8176_v2 = vld [vmem:[%s11435_s20 + $0xf0] sm:$0xff]  ;;  %v8175_v27 = vld [vmem:[%s11435_s20 + $0xe8] sm:$0xff] }
 0xc39   :  { %v6929_v16 = vsel %vm368_vm4, %v6927_v46, %v6928_v59  ;;  %v6946_v55 = vrot.slane %v11149_v34, 2  ;;  %v6939_v22 = vrot.slane %v11129_v44, 2  ;;  %v6940_v26 = vrot.slane %v11133_v36, 2  ;;  %v7240_v34 = vld [vmem:[%s11435_s20 + $0x60] sm:$0xff]  ;;  %9119 = vmatpush3.msra.mxu1 %v8177_v47  ;;  %v8173_v38 = vld [vmem:[%s11435_s20 + $0xd8] sm:$0xff]  ;;  %v8172_v31 = vld [vmem:[%s11435_s20 + $0xd0] sm:$0xff] }
 0xc3a   :  { %6774 = vmatmul.mubr.bf16.gmra.mxu0 %v6602_v41  ;;  %v6959_v52 = vpack.c.bf16 %v6935_v54, %v6929_v16  ;;  %v6944_v19 = vsel %vm368_vm4, %v6942_v6, %v6943_v50  ;;  %9120 = vmatprep.subr.mxu1 %v9837_v25  ;;  %v8171_v4 = vld [vmem:[%s11435_s20 + $0xc8] sm:$0xff]  ;;  %v8170_v29 = vld [vmem:[%s11435_s20 + $0xc0] sm:$0xff]  ;;  %v8169_v39 = vld [vmem:[%s11435_s20 + $0xb8] sm:$0xff] }
 0xc3b   :  { %8574 = vmatpush3.bf16.msra.mxu0 %v9629_v40  ;;  %7124 = vmatprep.mubr.bf16.mxu0 %v6960_v43  ;;  %v6962_v3 = vpack.c.bf16 %v6950_v53, %v6944_v19  ;;  %v6947_v32 = vsel %vm368_vm4, %v6945_v49, %v6946_v55  ;;  %v6941_v44 = vsel %vm368_vm4, %v6939_v22, %v6940_v26  ;;  %v8168_v5 = vld [vmem:[%s11435_s20 + $0xb0] sm:$0xff]  ;;  %v8167_v12 = vld [vmem:[%s11435_s20 + $0xa8] sm:$0xff]  ;;  %v8166_v60 = vld [vmem:[%s11435_s20 + $0xa0] sm:$0xff] }
 0xc3c   :  { %8575 = vmatprep.subr.bf16.mxu0 %v9630_v33  ;;  %v6961_v36 = vpack.c.bf16 %v6947_v32, %v6941_v44  ;;  %9121 = vmatpush3.msra.mxu1 %v8176_v2  ;;  %v8165_v40 = vld [vmem:[%s11435_s20 + $0x98] sm:$0xff]  ;;  %v8164_v41 = vld [vmem:[%s11435_s20 + $0x90] sm:$0xff]  ;;  %v8163_v21 = vld [vmem:[%s11435_s20 + $0x88] sm:$0xff] }
 0xc3d   :  { %9122 = vmatprep.subr.mxu1 %v9837_v25  ;;  %v8162_v33 = vld [vmem:[%s11435_s20 + $0x80] sm:$0xff] }
 0xc3e   :  { %9123 = vmatpush3.msra.mxu1 %v8175_v27 }
 0xc3f   :  { %8576 = vmatpush3.bf16.msra.mxu0 %v9631_v61  ;;  %9124 = vmatprep.subr.mxu1 %v9837_v25 }
 0xc40   :  { %8577 = vmatprep.subr.bf16.mxu0 %v9632_v45 }
 0xc43   :  { %8578 = vmatpush3.bf16.msra.mxu0 %v9633_v13 }
 0xc44   :  { %8579 = vmatprep.subr.bf16.mxu0 %v9634_v42 }
 0xc47   :  { %8580 = vmatpush3.bf16.msra.mxu0 %v9635_v58 }
 0xc48   :  { %8581 = vmatprep.subr.bf16.mxu0 %v9636_v24 }
 0xc4b   :  { %8582 = vmatpush3.bf16.msra.mxu0 %v9637_v20 }
 0xc4c   :  { %8583 = vmatprep.subr.bf16.mxu0 %v9638_v23 }
 0xc4f   :  { %8584 = vmatpush3.bf16.msra.mxu0 %v9639_v1 }
 0xc50   :  { %9153 = vmatprep.subr.mxu0 %v9837_v25 }
 0xc52   :  { %7125 = vmatmul.mubr.bf16.vlgmr.msra.gmra.mxu0 %v6959_v52  ;;  %v8155_v52 = vld [vmem:[%s11433_s18 + $0x1] ss:$0 sm:$0xff] }
 0xc53   :  { %7132 = vmatprep.mubr.bf16.mxu0 %v6962_v3  ;;  %9154 = vmatpush3.msra.mxu0 %v7243_v15 }
 0xc54   :  { %9155 = vmatprep.subr.mxu0 %v9837_v25 }
 0xc55   :  { %9156 = vmatpush3.msra.mxu0 %v7242_v56  ;;  %v8157_v56 = vld [vmem:[%s11434_s19 + $0x1] ss:$0 sm:$0xff] }
 0xc56   :  { %9157 = vmatprep.subr.mxu0 %v9837_v25 }
 0xc57   :  { %9158 = vmatpush3.msra.mxu0 %v7241_v37 }
 0xc58   :  { %9159 = vmatprep.subr.mxu0 %v9837_v25 }
 0xc59   :  { %9160 = vmatpush3.msra.mxu0 %v7240_v34 }
 0xc5a   :  { %7133 = vmatmul.mubr.bf16.gmra.mxu0 %v6961_v36  ;;  %9161 = vmatprep.subr.mxu0 %v9837_v25 }
 0xc5b   :  { %9162 = vmatpush3.msra.mxu0 %v7239_v0  ;;  %9185 = vmatprep.mubr.msk.f32.mxu0 %vm9838_vm14, %v9837_v25 }
 0xc5c   :  { %9163 = vmatprep.subr.mxu0 %v9837_v25 }
 0xc5d   :  { %9164 = vmatpush3.msra.mxu0 %v7238_v7 }
 0xc5e   :  { %9165 = vmatprep.subr.mxu0 %v9837_v25 }
 0xc5f   :  { %9166 = vmatpush3.msra.mxu0 %v7237_v8 }
 0xc60   :  { %9167 = vmatprep.subr.mxu0 %v9837_v25 }
 0xc61   :  { %9168 = vmatpush3.msra.mxu0 %v7236_v48 }
 0xc62   :  { %9169 = vmatprep.subr.mxu0 %v9837_v25 }
 0xc63   :  { %9170 = vmatpush3.msra.mxu0 %v7235_v9 }
 0xc64   :  { %9171 = vmatprep.subr.mxu0 %v9837_v25 }
 0xc65   :  { %9172 = vmatpush3.msra.mxu0 %v7234_v10 }
 0xc66   :  { %9173 = vmatprep.subr.mxu0 %v9837_v25 }
 0xc67   :  { %9174 = vmatpush3.msra.mxu0 %v7233_v63 }
 0xc68   :  { %9175 = vmatprep.subr.mxu0 %v9837_v25 }
 0xc69   :  { %9176 = vmatpush3.msra.mxu0 %v7232_v62 }
 0xc6a   :  { %9177 = vmatprep.subr.mxu0 %v9837_v25 }
 0xc6b   :  { %9178 = vmatpush3.msra.mxu0 %v7231_v14 }
 0xc6c   :  { %9179 = vmatprep.subr.mxu0 %v9837_v25 }
 0xc6d   :  { %9180 = vmatpush3.msra.mxu0 %v7230_v57 }
 0xc6e   :  { %9181 = vmatprep.subr.mxu0 %v9837_v25 }
 0xc6f   :  { %9182 = vmatpush3.msra.mxu0 %v7229_v17 }
 0xc70   :  { %9183 = vmatprep.subr.mxu0 %v9837_v25 }
 0xc71   :  { %9184 = vmatpush3.msra.mxu0 %v7228_v18 }
 0xc72   :  { %9186 = vmatmul.mubr.f32.vlgmr.msra.gmra.mxu0 %v10604_v30  ;;  %v8174_v30 = vld [vmem:[%s11435_s20 + $0xe0] sm:$0xff] }
 0xc73   :  { %9125 = vmatpush3.msra.mxu1 %v8174_v30 }
 0xc74   :  { %9126 = vmatprep.subr.mxu1 %v9837_v25 }
 0xc75   :  { %9127 = vmatpush3.msra.mxu1 %v8173_v38 }
 0xc76   :  { %9128 = vmatprep.subr.mxu1 %v9837_v25 }
 0xc77   :  { %9129 = vmatpush3.msra.mxu1 %v8172_v31 }
 0xc78   :  { %9130 = vmatprep.subr.mxu1 %v9837_v25 }
 0xc79   :  { %9131 = vmatpush3.msra.mxu1 %v8171_v4 }
 0xc7a   :  { %9132 = vmatprep.subr.mxu1 %v9837_v25 }
 0xc7b   :  { %9133 = vmatpush3.msra.mxu1 %v8170_v29 }
 0xc7c   :  { %9134 = vmatprep.subr.mxu1 %v9837_v25 }
 0xc7d   :  { %9135 = vmatpush3.msra.mxu1 %v8169_v39 }
 0xc7e   :  { %9136 = vmatprep.subr.mxu1 %v9837_v25 }
 0xc7f   :  { %9137 = vmatpush3.msra.mxu1 %v8168_v5 }
 0xc80   :  { %9138 = vmatprep.subr.mxu1 %v9837_v25 }
 0xc81   :  { %9139 = vmatpush3.msra.mxu1 %v8167_v12 }
 0xc82   :  { %9140 = vmatprep.subr.mxu1 %v9837_v25 }
 0xc83   :  { %9141 = vmatpush3.msra.mxu1 %v8166_v60 }
 0xc84   :  { %9142 = vmatprep.subr.mxu1 %v9837_v25 }
 0xc85   :  { %9143 = vmatpush3.msra.mxu1 %v8165_v40 }
 0xc86   :  { %9144 = vmatprep.subr.mxu1 %v9837_v25 }
 0xc87   :  { %9145 = vmatpush3.msra.mxu1 %v8164_v41 }
 0xc88   :  { %9146 = vmatprep.subr.mxu1 %v9837_v25 }
 0xc89   :  { %9147 = vmatpush3.msra.mxu1 %v8163_v21 }
 0xc8a   :  { %9148 = vmatprep.subr.mxu1 %v9837_v25 }
 0xc8b   :  { %9149 = vmatpush3.msra.mxu1 %v8162_v33 }
 0xc8c   :  { %9188 = vmatprep.subr.mxu1 %v9837_v25 }
 0xcea   :  { %v8557_v13 = vpop.f32.mrf.mxu1 }
 0xcec   :  { %v8558_v58 = vpop.f32.mrf.mxu1 }
 0xced   :  { %v8559_v1 = vadd.f32 %v8558_v58, %v8557_v13 }
 0xcee   :  { %v8560_v20 = vpop.f32.mrf.mxu1 }
 0xcf0   :  { %v8561_v35 = vpop.f32.mrf.mxu1 }
 0xcf1   :  { %v8562_v15 = vadd.f32 %v8561_v35, %v8560_v20 }
 0xcf2   :  { %v8529_v43 = vpop.f32.mrf.mxu0 }
 0xcf3   :  { %v8563_v28 = vpop.f32.mrf.mxu1 }
 0xcf4   :  { %v8530_v61 = vpop.f32.mrf.mxu0 }
 0xcf5   :  { %v8531_v46 = vadd.f32 %v8530_v61, %v8529_v43  ;;  %v8564_v6 = vpop.f32.mrf.mxu1 }
 0xcf6   :  { %v8532_v45 = vpop.f32.mrf.mxu0  ;;  %v8565_v34 = vadd.f32 %v8564_v6, %v8563_v28 }
 0xcf7   :  { %v6913_v54 = vadd.f32 %v8559_v1, %v8531_v46  ;;  %v8566_v49 = vpop.f32.mrf.mxu1 }
 0xcf8   :  { %v8533_v42 = vpop.f32.mrf.mxu0 }
 0xcf9   :  { %v8534_v53 = vadd.f32 %v8533_v42, %v8532_v45  ;;  %v8567_v8 = vpop.f32.mrf.mxu1 }
 0xcfa   :  { %v8535_v24 = vpop.f32.mrf.mxu0  ;;  %v8568_v57 = vadd.f32 %v8567_v8, %v8566_v49  ;;  %v8193_v49 = vld [vmem:[%s11435_s20 + $0x178] sm:$0xff] }
 0xcfb   :  { %v6916_v26 = vadd.f32 %v8562_v15, %v8534_v53 }
 0xcfc   :  { %v8536_v23 = vpop.f32.mrf.mxu0 }
 0xcfd   :  { %v8537_v55 = vadd.f32 %v8536_v23, %v8535_v24 }
 0xcfe   :  { %v8538_v51 = vpop.f32.mrf.mxu0 }
 0xcff   :  { %v6921_v7 = vadd.f32 %v8565_v34, %v8537_v55  ;;  %v8190_v34 = vld [vmem:[%s11435_s20 + $0x160] sm:$0xff] }
 0xd00   :  { %v8539_v11 = vpop.f32.mrf.mxu0 }
 0xd01   :  { %v8540_v9 = vadd.f32 %v8539_v11, %v8538_v51 }
 0xd03   :  { %v6924_v2 = vadd.f32 %v8568_v57, %v8540_v9  ;;  %v8184_v57 = vld [vmem:[%s11435_s20 + $0x130] sm:$0xff] }
 0xd12   :  { %v8585_v59 = vpop.f32.mrf.mxu0 }
 0xd14   :  { %v8586_v50 = vpop.f32.mrf.mxu0 }
 0xd15   :  { %v8587_v16 = vadd.f32 %v8586_v50, %v8585_v59 }
 0xd16   :  { %v8588_v19 = vpop.f32.mrf.mxu0 }
 0xd17   :  { %v7141_v3 = vadd.f32 %v8587_v16, %v6913_v54 }
 0xd18   :  { %v8589_v22 = vpop.f32.mrf.mxu0 }
 0xd19   :  { %v7153_v37 = vmul.f32 %v8155_v52, %v7141_v3  ;;  %v8590_v32 = vadd.f32 %v8589_v22, %v8588_v19  ;;  %v8192_v22 = vld [vmem:[%s11435_s20 + $0x170] sm:$0xff] }
 0xd1a   :  { %v8591_v44 = vpop.f32.mrf.mxu0 }
 0xd1b   :  { %v7165_v36 = vadd.f32 %v8157_v56, %v7153_v37  ;;  %v7142_v0 = vadd.f32 %v8590_v32, %v6916_v26  ;;  %v8191_v37 = vld [vmem:[%s11435_s20 + $0x168] sm:$0xff] }
 0xd1c   :  { %v8592_v48 = vpop.f32.mrf.mxu0 }
 0xd1d   :  { %v7173_v10 = vmul.f32 1.442695, %v7165_v36  ;;  %v7154_v63 = vmul.f32 %v8155_v52, %v7142_v0  ;;  %v8593_v62 = vadd.f32 %v8592_v48, %v8591_v44  ;;  %vm7169_vm1 = vcmp.gt.f32.partialorder %v7165_v36, 0.0  ;;  %v8187_v48 = vld [vmem:[%s11435_s20 + $0x148] sm:$0xff] }
 0xd1e   :  { %v8594_v14 = vpop.f32.mrf.mxu0 }
 0xd1f   :  { %9664 = vpow2.f32 %v7173_v10  ;;  %v7166_v17 = vadd.f32 %v8157_v56, %v7154_v63  ;;  %v7143_v18 = vadd.f32 %v8593_v62, %v6921_v7  ;;  %v8188_v7 = vld [vmem:[%s11435_s20 + $0x150] sm:$0xff]  ;;  %v8186_v10 = vld [vmem:[%s11435_s20 + $0x140] sm:$0xff]  ;;  %v8185_v62 = vld [vmem:[%s11435_s20 + $0x138] sm:$0xff] }
 0xd20   :  { %v8595_v47 = vpop.f32.mrf.mxu0 }
 0xd21   :  { %v7175_v27 = vmul.f32 1.442695, %v7166_v17  ;;  %v8596_v30 = vadd.f32 %v8595_v47, %v8594_v14  ;;  %v7155_v38 = vmul.f32 %v8155_v52, %v7143_v18  ;;  %vm7170_vm4 = vcmp.gt.f32.partialorder %v7166_v17, 0.0  ;;  %v8183_v18 = vld [vmem:[%s11435_s20 + $0x128] sm:$0xff] }
 0xd23   :  { %9666 = vpow2.f32 %v7175_v27  ;;  %v7144_v31 = vadd.f32 %v8596_v30, %v6924_v2  ;;  %v7167_v29 = vadd.f32 %v8157_v56, %v7155_v38  ;;  %v8182_v2 = vld [vmem:[%s11435_s20 + $0x120] sm:$0xff]  ;;  %v8181_v30 = vld [vmem:[%s11435_s20 + $0x118] sm:$0xff] }
 0xd25   :  { %v7156_v4 = vmul.f32 %v8155_v52, %v7144_v31  ;;  %v7177_v12 = vmul.f32 1.442695, %v7167_v29  ;;  %vm7171_vm3 = vcmp.gt.f32.partialorder %v7167_v29, 0.0  ;;  %v8180_v31 = vld [vmem:[%s11435_s20 + $0x110] sm:$0xff] }
 0xd27   :  { %v7168_v39 = vadd.f32 %v8157_v56, %v7156_v4 }
 0xd29   :  { %v7179_v5 = vmul.f32 1.442695, %v7168_v39  ;;  %vm7172_vm7 = vcmp.gt.f32.partialorder %v7168_v39, 0.0 }
 0xd2b   :  { %9668 = vpow2.f32 %v7179_v5  ;;  %v8178_v5 = vld [vmem:[%s11435_s20 + $0x100] sm:$0xff] }
 0xd2c   :  { %v9665_v60 = vpop.eup %9664  ;;  %9670 = vpow2.f32 %v7177_v12 }
 0xd2d   :  { %v8158_v40 = vadd.f32 -1.0, %v9665_v60 }
 0xd2f   :  { %v7185_v41 = vmul.f32 0.3, %v8158_v40 }
 0xd30   :  { %v9667_v21 = vpop.eup %9666 }
 0xd31   :  { %v7189_v33 = vsel %vm7169_vm1, %v7165_v36, %v7185_v41  ;;  %v8159_v43 = vadd.f32 -1.0, %v9667_v21  ;;  %v8189_v36 = vld [vmem:[%s11435_s20 + $0x158] sm:$0xff] }
 0xd32   :  { %v7193_v61 = vrot.slane %v7189_v33, 4  ;;  %v11336_v45 = vpop.f32.mrf.mxu0 }
 0xd33   :  { %v7186_v13 = vmul.f32 0.3, %v8159_v43 }
 0xd34   :  { %v7194_v42 = vadd.f32 %v7193_v61, %v7189_v33  ;;  %v9187_v58 = vpop.f32.mrf.mxu0 }
 0xd35   :  { %v7190_v24 = vsel %vm7170_vm4, %v7166_v17, %v7186_v13 }
 0xd36   :  { %v7195_v20 = vrot.slane %v7194_v42, 2  ;;  %v7199_v23 = vrot.slane %v7190_v24, 4 }
 0xd38   :  { %v7196_v35 = vadd.f32 %v7195_v20, %v7194_v42  ;;  %v7200_v51 = vadd.f32 %v7199_v23, %v7190_v24  ;;  %v9669_v28 = vpop.eup %9668 }
 0xd39   :  { %v9671_v59 = vpop.eup %9670  ;;  %v8161_v6 = vadd.f32 -1.0, %v9669_v28 }
 0xd3a   :  { %v7201_v11 = vrot.slane %v7200_v51, 2  ;;  %v7197_v46 = vrot.slane %v7196_v35, 1  ;;  %v8160_v53 = vadd.f32 -1.0, %v9671_v59 }
 0xd3b   :  { %v7188_v52 = vmul.f32 0.3, %v8161_v6 }
 0xd3c   :  { %v7202_v1 = vadd.f32 %v7201_v11, %v7200_v51  ;;  %v7198_v50 = vadd.f32 %v7197_v46, %v7196_v35  ;;  %v7187_v3 = vmul.f32 0.3, %v8160_v53 }
 0xd3d   :  { %v7192_v56 = vsel %vm7172_vm7, %v7168_v39, %v7188_v52 }
 0xd3e   :  { %v7203_v54 = vrot.slane %v7202_v1, 1  ;;  %v7218_v19 = vmul.f32 0.125, %v7198_v50  ;;  %v7191_v26 = vsel %vm7171_vm3, %v7167_v29, %v7187_v3  ;;  %v7211_v32 = vrot.slane %v7192_v56, 4  ;;  %v8179_v29 = vld [vmem:[%s11435_s20 + $0x108] sm:$0xff] }
 0xd3f   :  { %v7205_v44 = vrot.slane %v7191_v26, 4 }
 0xd40   :  { %v7204_v16 = vadd.f32 %v7203_v54, %v7202_v1  ;;  %v7212_v0 = vadd.f32 %v7211_v32, %v7192_v56 }
 0xd41   :  { %v7206_v8 = vadd.f32 %v7205_v44, %v7191_v26 }
 0xd42   :  { %v7219_v15 = vmul.f32 0.125, %v7204_v16  ;;  %v7213_v9 = vrot.slane %v7212_v0, 2 }
 0xd43   :  { %v7207_v63 = vrot.slane %v7206_v8, 2 }
 0xd44   :  { %v7263_v55 = vsel %vm7224_vm9, %v7219_v15, %v7218_v19  ;;  %v7214_v14 = vadd.f32 %v7213_v9, %v7212_v0 }
 0xd45   :  { %9151 = vmatmul.mubr.f32.vlgmr.msra.gmra.mxu1 %v7263_v55  ;;  %v7208_v17 = vadd.f32 %v7207_v63, %v7206_v8 }
 0xd46   :  { %9189 = vmatpush3.msra.mxu1 %v8193_v49  ;;  %9220 = vmatprep.mubr.msk.f32.mxu1 %vm9838_vm14, %v9837_v25  ;;  %v7215_v47 = vrot.slane %v7214_v14, 1 }
 0xd47   :  { %9190 = vmatprep.subr.mxu1 %v9837_v25  ;;  %v7209_v27 = vrot.slane %v7208_v17, 1 }
 0xd48   :  { %9191 = vmatpush3.msra.mxu1 %v8192_v22  ;;  %v7216_v38 = vadd.f32 %v7215_v47, %v7214_v14 }
 0xd49   :  { %9192 = vmatprep.subr.mxu1 %v9837_v25  ;;  %v7210_v4 = vadd.f32 %v7209_v27, %v7208_v17 }
 0xd4a   :  { %9193 = vmatpush3.msra.mxu1 %v8191_v37  ;;  %v7221_v39 = vmul.f32 0.125, %v7216_v38 }
 0xd4b   :  { %9194 = vmatprep.subr.mxu1 %v9837_v25  ;;  %v7220_v12 = vmul.f32 0.125, %v7210_v4 }
 0xd4c   :  { %9195 = vmatpush3.msra.mxu1 %v8190_v34 }
 0xd4d   :  { %9196 = vmatprep.subr.mxu1 %v9837_v25  ;;  %v7424_v60 = vsel %vm7224_vm9, %v7221_v39, %v7220_v12 }
 0xd4e   :  { %9197 = vmatpush3.msra.mxu1 %v8189_v36 }
 0xd4f   :  { %9198 = vmatprep.subr.mxu1 %v9837_v25 }
 0xd50   :  { %9199 = vmatpush3.msra.mxu1 %v8188_v7 }
 0xd51   :  { %9200 = vmatprep.subr.mxu1 %v9837_v25 }
 0xd52   :  { %9201 = vmatpush3.msra.mxu1 %v8187_v48 }
 0xd53   :  { %9202 = vmatprep.subr.mxu1 %v9837_v25 }
 0xd54   :  { %9203 = vmatpush3.msra.mxu1 %v8186_v10 }
 0xd55   :  { %9204 = vmatprep.subr.mxu1 %v9837_v25 }
 0xd56   :  { %9205 = vmatpush3.msra.mxu1 %v8185_v62 }
 0xd57   :  { %9206 = vmatprep.subr.mxu1 %v9837_v25 }
 0xd58   :  { %9207 = vmatpush3.msra.mxu1 %v8184_v57 }
 0xd59   :  { %9208 = vmatprep.subr.mxu1 %v9837_v25 }
 0xd5a   :  { %9209 = vmatpush3.msra.mxu1 %v8183_v18 }
 0xd5b   :  { %9210 = vmatprep.subr.mxu1 %v9837_v25 }
 0xd5c   :  { %9211 = vmatpush3.msra.mxu1 %v8182_v2 }
 0xd5d   :  { %9212 = vmatprep.subr.mxu1 %v9837_v25 }
 0xd5e   :  { %9213 = vmatpush3.msra.mxu1 %v8181_v30 }
 0xd5f   :  { %9214 = vmatprep.subr.mxu1 %v9837_v25 }
 0xd60   :  { %9215 = vmatpush3.msra.mxu1 %v8180_v31 }
 0xd61   :  { %9216 = vmatprep.subr.mxu1 %v9837_v25 }
 0xd62   :  { %9217 = vmatpush3.msra.mxu1 %v8179_v29 }
 0xd63   :  { %9218 = vmatprep.subr.mxu1 %v9837_v25 }
 0xd64   :  { %9219 = vmatpush3.msra.mxu1 %v8178_v5 }
 0xd65   :  { %9221 = vmatmul.mubr.f32.vlgmr.msra.gmra.mxu1 %v7424_v60 }
 0xd66   :  { %9787 = shalt.err (!%p9784_p1)
}
 0xd67   :  { %7516 = dma.vmem_to_hbm [thread:$0]  %s7514_s10, 32, %s11437_s22, [#allocation4]   ;;  %v8194_v33 = vld [vmem:[%s11436_s21] ss:$0 sm:$0xff]  ;;  %vm7505_vm14 = vcmask 41984  }
 0xd68   :  { %s9840_s11 = smov [#allocation12]  }
 0xd69   :  { %s7523_s23 = sshll.u32 %s9840_s11, 4  ;;  %s7524_s23 = int_to_ptr.vmem [resolvable:$true] %s7523_s23 }
 0xd6a   :  { %s9796_s15 = scalar_lea.vmem %s7524_s23, 32  ;;  %p9801_p3 = scmp.lt.s32.totalorder %s7524_s23, %s7524_s23 }
 0xd6b   :  { %p9797_p2 = scmp.ne.s32.totalorder %s7524_s23, %s9796_s15  ;;  %p9802_p4 = scmp.lt.s32.totalorder %s9796_s15, %s9796_s15 }
 0xd6d   :  { %p9803_p5 = por %p9802_p4, %p9801_p3 }
 0xd6f   :  { %p9804_p6 = pnand %p9803_p5, %p9797_p2 }
 0xe05   :  { %v7331_v40 = vpop.f32.mrf.mxu1 }
 0xe06   :  { %v7402_v41 = vadd.f32 %v11336_v45, %v7331_v40 }
 0xe07   :  { %v9152_v25 = vpop.f32.mrf.mxu1 }
 0xe25   :  { %v7492_v21 = vpop.f32.mrf.mxu1 }
 0xe26   :  { %v7496_v43 = vadd.f32 %v7492_v21, %v7402_v41 }
 0xe27   :  { %v9222_v61 = vpop.f32.mrf.mxu1 }
 0xe28   :  { %v7504_v13 = vadd.f32 %v8194_v33, %v7496_v43 }
 0xe2a   :  { %7506 = vst.msk [vmem:[#allocation12] sm:$0x3] %vm7505_vm14, %v7504_v13 }
 0xe2b   :  { %9807 = shalt.err (!%p9804_p6)
}
 0xe2c   :  { %s11467_s5 = sld [smem:[#allocation27_spill]] }
 0xe32   :  { %7526 = dma.vmem_to_hbm [thread:$0]  %s7524_s23, 32, %s11467_s5, [#allocation13]  }
 0xe33   :  { %9822 = dma.done.wait [#allocation4], 32  }
 0xe34   :  { %9823 = vsyncadd [#allocation4], 4294967264 }
 0xe35   :  { %9824 = dma.done.wait [#allocation13], 32  }
 0xe36   :  { %9825 = vsyncadd [#allocation13], 4294967264 }
 0xe37   :  { %7533 = vsyncpa [#allocation3], 1 }
 0xe38   :  { %7534 = vsyncpa [#allocation6], 1 }
 0xe39   :  { %7535 = vsyncpa [#allocation9], 1 }
 0xe3a   :  { %7536 = vsyncpa [#allocation4], 1 }
 0xe3b   :  { %7537 = vsyncpa [#allocation13], 1 }

</bundles_post_ra>
